<compile_context>
chip_gen: v7x
topology: tpu7x:2x2x1
jax: 0.10.0
libtpu: 0.0.40
codegen_flags: <defaults>
</compile_context>

<pallas_src>
import math

import jax
import jax.numpy as jnp
from jax.experimental import pallas as pl
from jax.experimental.pallas import tpu as pltpu

BN_EPS = 1e-5
HID = 512


def _r2_kernel(x_ref, w1_ref, b1_ref, w2_ref, b2_ref, sigmask_ref, out_ref):
    x = x_ref[...]                              # (TN, C, HW) float32
    hw = x.shape[-1]

    # --- one-pass spatial statistics over the lane (HW) axis ---
    sum_x = jnp.sum(x, axis=-1)                 # (TN, C)
    sumsq = jnp.sum(x * x, axis=-1)             # (TN, C)
    max_x = jnp.max(x, axis=-1)                 # (TN, C)
    mean_x = sum_x * (1.0 / hw)
    # unbiased variance: (sum(x^2) - hw*mean^2) / (hw - 1)
    var = jnp.maximum(sumsq - mean_x * sum_x, 0.0) / (hw - 1)
    std = jnp.sqrt(var)                         # (TN, C)

    sig = jax.nn.sigmoid(x)
    mean_s = jnp.mean(sig, axis=-1)             # (TN, C)
    max_s = jax.nn.sigmoid(max_x)               # exact: sigmoid is monotonic

    # --- fused BN1 + Linear(216, 512), no lane-axis concat ---
    # feat = [max_x, max_s, std, mean_x, mean_s, std]; the two std blocks of
    # the (BN-folded) W1 were merged in the wrapper, giving 5 (C, 512) blocks.
    z = (jnp.dot(max_x, w1_ref[0], preferred_element_type=jnp.float32)
         + jnp.dot(max_s, w1_ref[1], preferred_element_type=jnp.float32)
         + jnp.dot(std, w1_ref[2], preferred_element_type=jnp.float32)
         + jnp.dot(mean_x, w1_ref[3], preferred_element_type=jnp.float32)
         + jnp.dot(mean_s, w1_ref[4], preferred_element_type=jnp.float32)
         + b1_ref[...])
    h = jnp.maximum(z, 0.0)                     # ReLU

    # --- fused BN2 + Linear(512, n_out_pad) ---
    y = jnp.dot(h, w2_ref[...], preferred_element_type=jnp.float32) + b2_ref[...]

    # x7[:, sigmoid_idx] = sigmoid(...); x7 = relu(x7)
    y = jnp.where(sigmask_ref[...] > 0.5, jax.nn.sigmoid(y), y)
    out_ref[...] = jnp.maximum(y, 0.0)


def prepare_kernel_params(params, sigmoid_idx, c_in):
    """One-time wrapper-side precompute: BN folding, W1 block split, padding."""
    f_in = 6 * c_in
    n_out = params["w2"].shape[1]
    n_out_pad = max(128, ((n_out + 127) // 128) * 128)

    # Fold BN1 (before Linear1): h = feat*s1 + t1 ; z = h@W1 + b1
    s1 = params["bn1_g"] * jax.lax.rsqrt(params["bn1_v"] + BN_EPS)   # (1, 216)
    t1 = params["bn1_b"] - params["bn1_m"] * s1
    w1f = s1.reshape(f_in, 1) * params["w1"]                         # (216, 512)
    b1f = t1 @ params["w1"] + params["b1"]                           # (1, 512)

    # Split W1 into the 6 feature blocks; merge the two std blocks.
    blk = [w1f[i * c_in:(i + 1) * c_in] for i in range(6)]
    wstack = jnp.stack([blk[0], blk[1], blk[2] + blk[5], blk[3], blk[4]],
                       axis=0)                                       # (5, C, 512)

    # Fold BN2 (after ReLU, before Linear2): y = relu(z)@(s2*W2) + (t2@W2 + b2)
    s2 = params["bn2_g"] * jax.lax.rsqrt(params["bn2_v"] + BN_EPS)   # (1, 512)
    t2 = params["bn2_b"] - params["bn2_m"] * s2
    w2f = s2.reshape(HID, 1) * params["w2"]                          # (512, n_out)
    b2f = t2 @ params["w2"] + params["b2"]                           # (1, n_out)

    # Pad the output dim to a full 128-lane width (unmasked stores); sliced back.
    w2p = jnp.zeros((HID, n_out_pad), jnp.float32).at[:, :n_out].set(w2f)
    b2p = jnp.zeros((1, n_out_pad), jnp.float32).at[:, :n_out].set(b2f)
    sigmask = jnp.zeros((1, n_out_pad), jnp.float32)
    sigmask = sigmask.at[0, jnp.array(sigmoid_idx)].set(1.0)

    return dict(wstack=wstack, b1=b1f, w2=w2p, b2=b2p, sigmask=sigmask,
                n_out=n_out, n_out_pad=n_out_pad)


def r2_forward(x_nchw, kp, tile_n=8):
    """Fused R2 forward. kp = prepare_kernel_params(...) output."""
    n, c, h, w = x_nchw.shape
    hw = h * w
    x = x_nchw.reshape(n, c, hw).astype(jnp.float32)

    # Pad batch to a multiple of the tile (sublane-aligned, enables pipelining).
    n_pad = ((n + tile_n - 1) // tile_n) * tile_n
    if n_pad != n:
        x = jnp.pad(x, ((0, n_pad - n), (0, 0), (0, 0)))

    p = kp["n_out_pad"]
    wstack_shape = kp["wstack"].shape

    out = pl.pallas_call(
        _r2_kernel,
        grid=(n_pad // tile_n,),
        in_specs=[
            pl.BlockSpec((tile_n, c, hw), lambda i: (i, 0, 0)),   # x tile
            pl.BlockSpec(wstack_shape, lambda i: (0, 0, 0)),      # W1 blocks (resident)
            pl.BlockSpec((1, HID), lambda i: (0, 0)),             # b1
            pl.BlockSpec((HID, p), lambda i: (0, 0)),             # W2 (padded)
            pl.BlockSpec((1, p), lambda i: (0, 0)),               # b2 (padded)
            pl.BlockSpec((1, p), lambda i: (0, 0)),               # sigmoid mask
        ],
        out_specs=pl.BlockSpec((tile_n, p), lambda i: (i, 0)),
        out_shape=jax.ShapeDtypeStruct((n_pad, p), jnp.float32),
        compiler_params=pltpu.CompilerParams(
            dimension_semantics=("parallel",)),
    )(x, kp["wstack"], kp["b1"], kp["w2"], kp["b2"], kp["sigmask"])

    return out[:n, :kp["n_out"]]


def init_params(key, c_in=36, n_out=8):
    """Deterministic synthetic parameters matching the head shapes."""
    f_in = 6 * c_in          # 216
    hid = HID
    ks = jax.random.split(key, 6)

    def linear(k, fan_in, fan_out):
        kw, kb = jax.random.split(k)
        bound = 1.0 / math.sqrt(fan_in)
        w = jax.random.uniform(kw, (fan_in, fan_out), jnp.float32, -bound, bound)
        b = jax.random.uniform(kb, (1, fan_out), jnp.float32, -bound, bound)
        return w, b

    w1, b1 = linear(ks[0], f_in, hid)
    w2, b2 = linear(ks[1], hid, n_out)
    return dict(
        w1=w1, b1=b1, w2=w2, b2=b2,
        bn1_g=jnp.ones((1, f_in), jnp.float32),
        bn1_b=jnp.zeros((1, f_in), jnp.float32),
        bn1_m=0.1 * jax.random.normal(ks[2], (1, f_in), jnp.float32),
        bn1_v=1.0 + 0.1 * jax.random.uniform(ks[3], (1, f_in), dtype=jnp.float32),
        bn2_g=jnp.ones((1, hid), jnp.float32),
        bn2_b=jnp.zeros((1, hid), jnp.float32),
        bn2_m=0.1 * jax.random.normal(ks[4], (1, hid), jnp.float32),
        bn2_v=1.0 + 0.1 * jax.random.uniform(ks[5], (1, hid), dtype=jnp.float32),
    )


def reference(x_nchw, params, sigmoid_idx):
    """Literal pure-JAX transcription of the PyTorch forward (eval mode)."""
    x = x_nchw.astype(jnp.float32)
    sig = jax.nn.sigmoid(x)
    cat2 = jnp.concatenate([x, sig], axis=1)
    std = jnp.std(x, axis=(2, 3), ddof=1)
    std_e = jnp.broadcast_to(std[:, :, None, None],
                             (x.shape[0], x.shape[1], x.shape[2], x.shape[3]))
    cat3 = jnp.concatenate([cat2, std_e], axis=1)
    mp = jnp.max(cat3, axis=(2, 3))
    ap = jnp.mean(cat3, axis=(2, 3))
    feat = jnp.concatenate([mp, ap], axis=1)
    h = (feat - params["bn1_m"]) * params["bn1_g"] / jnp.sqrt(
        params["bn1_v"] + BN_EPS) + params["bn1_b"]
    h = h @ params["w1"] + params["b1"]
    h = jnp.maximum(h, 0.0)
    h = (h - params["bn2_m"]) * params["bn2_g"] / jnp.sqrt(
        params["bn2_v"] + BN_EPS) + params["bn2_b"]
    y = h @ params["w2"] + params["b2"]
    idx = jnp.array(sigmoid_idx)
    y = y.at[:, idx].set(jax.nn.sigmoid(y[:, idx]))
    return jnp.maximum(y, 0.0)


if __name__ == "__main__":
    key = jax.random.PRNGKey(0)
    kx, kp_key = jax.random.split(key)

    N, C, H, W = 2, 36, 8, 8       # 6 * C = 216 head input features
    n_out = 8                      # 8 urban-morphology outputs
    sigmoid_idx = (5, 6)           # planar_index, frontal_index

    x = jax.random.normal(kx, (N, C, H, W), dtype=jnp.float32)
    params = init_params(kp_key, C, n_out)

    # One-time parameter preparation (BN folding, W1 split, output padding).
    kparams = prepare_kernel_params(params, sigmoid_idx, C)

    out = jax.block_until_ready(r2_forward(x, kparams))
    ref = reference(x, params, sigmoid_idx)
    assert out.shape == (N, n_out)
    assert jnp.allclose(out, ref, atol=1e-4, rtol=1e-4), (out, ref)

    print("KERNEL_OK")
</pallas_src>

<mosaic_0001>
module attributes {stable_mosaic.version = 11 : i64} {
  func.func @_r2_kernel(%arg0: i32, %arg1: memref<8x36x64xf32, #tpu.memory_space<vmem>>, %arg2: memref<5x36x512xf32, #tpu.memory_space<vmem>>, %arg3: memref<1x512xf32, #tpu.memory_space<vmem>>, %arg4: memref<512x128xf32, #tpu.memory_space<vmem>>, %arg5: memref<1x128xf32, #tpu.memory_space<vmem>>, %arg6: memref<1x128xf32, #tpu.memory_space<vmem>>, %arg7: memref<8x128xf32, #tpu.memory_space<vmem>>) attributes {dimension_semantics = [#tpu.dimension_semantics<parallel>], iteration_bounds = array<i64: 1>, scalar_prefetch = 0 : i64, scratch_operands = 0 : i64, tpu.core_type = #tpu.core_type<tc>, window_params = [{transform_indices = @transform_0, window_bounds = array<i64: 8, 36, 64>}, {pipeline_mode = #tpu.pipeline_mode<synchronous>, transform_indices = @transform_1, window_bounds = array<i64: 5, 36, 512>}, {pipeline_mode = #tpu.pipeline_mode<synchronous>, transform_indices = @transform_2, window_bounds = array<i64: 1, 512>}, {pipeline_mode = #tpu.pipeline_mode<synchronous>, transform_indices = @transform_3, window_bounds = array<i64: 512, 128>}, {pipeline_mode = #tpu.pipeline_mode<synchronous>, transform_indices = @transform_4, window_bounds = array<i64: 1, 128>}, {pipeline_mode = #tpu.pipeline_mode<synchronous>, transform_indices = @transform_5, window_bounds = array<i64: 1, 128>}, {transform_indices = @transform_6, window_bounds = array<i64: 8, 128>}]} {
    %c0 = arith.constant 0 : index
    %c0_0 = arith.constant 0 : index
    %c0_1 = arith.constant 0 : index
    %0 = vector.load %arg1[%c0, %c0_0, %c0_1] : memref<8x36x64xf32, #tpu.memory_space<vmem>>, vector<8x36x64xf32>
    %cst = arith.constant dense<0.000000e+00> : vector<8x36xf32>
    %1 = vector.multi_reduction <add>, %0, %cst [2] : vector<8x36x64xf32> to vector<8x36xf32>
    %2 = arith.mulf %0, %0 : vector<8x36x64xf32>
    %cst_2 = arith.constant dense<0.000000e+00> : vector<8x36xf32>
    %3 = vector.multi_reduction <add>, %2, %cst_2 [2] : vector<8x36x64xf32> to vector<8x36xf32>
    %cst_3 = arith.constant dense<0xFF800000> : vector<8x36xf32>
    %4 = vector.multi_reduction <maximumf>, %0, %cst_3 [2] : vector<8x36x64xf32> to vector<8x36xf32>
    %cst_4 = arith.constant 1.562500e-02 : f32
    %5 = vector.broadcast %cst_4 : f32 to vector<8x36xf32>
    %6 = arith.mulf %1, %5 : vector<8x36xf32>
    %7 = arith.mulf %6, %1 : vector<8x36xf32>
    %8 = arith.subf %3, %7 : vector<8x36xf32>
    %cst_5 = arith.constant 0.000000e+00 : f32
    %9 = vector.broadcast %cst_5 : f32 to vector<8x36xf32>
    %10 = arith.maximumf %8, %9 : vector<8x36xf32>
    %cst_6 = arith.constant 6.300000e+01 : f32
    %11 = vector.broadcast %cst_6 : f32 to vector<8x36xf32>
    %12 = arith.divf %10, %11 : vector<8x36xf32>
    %13 = math.sqrt %12 : vector<8x36xf32>
    %14 = arith.negf %0 : vector<8x36x64xf32>
    %15 = math.exp %14 : vector<8x36x64xf32>
    %cst_7 = arith.constant 1.000000e+00 : f32
    %16 = vector.broadcast %cst_7 : f32 to vector<8x36x64xf32>
    %17 = arith.addf %16, %15 : vector<8x36x64xf32>
    %18 = arith.divf %16, %17 : vector<8x36x64xf32>
    %cst_8 = arith.constant dense<0.000000e+00> : vector<8x36xf32>
    %19 = vector.multi_reduction <add>, %18, %cst_8 [2] : vector<8x36x64xf32> to vector<8x36xf32>
    %cst_9 = arith.constant 6.400000e+01 : f32
    %20 = vector.broadcast %cst_9 : f32 to vector<8x36xf32>
    %21 = arith.divf %19, %20 : vector<8x36xf32>
    %22 = arith.negf %4 : vector<8x36xf32>
    %23 = math.exp %22 : vector<8x36xf32>
    %cst_10 = arith.constant 1.000000e+00 : f32
    %24 = vector.broadcast %cst_10 : f32 to vector<8x36xf32>
    %25 = arith.addf %24, %23 : vector<8x36xf32>
    %26 = arith.divf %24, %25 : vector<8x36xf32>
    %c0_11 = arith.constant 0 : index
    %c0_12 = arith.constant 0 : index
    %c0_13 = arith.constant 0 : index
    %27 = vector.load %arg2[%c0_11, %c0_12, %c0_13] : memref<5x36x512xf32, #tpu.memory_space<vmem>>, vector<1x36x512xf32>
    %28 = vector.shape_cast %27 : vector<1x36x512xf32> to vector<36x512xf32>
    %cst_14 = arith.constant dense<0.000000e+00> : vector<8x512xf32>
    %29 = tpu.matmul %4, %28, %cst_14 {dimension_numbers = #tpu.dot_dimension_numbers<[1], [0], [0], [1], [0, 0, 1, 1], [], []>} : vector<8x36xf32>, vector<36x512xf32>, vector<8x512xf32> -> vector<8x512xf32>
    %c1 = arith.constant 1 : index
    %c0_15 = arith.constant 0 : index
    %c0_16 = arith.constant 0 : index
    %30 = vector.load %arg2[%c1, %c0_15, %c0_16] : memref<5x36x512xf32, #tpu.memory_space<vmem>>, vector<1x36x512xf32>
    %31 = vector.shape_cast %30 : vector<1x36x512xf32> to vector<36x512xf32>
    %cst_17 = arith.constant dense<0.000000e+00> : vector<8x512xf32>
    %32 = tpu.matmul %26, %31, %cst_17 {dimension_numbers = #tpu.dot_dimension_numbers<[1], [0], [0], [1], [0, 0, 1, 1], [], []>} : vector<8x36xf32>, vector<36x512xf32>, vector<8x512xf32> -> vector<8x512xf32>
    %33 = arith.addf %29, %32 : vector<8x512xf32>
    %c2 = arith.constant 2 : index
    %c0_18 = arith.constant 0 : index
    %c0_19 = arith.constant 0 : index
    %34 = vector.load %arg2[%c2, %c0_18, %c0_19] : memref<5x36x512xf32, #tpu.memory_space<vmem>>, vector<1x36x512xf32>
    %35 = vector.shape_cast %34 : vector<1x36x512xf32> to vector<36x512xf32>
    %cst_20 = arith.constant dense<0.000000e+00> : vector<8x512xf32>
    %36 = tpu.matmul %13, %35, %cst_20 {dimension_numbers = #tpu.dot_dimension_numbers<[1], [0], [0], [1], [0, 0, 1, 1], [], []>} : vector<8x36xf32>, vector<36x512xf32>, vector<8x512xf32> -> vector<8x512xf32>
    %37 = arith.addf %33, %36 : vector<8x512xf32>
    %c3 = arith.constant 3 : index
    %c0_21 = arith.constant 0 : index
    %c0_22 = arith.constant 0 : index
    %38 = vector.load %arg2[%c3, %c0_21, %c0_22] : memref<5x36x512xf32, #tpu.memory_space<vmem>>, vector<1x36x512xf32>
    %39 = vector.shape_cast %38 : vector<1x36x512xf32> to vector<36x512xf32>
    %cst_23 = arith.constant dense<0.000000e+00> : vector<8x512xf32>
    %40 = tpu.matmul %6, %39, %cst_23 {dimension_numbers = #tpu.dot_dimension_numbers<[1], [0], [0], [1], [0, 0, 1, 1], [], []>} : vector<8x36xf32>, vector<36x512xf32>, vector<8x512xf32> -> vector<8x512xf32>
    %41 = arith.addf %37, %40 : vector<8x512xf32>
    %c4 = arith.constant 4 : index
    %c0_24 = arith.constant 0 : index
    %c0_25 = arith.constant 0 : index
    %42 = vector.load %arg2[%c4, %c0_24, %c0_25] : memref<5x36x512xf32, #tpu.memory_space<vmem>>, vector<1x36x512xf32>
    %43 = vector.shape_cast %42 : vector<1x36x512xf32> to vector<36x512xf32>
    %cst_26 = arith.constant dense<0.000000e+00> : vector<8x512xf32>
    %44 = tpu.matmul %21, %43, %cst_26 {dimension_numbers = #tpu.dot_dimension_numbers<[1], [0], [0], [1], [0, 0, 1, 1], [], []>} : vector<8x36xf32>, vector<36x512xf32>, vector<8x512xf32> -> vector<8x512xf32>
    %45 = arith.addf %41, %44 : vector<8x512xf32>
    %c0_27 = arith.constant 0 : index
    %c0_28 = arith.constant 0 : index
    %46 = vector.load %arg3[%c0_27, %c0_28] : memref<1x512xf32, #tpu.memory_space<vmem>>, vector<1x512xf32>
    %47 = vector.broadcast %46 : vector<1x512xf32> to vector<8x512xf32>
    %48 = arith.addf %45, %47 : vector<8x512xf32>
    %cst_29 = arith.constant 0.000000e+00 : f32
    %49 = vector.broadcast %cst_29 : f32 to vector<8x512xf32>
    %50 = arith.maximumf %48, %49 : vector<8x512xf32>
    %c0_30 = arith.constant 0 : index
    %c0_31 = arith.constant 0 : index
    %51 = vector.load %arg4[%c0_30, %c0_31] : memref<512x128xf32, #tpu.memory_space<vmem>>, vector<512x128xf32>
    %cst_32 = arith.constant dense<0.000000e+00> : vector<8x128xf32>
    %52 = tpu.matmul %50, %51, %cst_32 {dimension_numbers = #tpu.dot_dimension_numbers<[1], [0], [0], [1], [0, 0, 1, 1], [], []>} : vector<8x512xf32>, vector<512x128xf32>, vector<8x128xf32> -> vector<8x128xf32>
    %c0_33 = arith.constant 0 : index
    %c0_34 = arith.constant 0 : index
    %53 = vector.load %arg5[%c0_33, %c0_34] : memref<1x128xf32, #tpu.memory_space<vmem>>, vector<1x128xf32>
    %54 = vector.broadcast %53 : vector<1x128xf32> to vector<8x128xf32>
    %55 = arith.addf %52, %54 : vector<8x128xf32>
    %c0_35 = arith.constant 0 : index
    %c0_36 = arith.constant 0 : index
    %56 = vector.load %arg6[%c0_35, %c0_36] : memref<1x128xf32, #tpu.memory_space<vmem>>, vector<1x128xf32>
    %cst_37 = arith.constant 5.000000e-01 : f32
    %57 = vector.broadcast %cst_37 : f32 to vector<1x128xf32>
    %58 = arith.cmpf ogt, %56, %57 : vector<1x128xf32>
    %59 = arith.negf %55 : vector<8x128xf32>
    %60 = math.exp %59 : vector<8x128xf32>
    %cst_38 = arith.constant 1.000000e+00 : f32
    %61 = vector.broadcast %cst_38 : f32 to vector<8x128xf32>
    %62 = arith.addf %61, %60 : vector<8x128xf32>
    %63 = arith.divf %61, %62 : vector<8x128xf32>
    %64 = vector.shape_cast %58 : vector<1x128xi1> to vector<1x128xi1>
    %65 = vector.broadcast %64 : vector<1x128xi1> to vector<8x128xi1>
    %66 = arith.select %65, %63, %55 : vector<8x128xi1>, vector<8x128xf32>
    %cst_39 = arith.constant 0.000000e+00 : f32
    %67 = vector.broadcast %cst_39 : f32 to vector<8x128xf32>
    %68 = arith.maximumf %66, %67 : vector<8x128xf32>
    %c0_40 = arith.constant 0 : index
    %c0_41 = arith.constant 0 : index
    %69 = vector.load %arg7[%c0_40, %c0_41] : memref<8x128xf32, #tpu.memory_space<vmem>>, vector<8x128xf32>
    tpu.vector_store %arg7[%c0_40, %c0_41], %68 {strides = array<i32>} : memref<8x128xf32, #tpu.memory_space<vmem>>, vector<8x128xf32>,
    return
  }
  func.func @transform_0(%arg0: i32) -> (i32, i32, i32) {
    %c0_i32 = arith.constant 0 : i32
    %c0_i32_0 = arith.constant 0 : i32
    %c0_i32_1 = arith.constant 0 : i32
    return %arg0, %c0_i32, %c0_i32_0 : i32, i32, i32
  }
  func.func @transform_1(%arg0: i32) -> (i32, i32, i32) {
    %c0_i32 = arith.constant 0 : i32
    %c0_i32_0 = arith.constant 0 : i32
    %c0_i32_1 = arith.constant 0 : i32
    %c0_i32_2 = arith.constant 0 : i32
    return %c0_i32, %c0_i32_0, %c0_i32_1 : i32, i32, i32
  }
  func.func @transform_2(%arg0: i32) -> (i32, i32) {
    %c0_i32 = arith.constant 0 : i32
    %c0_i32_0 = arith.constant 0 : i32
    %c0_i32_1 = arith.constant 0 : i32
    return %c0_i32, %c0_i32_0 : i32, i32
  }
  func.func @transform_3(%arg0: i32) -> (i32, i32) {
    %c0_i32 = arith.constant 0 : i32
    %c0_i32_0 = arith.constant 0 : i32
    %c0_i32_1 = arith.constant 0 : i32
    return %c0_i32, %c0_i32_0 : i32, i32
  }
  func.func @transform_4(%arg0: i32) -> (i32, i32) {
    %c0_i32 = arith.constant 0 : i32
    %c0_i32_0 = arith.constant 0 : i32
    %c0_i32_1 = arith.constant 0 : i32
    return %c0_i32, %c0_i32_0 : i32, i32
  }
  func.func @transform_5(%arg0: i32) -> (i32, i32) {
    %c0_i32 = arith.constant 0 : i32
    %c0_i32_0 = arith.constant 0 : i32
    %c0_i32_1 = arith.constant 0 : i32
    return %c0_i32, %c0_i32_0 : i32, i32
  }
  func.func @transform_6(%arg0: i32) -> (i32, i32) {
    %c0_i32 = arith.constant 0 : i32
    %c0_i32_0 = arith.constant 0 : i32
    return %arg0, %c0_i32 : i32, i32
  }
}

</mosaic_0001>

<bundles_post_ra>
// kernel: tpu_custom_call.1
= control target key start
LH: loop header
LB: loop body
LE: loop exit
PB: predicated region body
PF: predicated region fallthrough
CT: control target
= control target key end

     0   :  { %11 = vsyncpa [#allocation3], 0  ;;  %s7960_s0 = inlined_call_operand.vmem [shape: f32[8,36,64], index: 0, kind: input, shape index: {}]   ;;  %s7961_s1 = inlined_call_operand.hbm [shape: f32[5,36,512], index: 1, kind: input, shape index: {}]   ;;  %s7962_s2 = inlined_call_operand.vmem [shape: f32[1,512], index: 2, kind: input, shape index: {}]   ;;  %s7963_s3 = inlined_call_operand.vmem [shape: f32[512,128], index: 3, kind: input, shape index: {}]   ;;  %s7964_s4 = inlined_call_operand.vmem [shape: f32[1,128], index: 4, kind: input, shape index: {}]   ;;  %s7965_s5 = inlined_call_operand.vmem [shape: f32[1,128], index: 5, kind: input, shape index: {}]   ;;  %s7966_s6 = inlined_call_operand.hbm [shape: f32[8,128], index: 6, kind: output, shape index: {}]  }
   0x1   :  { %12 = vsyncpa [#allocation4], 0  ;;  %s4800_s21 = smov [#allocation2]   ;;  %s4752_s25 = scalar_lea.hbm %s7961_s1, 12800 }
   0x2   :  { %s20_s22 = sshll.u32 %s4800_s21, 4  ;;  %p4753_p0 = scmp.ne.s32.totalorder %s7961_s1, %s4752_s25  ;;  %s21_s22 = int_to_ptr.vmem [resolvable:$true] %s20_s22 }
   0x3   :  { %p4756_p1 = scmp.lt.u32.totalorder %s4752_s25, %s7961_s1 }
   0x5   :  { %p4758_p2 = pnand %p4756_p1, %p4753_p0 }
   0x7   :  { %4761 = shalt.err (!%p4758_p2)
}
   0x8   :  { %s4762_s30 = scalar_lea.vmem %s21_s22, 12800  ;;  %p4767_p4 = scmp.lt.s32.totalorder %s21_s22, %s21_s22 }
   0x9   :  { %p4763_p3 = scmp.ne.s32.totalorder %s21_s22, %s4762_s30  ;;  %p4768_p5 = scmp.lt.s32.totalorder %s4762_s30, %s4762_s30 }
   0xb   :  { %p4769_p6 = por %p4768_p5, %p4767_p4 }
   0xd   :  { %p4770_p7 = pnand %p4769_p6, %p4763_p3 }
   0xf   :  { %4773 = shalt.err (!%p4770_p7)
}
  0x10   :  { %s4801_s7 = smov 512   ;;  %s4802_s8 = smov 32  }
  0x11   :  { %26 = dma.hbm_to_vmem [thread:$0]  %s7961_s1, 12800, %s21_s22, [#allocation3], %s4801_s7, %s4801_s7, %s4802_s8  }
  0x12   :  { %4796 = dma.done.wait [#allocation3], 12800  }
  0x13   :  { %4797 = vsyncadd [#allocation3], 4294954496  ;;  %vm78_vm0 = vcmask 523264   ;;  %v4856_v0 = vld [vmem:[%s7960_s0 + $0x28] sm:$0xff]  ;;  %v4861_v1 = vld [vmem:[%s7960_s0] sm:$0xff]  ;;  %vm91_vm1 = vcmask 519168  }
  0x14   :  { %v4866_v2 = vld [vmem:[%s7960_s0 + $0x30] sm:$0xff]  ;;  %v375_v3 = vsel %vm78_vm0, %v4856_v0, -inf  ;;  %v360_v4 = vsel %vm78_vm0, %v4861_v1, -inf  ;;  %v4875_v5 = vld [vmem:[%s7960_s0 + $0x8] sm:$0xff]  ;;  %v4884_v8 = vld [vmem:[%s7960_s0 + $0x38] sm:$0xff]  ;;  %vm8034_vm2 = vcmask 1043456  }
  0x15   :  { %376 = vmax.xlane.f32.xlu1 %v375_v3  ;;  %361 = vmax.xlane.f32.xlu0 %v360_v4  ;;  %v378_v6 = vsel %vm78_vm0, %v4866_v2, -inf  ;;  %v363_v7 = vsel %vm78_vm0, %v4875_v5, -inf  ;;  %v4889_v9 = vld [vmem:[%s7960_s0 + $0x10] sm:$0xff]  ;;  %v381_v10 = vsel %vm78_vm0, %v4884_v8, -inf  ;;  %v4898_v12 = vld [vmem:[%s7960_s0 + $0x58] sm:$0xff]  ;;  %v4912_v16 = vld [vmem:[%s7960_s0 + $0x40] sm:$0xff] }
  0x16   :  { %v366_v11 = vsel %vm78_vm0, %v4889_v9, -inf  ;;  %v4903_v13 = vld [vmem:[%s7960_s0 + $0x50] sm:$0xff]  ;;  %v393_v14 = vsel %vm78_vm0, %v4898_v12, -inf  ;;  %v4917_v17 = vld [vmem:[%s7960_s0 + $0x18] sm:$0xff]  ;;  %v384_v18 = vsel %vm78_vm0, %v4912_v16, -inf  ;;  %v4931_v21 = vld [vmem:[%s7960_s0 + $0x60] sm:$0xff] }
  0x17   :  { %v390_v15 = vsel %vm78_vm0, %v4903_v13, -inf  ;;  %v369_v19 = vsel %vm78_vm0, %v4917_v17, -inf  ;;  %v4926_v20 = vld [vmem:[%s7960_s0 + $0x78] sm:$0xff]  ;;  %v396_v23 = vsel %vm78_vm0, %v4931_v21, -inf  ;;  %v4940_v24 = vld [vmem:[%s7960_s0 + $0x20] sm:$0xf] }
  0x18   :  { %v405_v22 = vsel %vm78_vm0, %v4926_v20, -inf  ;;  %v4945_v25 = vld [vmem:[%s7960_s0 + $0x80] sm:$0xff]  ;;  %v372_v26 = vsel %vm91_vm1, %v4940_v24, -inf  ;;  %v4954_v28 = vld [vmem:[%s7960_s0 + $0x68] sm:$0xff]  ;;  %v4982_v36 = vld [vmem:[%s7960_s0 + $0x70] sm:$0xf] }
  0x19   :  { %379 = vmax.xlane.f32.xlu1 %v378_v6  ;;  %364 = vmax.xlane.f32.xlu0 %v363_v7  ;;  %v408_v27 = vsel %vm78_vm0, %v4945_v25, -inf  ;;  %8048 = vst [vmem:[#allocation8_spill] sm:$0xff] %v4954_v28  ;;  %v4959_v29 = vld [vmem:[%s7960_s0 + $0x48] sm:$0xf]  ;;  %v399_v30 = vsel %vm78_vm0, %v4954_v28, -inf  ;;  %v4968_v32 = vld [vmem:[%s7960_s0 + $0xa0] sm:$0xff] }
  0x1a   :  { %v387_v31 = vsel %vm91_vm1, %v4959_v29, -inf  ;;  %8049 = vst [vmem:[#allocation9_spill] sm:$0xff] %v4968_v32  ;;  %v4973_v33 = vld [vmem:[%s7960_s0 + $0x88] sm:$0xff]  ;;  %v420_v34 = vsel %vm78_vm0, %v4968_v32, -inf  ;;  %8051 = vst [vmem:[#allocation11_spill] sm:$0xff] %v4982_v36  ;;  %v402_v38 = vsel %vm91_vm1, %v4982_v36, -inf }
  0x1b   :  { %8050 = vst [vmem:[#allocation10_spill] sm:$0xff] %v4973_v33  ;;  %v411_v35 = vsel %vm78_vm0, %v4973_v33, -inf  ;;  %v4987_v37 = vld [vmem:[%s7960_s0 + $0xa8] sm:$0xff]  ;;  %v4996_v40 = vld [vmem:[%s7960_s0 + $0xb0] sm:$0xff]  ;;  %v5024_v48 = vld [vmem:[%s7960_s0 + $0xb8] sm:$0xff]  ;;  %vm8041_vm3 = vcmask 130112  }
  0x1c   :  { %8052 = vst [vmem:[#allocation12_spill] sm:$0xff] %v4987_v37  ;;  %v423_v39 = vsel %vm78_vm0, %v4987_v37, -inf  ;;  %v5001_v41 = vld [vmem:[%s7960_s0 + $0x90] sm:$0xff]  ;;  %v426_v42 = vsel %vm78_vm0, %v4996_v40, -inf  ;;  %v5015_v45 = vld [vmem:[%s7960_s0 + $0xc8] sm:$0xff]  ;;  %v429_v50 = vsel %vm78_vm0, %v5024_v48, -inf }
  0x1d   :  { %382 = vmax.xlane.f32.xlu1 %v381_v10  ;;  %367 = vmax.xlane.f32.xlu0 %v366_v11  ;;  %v414_v43 = vsel %vm78_vm0, %v5001_v41, -inf  ;;  %v5010_v44 = vld [vmem:[%s7960_s0 + $0xd0] sm:$0xff]  ;;  %v435_v47 = vsel %vm78_vm0, %v5015_v45, -inf  ;;  %v5029_v49 = vld [vmem:[%s7960_s0 + $0x98] sm:$0xf]  ;;  %v5066_v60 = vld [vmem:[%s7960_s0 + $0x100] sm:$0xff] }
  0x1e   :  { %v438_v46 = vsel %vm78_vm0, %v5010_v44, -inf  ;;  %v417_v51 = vsel %vm91_vm1, %v5029_v49, -inf  ;;  %v5038_v52 = vld [vmem:[%s7960_s0 + $0xf0] sm:$0xff]  ;;  %v5043_v53 = vld [vmem:[%s7960_s0 + $0xd8] sm:$0xff]  ;;  %v5052_v56 = vld [vmem:[%s7960_s0 + $0xc0] sm:$0xf] }
  0x1f   :  { %v450_v54 = vsel %vm78_vm0, %v5038_v52, -inf  ;;  %v441_v55 = vsel %vm78_vm0, %v5043_v53, -inf  ;;  %v5057_v57 = vld [vmem:[%s7960_s0 + $0xf8] sm:$0xff]  ;;  %v432_v58 = vsel %vm91_vm1, %v5052_v56, -inf  ;;  %v5071_v61 = vld [vmem:[%s7960_s0 + $0xe0] sm:$0xff]  ;;  %v456_v62 = vsel %vm78_vm0, %v5066_v60, -inf }
  0x20   :  { %v453_v59 = vsel %vm78_vm0, %v5057_v57, -inf  ;;  %v444_v63 = vsel %vm78_vm0, %v5071_v61, -inf  ;;  %v5080_v3 = vld [vmem:[%s7960_s0 + $0x120] sm:$0xff]  ;;  %v5085_v4 = vld [vmem:[%s7960_s0 + $0x118] sm:$0xff]  ;;  %v5094_v10 = vld [vmem:[%s7960_s0 + $0x108] sm:$0xff]  ;;  %vm8042_vm4 = vcmask 195712  }
  0x21   :  { %394 = vmax.xlane.f32.xlu1 %v393_v14  ;;  %391 = vmax.xlane.f32.xlu0 %v390_v15  ;;  %v468_v6 = vsel %vm78_vm0, %v5080_v3, -inf  ;;  %v465_v7 = vsel %vm78_vm0, %v5085_v4, -inf  ;;  %v5099_v11 = vld [vmem:[%s7960_s0 + $0xe8] sm:$0xf]  ;;  %v459_v14 = vsel %vm78_vm0, %v5094_v10, -inf  ;;  %vm8040_vm5 = vcmask 261312  }
  0x22   :  { %v447_v15 = vsel %vm91_vm1, %v5099_v11, -inf  ;;  %vm1715_vm6 = vcmask 326912   ;;  %vm8039_vm7 = vcmask 1041409   ;;  %vm8023_vm8 = vcmask 1042434  }
  0x23   :  { %vm8025_vm9 = vcmask 1043459   ;;  %vm8038_vm10 = vcmask 1044484   ;;  %vm8035_vm11 = vcmask 1045509   ;;  %vm8021_vm12 = vcmask 1046534  }
  0x24   :  { %vm8014_vm13 = vcmask 293888   ;;  %vm8016_vm14 = vcmask 1047559  }
  0x25   :  { %385 = vmax.xlane.f32.xlu1 %v384_v18  ;;  %370 = vmax.xlane.f32.xlu0 %v369_v19  ;;  %v5108_v18 = vld [vmem:[%s7960_s0 + $0x110] sm:$0xf]  ;;  %v5113_v19 = vld [vmem:[%s7960_s0 + $0x128] sm:$0xff] }
  0x29   :  { %406 = vmax.xlane.f32.xlu1 %v405_v22  ;;  %397 = vmax.xlane.f32.xlu0 %v396_v23  ;;  %v462_v22 = vsel %vm91_vm1, %v5108_v18, -inf  ;;  %v471_v23 = vsel %vm78_vm0, %v5113_v19, -inf }
  0x2d   :  { %373 = vmax.xlane.f32.xlu1 %v372_v26  ;;  %409 = vmax.xlane.f32.xlu0 %v408_v27  ;;  %v5122_v26 = vld [vmem:[%s7960_s0 + $0x138] sm:$0xf]  ;;  %v5127_v27 = vld [vmem:[%s7960_s0 + $0x130] sm:$0xff] }
  0x2e   :  { %8053 = vst [vmem:[#allocation13_spill] sm:$0xff] %v5127_v27 }
  0x31   :  { %400 = vmax.xlane.f32.xlu1 %v399_v30  ;;  %388 = vmax.xlane.f32.xlu0 %v387_v31  ;;  %v3990_v30 = vmul.f32 -1.442695, %v4856_v0  ;;  %v3985_v31 = vmul.f32 -1.442695, %v4861_v1 }
  0x33   :  { %4333 = vpow2.f32 %v3990_v30 }
  0x34   :  { %4335 = vpow2.f32 %v3985_v31 }
  0x35   :  { %421 = vmax.xlane.f32.xlu1 %v420_v34  ;;  %412 = vmax.xlane.f32.xlu0 %v411_v35  ;;  %v477_v34 = vsel %vm91_vm1, %v5122_v26, -inf  ;;  %v474_v35 = vsel %vm78_vm0, %v5127_v27, -inf }
  0x39   :  { %403 = vmax.xlane.f32.xlu1 %v402_v38  ;;  %424 = vmax.xlane.f32.xlu0 %v423_v39  ;;  %v3991_v38 = vmul.f32 -1.442695, %v4866_v2  ;;  %v3986_v39 = vmul.f32 -1.442695, %v4875_v5 }
  0x3b   :  { %4337 = vpow2.f32 %v3991_v38 }
  0x3c   :  { %4339 = vpow2.f32 %v3986_v39 }
  0x3d   :  { %427 = vmax.xlane.f32.xlu1 %v426_v42  ;;  %415 = vmax.xlane.f32.xlu0 %v414_v43  ;;  %v3992_v42 = vmul.f32 -1.442695, %v4884_v8  ;;  %v3987_v43 = vmul.f32 -1.442695, %v4889_v9 }
  0x3f   :  { %4341 = vpow2.f32 %v3992_v42 }
  0x40   :  { %4343 = vpow2.f32 %v3987_v43 }
  0x41   :  { %439 = vmax.xlane.f32.xlu1 %v438_v46  ;;  %436 = vmax.xlane.f32.xlu0 %v435_v47  ;;  %v82_v46 = vsel %vm78_vm0, %v4875_v5, 0.0  ;;  %v79_v47 = vsel %vm78_vm0, %v4861_v1, 0.0 }
  0x45   :  { %430 = vmax.xlane.f32.xlu1 %v429_v50  ;;  %418 = vmax.xlane.f32.xlu0 %v417_v51  ;;  %v3996_v50 = vmul.f32 -1.442695, %v4898_v12  ;;  %v3995_v51 = vmul.f32 -1.442695, %v4903_v13 }
  0x47   :  { %4345 = vpow2.f32 %v3996_v50 }
  0x48   :  { %4347 = vpow2.f32 %v3995_v51 }
  0x49   :  { %451 = vmax.xlane.f32.xlu1 %v450_v54  ;;  %442 = vmax.xlane.f32.xlu0 %v441_v55  ;;  %v98_v54 = vsel %vm78_vm0, %v4866_v2, 0.0  ;;  %v95_v55 = vsel %vm78_vm0, %v4856_v0, 0.0 }
  0x4d   :  { %433 = vmax.xlane.f32.xlu1 %v432_v58  ;;  %454 = vmax.xlane.f32.xlu0 %v453_v59  ;;  %v3993_v58 = vmul.f32 -1.442695, %v4912_v16  ;;  %v3988_v59 = vmul.f32 -1.442695, %v4917_v17 }
  0x4f   :  { %4349 = vpow2.f32 %v3993_v58 }
  0x50   :  { %4351 = vpow2.f32 %v3988_v59 }
  0x51   :  { %457 = vmax.xlane.f32.xlu1 %v456_v62  ;;  %445 = vmax.xlane.f32.xlu0 %v444_v63  ;;  %v101_v62 = vsel %vm78_vm0, %v4884_v8, 0.0  ;;  %v85_v63 = vsel %vm78_vm0, %v4889_v9, 0.0 }
  0x55   :  { %469 = vmax.xlane.f32.xlu1 %v468_v6  ;;  %466 = vmax.xlane.f32.xlu0 %v465_v7  ;;  %v4334_v6 = vpop.eup %4333  ;;  %v4000_v7 = vmul.f32 -1.442695, %v4926_v20 }
  0x56   :  { %v1086_v31 = vadd.f32 1.0, %v4334_v6  ;;  %v125_v6 = vsel %vm78_vm0, %v4926_v20, 0.0 }
  0x57   :  { %4353 = vpow2.f32 %v4000_v7  ;;  %v116_v7 = vsel %vm78_vm0, %v4931_v21, 0.0 }
  0x59   :  { %460 = vmax.xlane.f32.xlu1 %v459_v14  ;;  %448 = vmax.xlane.f32.xlu0 %v447_v15  ;;  %v4336_v14 = vpop.eup %4335  ;;  %v3997_v15 = vmul.f32 -1.442695, %v4931_v21 }
  0x5a   :  { %v1081_v39 = vadd.f32 1.0, %v4336_v14 }
  0x5b   :  { %4355 = vpow2.f32 %v3997_v15  ;;  %v3998_v15 = vmul.f32 -1.442695, %v4954_v28 }
  0x5d   :  { %463 = vmax.xlane.f32.xlu1 %v462_v22  ;;  %472 = vmax.xlane.f32.xlu0 %v471_v23  ;;  %v4338_v22 = vpop.eup %4337  ;;  %v3989_v23 = vmul.f32 -1.442695, %v4940_v24 }
  0x5e   :  { %v4340_v30 = vpop.eup %4339  ;;  %v1087_v43 = vadd.f32 1.0, %v4338_v22 }
  0x5f   :  { %v4342_v38 = vpop.eup %4341  ;;  %4357 = vpow2.f32 %v3989_v23  ;;  %v3994_v23 = vmul.f32 -1.442695, %v4959_v29 }
  0x60   :  { %v4344_v42 = vpop.eup %4343  ;;  %4359 = vrcp.f32 %v1086_v31  ;;  %v1088_v51 = vadd.f32 1.0, %v4342_v38  ;;  %v4005_v31 = vmul.f32 -1.442695, %v4968_v32  ;;  %v92_v38 = vsel %vm91_vm1, %v4940_v24, 0.0 }
  0x61   :  { %478 = vmax.xlane.f32.xlu1 %v477_v34  ;;  %475 = vmax.xlane.f32.xlu0 %v474_v35  ;;  %v113_v34 = vsel %vm78_vm0, %v4898_v12, 0.0  ;;  %v110_v35 = vsel %vm78_vm0, %v4903_v13, 0.0  ;;  %4361 = vrcp.f32 %v1081_v39  ;;  %v1083_v58 = vadd.f32 1.0, %v4344_v42 }
  0x62   :  { %4363 = vrcp.f32 %v1087_v43  ;;  %v128_v39 = vsel %vm78_vm0, %v4945_v25, 0.0  ;;  %v3999_v43 = vmul.f32 -1.442695, %v4982_v36 }
  0x65   :  { %83 = vadd.xlane.f32.xlu1 %v82_v46  ;;  %80 = vadd.xlane.f32.xlu0 %v79_v47  ;;  %v4346_v46 = vpop.eup %4345  ;;  %v1082_v47 = vadd.f32 1.0, %v4340_v30 }
  0x66   :  { %v4348_v50 = vpop.eup %4347  ;;  %v1092_v59 = vadd.f32 1.0, %v4346_v46 }
  0x67   :  { %4365 = vrcp.f32 %v1082_v47  ;;  %v4350_v14 = vpop.eup %4349  ;;  %v4006_v47 = vmul.f32 -1.442695, %v4987_v37 }
  0x68   :  { %4367 = vrcp.f32 %v1088_v51  ;;  %v4352_v22 = vpop.eup %4351  ;;  %v1089_v51 = vadd.f32 1.0, %v4350_v14 }
  0x69   :  { %99 = vadd.xlane.f32.xlu1 %v98_v54  ;;  %96 = vadd.xlane.f32.xlu0 %v95_v55  ;;  %v104_v54 = vsel %vm78_vm0, %v4912_v16, 0.0  ;;  %v88_v55 = vsel %vm78_vm0, %v4917_v17, 0.0  ;;  %4369 = vrcp.f32 %v1083_v58  ;;  %v4354_v30 = vpop.eup %4353  ;;  %v119_v58 = vsel %vm78_vm0, %v4954_v28, 0.0  ;;  %v1629_v28 = vld [vmem:[#allocation2 + $0xd0] sm:$0xff] }
  0x6a   :  { %4371 = vrcp.f32 %v1092_v59  ;;  %v107_v59 = vsel %vm91_vm1, %v4959_v29, 0.0 }
  0x6d   :  { %102 = vadd.xlane.f32.xlu1 %v101_v62  ;;  %86 = vadd.xlane.f32.xlu0 %v85_v63  ;;  %v1091_v62 = vadd.f32 1.0, %v4348_v50  ;;  %v4001_v63 = vmul.f32 -1.442695, %v4945_v25 }
  0x6f   :  { %4373 = vrcp.f32 %v1091_v62 }
  0x70   :  { %4375 = vpow2.f32 %v4001_v63  ;;  %v4007_v63 = vmul.f32 -1.442695, %v4996_v40 }
  0x71   :  { %114 = vadd.xlane.f32.xlu1 %v113_v34  ;;  %111 = vadd.xlane.f32.xlu0 %v110_v35  ;;  %v5174_v34 = vpop.eup %4355  ;;  %v4002_v35 = vmul.f32 -1.442695, %v4973_v33  ;;  %4377 = vpow2.f32 %v3998_v15  ;;  %v4011_v15 = vmul.f32 -1.442695, %v5010_v44 }
  0x72   :  { %v5181_v42 = vpop.eup %4357  ;;  %4379 = vpow2.f32 %v3994_v23  ;;  %v4010_v23 = vmul.f32 -1.442695, %v5015_v45 }
  0x73   :  { %v5184_v46 = vpop.eup %4359  ;;  %4381 = vpow2.f32 %v4005_v31  ;;  %v140_v31 = vsel %vm78_vm0, %v4968_v32, 0.0  ;;  %v1625_v32 = vld [vmem:[#allocation2 + $0xb0] sm:$0xff] }
  0x74   :  { %8054 = vst [vmem:[#allocation14_spill] sm:$0xff] %v5184_v46  ;;  %v5187_v50 = vpop.eup %4361  ;;  %4383 = vpow2.f32 %v4002_v35  ;;  %v131_v35 = vsel %vm78_vm0, %v4973_v33, 0.0  ;;  %v1623_v46 = vld [vmem:[#allocation2 + $0xa0] sm:$0xff]  ;;  %v1633_v33 = vld [vmem:[#allocation2 + $0xf0] sm:$0xff] }
  0x75   :  { %105 = vadd.xlane.f32.xlu1 %v104_v54  ;;  %89 = vadd.xlane.f32.xlu0 %v88_v55  ;;  %8055 = vst [vmem:[#allocation15_spill] sm:$0xff] %v5187_v50  ;;  %v5189_v54 = vpop.eup %4363  ;;  %v1084_v55 = vadd.f32 1.0, %v4352_v22  ;;  %4385 = vpow2.f32 %v3999_v43  ;;  %v4004_v43 = vmul.f32 -1.442695, %v5029_v49 }
  0x76   :  { %8056 = vst [vmem:[#allocation16_spill] sm:$0xff] %v5189_v54  ;;  %v5195_v62 = vpop.eup %4365  ;;  %4387 = vpow2.f32 %v4006_v47  ;;  %v1627_v54 = vld [vmem:[#allocation2 + $0xc0] sm:$0xff] }
  0x77   :  { %8057 = vst [vmem:[#allocation17_spill] sm:$0xff] %v5195_v62  ;;  %4389 = vrcp.f32 %v1089_v51  ;;  %v5216_v51 = vmul.f32 -1.442695, %v5038_v52  ;;  %v4169_v27 = vpack.c.bf16 %v1627_v54, %v1623_v46  ;;  %v201_v46 = vmul.f32 %v4875_v5, %v4875_v5  ;;  %v1632_v54 = vld [vmem:[#allocation2 + $0xe8] sm:$0xff] }
  0x78   :  { %4391 = vrcp.f32 %v1084_v55  ;;  %v5220_v55 = vmul.f32 %v4861_v1, %v4861_v1  ;;  %v143_v1 = vsel %vm78_vm0, %v4987_v37, 0.0  ;;  %v134_v5 = vsel %vm78_vm0, %v5001_v41, 0.0 }
  0x79   :  { %126 = vadd.xlane.f32.xlu1 %v125_v6  ;;  %117 = vadd.xlane.f32.xlu0 %v116_v7  ;;  %v5198_v6 = vpop.eup %4367  ;;  %v4003_v7 = vmul.f32 -1.442695, %v5001_v41  ;;  %4393 = vpow2.f32 %v4007_v63  ;;  %v122_v63 = vsel %vm91_vm1, %v4982_v36, 0.0 }
  0x7a   :  { %8058 = vst [vmem:[#allocation18_spill] sm:$0xff] %v5198_v6  ;;  %v5201_v14 = vpop.eup %4369  ;;  %v1096_v6 = vadd.f32 1.0, %v4354_v30 }
  0x7b   :  { %8059 = vst [vmem:[#allocation19_spill] sm:$0xff] %v5201_v14  ;;  %v5204_v22 = vpop.eup %4371  ;;  %4395 = vpow2.f32 %v4003_v7  ;;  %v1630_v7 = vld [vmem:[#allocation2 + $0xd8] sm:$0xff] }
  0x7c   :  { %8060 = vst [vmem:[#allocation20_spill] sm:$0xff] %v5204_v22  ;;  %v1626_v22 = vld [vmem:[#allocation2 + $0xb8] sm:$0xff]  ;;  %4397 = vpow2.f32 %v4011_v15  ;;  %v1093_v15 = vadd.f32 1.0, %v5174_v34  ;;  %v1636_v34 = vld [vmem:[#allocation2 + $0x108] sm:$0xff] }
  0x7d   :  { %93 = vadd.xlane.f32.xlu1 %v92_v38  ;;  %129 = vadd.xlane.f32.xlu0 %v128_v39  ;;  %v5211_v38 = vpop.eup %4373  ;;  %v4008_v39 = vmul.f32 -1.442695, %v5024_v48  ;;  %4399 = vpow2.f32 %v4010_v23  ;;  %v4175_v62 = vpack.c.bf16 %v1630_v7, %v1626_v22  ;;  %v5232_v23 = vmul.f32 -1.442695, %v5052_v56  ;;  %v1634_v22 = vld [vmem:[#allocation2 + $0xf8] sm:$0xff] }
  0x7e   :  { %8061 = vst [vmem:[#allocation21_spill] sm:$0xff] %v5211_v38  ;;  %v4376_v47 = vpop.eup %4375 }
  0x7f   :  { %v4378_v14 = vpop.eup %4377  ;;  %4401 = vpow2.f32 %v4008_v39  ;;  %4176 = vmatprep.subr.bf16.mxu1 %v4175_v62  ;;  %v1097_v7 = vadd.f32 1.0, %v4376_v47 }
  0x80   :  { %v4380_v50 = vpop.eup %4379  ;;  %4403 = vpow2.f32 %v4004_v43  ;;  %v1635_v43 = vld [vmem:[#allocation2 + $0x100] sm:$0xff]  ;;  %v1094_v37 = vadd.f32 1.0, %v4378_v14 }
  0x81   :  { %120 = vadd.xlane.f32.xlu1 %v119_v58  ;;  %108 = vadd.xlane.f32.xlu0 %v107_v59  ;;  %v1624_v58 = vld [vmem:[#allocation2 + $0xa8] sm:$0xff]  ;;  %v4382_v30 = vpop.eup %4381  ;;  %4405 = vrcp.f32 %v1096_v6  ;;  %v1637_v6 = vld [vmem:[#allocation2 + $0x110] sm:$0xff] }
  0x82   :  { %v1628_v59 = vld [vmem:[#allocation2 + $0xc8] sm:$0xff]  ;;  %4407 = vrcp.f32 %v1093_v15  ;;  %v1101_v14 = vadd.f32 1.0, %v4382_v30  ;;  %v1642_v30 = vld [vmem:[#allocation2 + $0x138] sm:$0xf] }
  0x83   :  { %v4167_v38 = vpack.c.bf16 %v1628_v59, %v1624_v58  ;;  %v4384_v58 = vpop.eup %4383  ;;  %v1085_v59 = vadd.f32 1.0, %v5181_v42  ;;  %v1638_v42 = vld [vmem:[#allocation2 + $0x118] sm:$0xff] }
  0x84   :  { %v4386_v39 = vpop.eup %4385 }
  0x85   :  { %141 = vadd.xlane.f32.xlu1 %v140_v31  ;;  %132 = vadd.xlane.f32.xlu0 %v131_v35  ;;  %v5228_v31 = vmul.f32 -1.442695, %v5043_v53  ;;  %v4177_v35 = vpack.c.bf16 %v1629_v28, %v1625_v32  ;;  %v146_v28 = vsel %vm78_vm0, %v4996_v40, 0.0  ;;  %v4171_v32 = vpack.c.bf16 %v1636_v34, %v1632_v54  ;;  %v4388_v36 = vpop.eup %4387 }
  0x86   :  { %4168 = vmatprep.subr.bf16.mxu0 %v4167_v38  ;;  %v1631_v38 = vld [vmem:[#allocation2 + $0xe0] sm:$0xff]  ;;  %v5240_v47 = vpop.eup %4389  ;;  %v4181_v54 = vpack.c.bf16 %v1637_v6, %v1633_v33  ;;  %4409 = vrcp.f32 %v1085_v59  ;;  %v1095_v15 = vadd.f32 1.0, %v4386_v39  ;;  %v1640_v59 = vld [vmem:[#allocation2 + $0x128] sm:$0xf]  ;;  %v1605_v6 = vld [vmem:[#allocation2 + $0x18] sm:$0xff] }
  0x87   :  { %4170 = vmatpush1.bf16.msra.mxu0 %v4169_v27  ;;  %4178 = vmatpush1.bf16.msra.mxu1 %v4177_v35  ;;  %v4179_v27 = vpack.c.bf16 %v1638_v42, %v1634_v22  ;;  %v4173_v62 = vpack.c.bf16 %v1635_v43, %v1631_v38  ;;  %8062 = vst [vmem:[#allocation22_spill] sm:$0xff] %v5240_v47  ;;  %v5245_v34 = vpop.eup %4391  ;;  %v158_v35 = vsel %vm78_vm0, %v5010_v44, 0.0  ;;  %v155_v22 = vsel %vm78_vm0, %v5015_v45, 0.0  ;;  %v1607_v39 = vld [vmem:[#allocation2 + $0x28] sm:$0xff] }
  0x88   :  { %4172 = vmatprep.subr.bf16.mxu0 %v4171_v32  ;;  %8063 = vst [vmem:[#allocation23_spill] sm:$0xff] %v5245_v34  ;;  %v4394_v42 = vpop.eup %4393  ;;  %4411 = vrcp.f32 %v1097_v7  ;;  %v1102_v38 = vadd.f32 1.0, %v4388_v36  ;;  %v1603_v32 = vld [vmem:[#allocation2 + $0x8] sm:$0xff]  ;;  %v1641_v36 = vld [vmem:[#allocation2 + $0x130] sm:$0xf] }
  0x89   :  { %123 = vadd.xlane.f32.xlu1 %v122_v63  ;;  %144 = vadd.xlane.f32.xlu0 %v143_v1  ;;  %v1090_v63 = vadd.f32 1.0, %v4380_v50  ;;  %v5243_v1 = vmul.f32 -1.442695, %v5057_v57  ;;  %v1098_v50 = vadd.f32 1.0, %v4384_v58  ;;  %v4396_v33 = vpop.eup %4395  ;;  %4413 = vrcp.f32 %v1094_v37  ;;  %v1639_v58 = vld [vmem:[#allocation2 + $0x120] sm:$0xf] }
  0x8a   :  { %4180 = vmatprep.subr.bf16.mxu1 %v4179_v27  ;;  %v4398_v43 = vpop.eup %4397  ;;  %v206_v27 = vmul.f32 %v4866_v2, %v4866_v2  ;;  %v1103_v37 = vadd.f32 1.0, %v4394_v42  ;;  %v1609_v2 = vld [vmem:[#allocation2 + $0x38] sm:$0xff] }
  0x8b   :  { %4174 = vmatpush1.bf16.msra.mxu0 %v4173_v62  ;;  %4182 = vmatpush1.bf16.msra.mxu1 %v4181_v54  ;;  %4415 = vrcp.f32 %v1090_v63  ;;  %v4400_v7 = vpop.eup %4399  ;;  %v4183_v62 = vpack.c.bf16 %v1607_v39, %v1603_v32  ;;  %v1099_v54 = vadd.f32 1.0, %v4396_v33 }
  0x8c   :  { %4065 = vmatprep.subr.msk.mxu0 %vm8034_vm2, %v1640_v59  ;;  %4068 = vmatprep.subr.msk.mxu1 %vm8034_vm2, %v1642_v30  ;;  %4417 = vrcp.f32 %v1101_v14  ;;  %v4402_v63 = vpop.eup %4401  ;;  %v240_v59 = vsel %vm78_vm0, %v5220_v55, 0.0  ;;  %v4191_v14 = vpack.c.bf16 %v1609_v2, %v1605_v6  ;;  %v205_v30 = vmul.f32 %v4856_v0, %v4856_v0 }
  0x8d   :  { %147 = vadd.xlane.f32.xlu1 %v146_v28  ;;  %135 = vadd.xlane.f32.xlu0 %v134_v5  ;;  %v243_v28 = vsel %vm78_vm0, %v201_v46, 0.0  ;;  %v7973_v5 = vmov 0.0   ;;  %4419 = vrcp.f32 %v1098_v50  ;;  %v4404_v42 = vpop.eup %4403  ;;  %v1107_v46 = vadd.f32 1.0, %v4398_v43 }
  0x8e   :  { %1979 = vmatprep.mubr.f32.mxu0 %v7973_v5  ;;  %4421 = vrcp.f32 %v1095_v15  ;;  %2050 = vmatprep.mubr.f32.mxu1 %v7973_v5  ;;  %v5264_v32 = vpop.eup %4405  ;;  %v5268_v55 = vmul.f32 -1.442695, %v5071_v61  ;;  %v1104_v50 = vadd.f32 1.0, %v4402_v63  ;;  %v5271_v0 = vmul.f32 -1.442695, %v5080_v3 }
  0x8f   :  { %4066 = vmatpush1.msk.msra.mxu0 %vm8034_vm2, %v1639_v58  ;;  %v1683_v58 = vlaneseq  ;;  %4069 = vmatpush1.msk.msra.mxu1 %vm8034_vm2, %v1641_v36  ;;  %8064 = vst [vmem:[#allocation24_spill] sm:$0xff] %v5264_v32  ;;  %4423 = vrcp.f32 %v1102_v38  ;;  %v5274_v15 = vmul.f32 -1.442695, %v5085_v4  ;;  %v5276_v33 = vpop.eup %4407  ;;  %v1100_v38 = vadd.f32 1.0, %v4404_v42 }
  0x90   :  { %4184 = vmatprep.subr.bf16.mxu0 %v4183_v62  ;;  %4192 = vmatprep.subr.bf16.mxu1 %v4191_v14  ;;  %4425 = vrcp.f32 %v1103_v37  ;;  %8065 = vst [vmem:[#allocation25_spill] sm:$0xff] %v5276_v33  ;;  %v5279_v43 = vmul.f32 -1.442695, %v5094_v10  ;;  %v5282_v36 = vmul.f32 -1.442695, %v5099_v11  ;;  %v5284_v39 = vpop.eup %4409  ;;  %v255_v37 = vsel %vm78_vm0, %v205_v30, 0.0 }
  0x91   :  { %159 = vadd.xlane.f32.xlu1 %v158_v35  ;;  %156 = vadd.xlane.f32.xlu0 %v155_v22  ;;  %v1106_v35 = vadd.f32 1.0, %v4400_v7  ;;  %v4017_v22 = vmul.f32 -1.442695, %v5066_v60  ;;  %4427 = vrcp.f32 %v1099_v54  ;;  %8066 = vst [vmem:[#allocation26_spill] sm:$0xff] %v5284_v39  ;;  %v258_v7 = vsel %vm78_vm0, %v206_v27, 0.0 }
  0x92   :  { %4429 = vrcp.f32 %v1107_v46  ;;  %v1684_v62 = vand.u32 127, %v1683_v58  ;;  %v5288_v6 = vpop.eup %4411  ;;  %v5291_v2 = vmul.f32 -1.442695, %v5108_v18  ;;  %v5294_v63 = vmul.f32 -1.442695, %v5113_v19 }
  0x93   :  { %8067 = vst [vmem:[#allocation27_spill] sm:$0xff] %v5288_v6  ;;  %4431 = vrcp.f32 %v1106_v35  ;;  %v5298_v54 = vpop.eup %4413  ;;  %v210_v14 = vmul.f32 %v4903_v13, %v4903_v13  ;;  %v5307_v46 = vmul.f32 -1.442695, %v5122_v26  ;;  %v207_v30 = vmul.f32 %v4884_v8, %v4884_v8 }
  0x94   :  { %8068 = vst [vmem:[#allocation28_spill] sm:$0xff] %v5298_v54  ;;  %4433 = vrcp.f32 %v1104_v50  ;;  %v1689_v27 = vadd.s32 4294967288, %v1684_v62  ;;  %v137_v13 = vsel %vm91_vm1, %v5029_v49, 0.0  ;;  %v170_v35 = vsel %vm78_vm0, %v5038_v52, 0.0 }
  0x95   :  { %244 = vadd.xlane.f32.xlu1 %v243_v28  ;;  %241 = vadd.xlane.f32.xlu0 %v240_v59  ;;  %v202_v28 = vmul.f32 %v4889_v9, %v4889_v9  ;;  %v5300_v59 = vshrl.u32 %v1683_v58, 7  ;;  %v5304_v42 = vpop.eup %4415  ;;  %4435 = vrcp.f32 %v1100_v38  ;;  %v149_v9 = vsel %vm78_vm0, %v5024_v48, 0.0 }
  0x96   :  { %8070 = vst [vmem:[#allocation30_spill] sm:$0xff] %v5304_v42  ;;  %v5313_v58 = vpop.eup %4417  ;;  %4437 = vpow2.f32 %v5216_v51  ;;  %v1696_v50 = vadd.s32 4294967280, %v1684_v62 }
  0x97   :  { %8069 = vst [vmem:[#allocation29_spill] sm:$0xff] %v5300_v59  ;;  %8071 = vst [vmem:[#allocation31_spill] sm:$0xff] %v5313_v58  ;;  %v5320_v38 = vpop.eup %4419  ;;  %4439 = vpow2.f32 %v5228_v31  ;;  %v246_v8 = vsel %vm78_vm0, %v202_v28, 0.0  ;;  %v5332_v49 = vsub.s32 %v1684_v62, %v5300_v59  ;;  %v5335_v52 = vsub.s32 %v1689_v27, %v5300_v59 }
  0x98   :  { %8072 = vst [vmem:[#allocation32_spill] sm:$0xff] %v5320_v38  ;;  %v5328_v51 = vpop.eup %4421  ;;  %4441 = vpow2.f32 %v5232_v23  ;;  %v5338_v31 = vsel %vm78_vm0, %v210_v14, 0.0  ;;  %v1703_v23 = vadd.s32 4294967272, %v1684_v62  ;;  %v5351_v27 = vsub.s32 %v1696_v50, %v5300_v59 }
  0x99   :  { %259 = vadd.xlane.f32.xlu1 %v258_v7  ;;  %256 = vadd.xlane.f32.xlu0 %v255_v37  ;;  %v161_v7 = vsel %vm78_vm0, %v5043_v53, 0.0  ;;  %v173_v37 = vsel %vm78_vm0, %v5057_v57, 0.0  ;;  %8073 = vst [vmem:[#allocation33_spill] sm:$0xff] %v5328_v51  ;;  %v5340_v5 = vpop.eup %4423  ;;  %4443 = vpow2.f32 %v5243_v1  ;;  %v5344_v53 = vsel %vm78_vm0, %v207_v30, 0.0 }
  0x9a   :  { %8074 = vst [vmem:[#allocation34_spill] sm:$0xff] %v5340_v5  ;;  %v211_v57 = vmul.f32 %v4898_v12, %v4898_v12  ;;  %v5348_v28 = vpop.eup %4425  ;;  %4445 = vpow2.f32 %v4017_v22  ;;  %v208_v14 = vmul.f32 %v4912_v16, %v4912_v16  ;;  %v203_v1 = vmul.f32 %v4917_v17, %v4917_v17 }
  0x9b   :  { %8075 = vst [vmem:[#allocation35_spill] sm:$0xff] %v5348_v28  ;;  %4447 = vpow2.f32 %v5268_v55  ;;  %v5362_v12 = vsel %vm91_vm1, %v5052_v56, 0.0  ;;  %v1710_v30 = vadd.s32 4294967264, %v1684_v62  ;;  %v215_v22 = vmul.f32 %v4926_v20, %v4926_v20 }
  0x9c   :  { %4449 = vpow2.f32 %v5271_v0  ;;  %v5371_v16 = vsel %vm78_vm0, %v5066_v60, 0.0  ;;  %v5375_v17 = vsel %vm78_vm0, %v5071_v61, 0.0  ;;  %v212_v56 = vmul.f32 %v4931_v21, %v4931_v21 }
  0x9d   :  { %150 = vadd.xlane.f32.xlu1 %v149_v9  ;;  %138 = vadd.xlane.f32.xlu0 %v137_v13  ;;  %v5357_v9 = vpop.eup %4427  ;;  %4451 = vpow2.f32 %v5274_v15  ;;  %v5383_v20 = vsel %vm78_vm0, %v211_v57, 0.0  ;;  %v5386_v0 = vsub.s32 %v1703_v23, %v5300_v59  ;;  %v5390_v60 = vsel %vm78_vm0, %v5080_v3, 0.0 }
  0x9e   :  { %8076 = vst [vmem:[#allocation36_spill] sm:$0xff] %v5357_v9  ;;  %v5366_v13 = vpop.eup %4429  ;;  %4453 = vpow2.f32 %v5279_v43  ;;  %v5397_v15 = vsel %vm78_vm0, %v5085_v4, 0.0  ;;  %v5403_v50 = vsel %vm78_vm0, %v203_v1, 0.0  ;;  %v5409_v43 = vsub.s32 %v1710_v30, %v5300_v59 }
  0x9f   :  { %8077 = vst [vmem:[#allocation37_spill] sm:$0xff] %v5366_v13  ;;  %v5379_v55 = vpop.eup %4431  ;;  %4455 = vpow2.f32 %v5282_v36  ;;  %v5412_v57 = vsel %vm78_vm0, %v215_v22, 0.0  ;;  %v5416_v4 = vsel %vm78_vm0, %v212_v56, 0.0  ;;  %v216_v36 = vmul.f32 %v4945_v25, %v4945_v25 }
  0xa0   :  { %8078 = vst [vmem:[#allocation38_spill] sm:$0xff] %v5379_v55  ;;  %v5392_v61 = vpop.eup %4433  ;;  %4457 = vpow2.f32 %v5291_v2  ;;  %v5427_v22 = vsel %vm78_vm0, %v5113_v19, 0.0  ;;  %v5431_v2 = vsel %vm78_vm0, %v5094_v10, 0.0 }
  0xa1   :  { %171 = vadd.xlane.f32.xlu1 %v170_v35  ;;  %162 = vadd.xlane.f32.xlu0 %v161_v7  ;;  %8079 = vst [vmem:[#allocation39_spill] sm:$0xff] %v5392_v61  ;;  %v5400_v35 = vsel %vm78_vm0, %v208_v14, 0.0  ;;  %v5405_v7 = vpop.eup %4435  ;;  %v5420_v14 = vsel %vm91_vm1, %v5099_v11, 0.0  ;;  %4459 = vpow2.f32 %v5294_v63  ;;  %v209_v63 = vmul.f32 %v4959_v29, %v4959_v29  ;;  %v8082_v29 = vld [vmem:[#allocation10_spill] sm:$0xff] }
  0xa2   :  { %v377_v21 = vpop.xlane.xlu1 %376  ;;  %v362_v62 = vpop.xlane.xlu0 %361  ;;  %8080 = vst [vmem:[#allocation40_spill] sm:$0xff] %v5405_v7  ;;  %v217_v13 = vmul.f32 %v8082_v29, %v8082_v29 }
  0xa3   :  { %v4025_v3 = vmul.f32 -1.442695, %v362_v62  ;;  %v4438_v23 = vpop.eup %4437  ;;  %v4030_v30 = vmul.f32 -1.442695, %v377_v21  ;;  %v2124_v11 = vrot.slane %v377_v21, %v5332_v49  ;;  %v2100_v19 = vrot.slane %v362_v62, %v5332_v49 }
  0xa4   :  { %v4440_v1 = vpop.eup %4439 }
  0xa5   :  { %247 = vadd.xlane.f32.xlu1 %v246_v8  ;;  %174 = vadd.xlane.f32.xlu0 %v173_v37  ;;  %v4442_v56 = vpop.eup %4441  ;;  %4461 = vpow2.f32 %v4025_v3  ;;  %v204_v8 = vmul.f32 %v4940_v24, %v4940_v24  ;;  %v5445_v3 = vsel %vm78_vm0, %v216_v36, 0.0  ;;  %v1111_v36 = vadd.f32 1.0, %v4438_v23 }
  0xa6   :  { %v380_v59 = vpop.xlane.xlu1 %379  ;;  %v365_v25 = vpop.xlane.xlu0 %364  ;;  %4463 = vpow2.f32 %v5307_v46 }
  0xa7   :  { %v4444_v37 = vpop.eup %4443  ;;  %v2128_v7 = vrot.slane %v380_v59, %v5335_v52  ;;  %v4026_v61 = vmul.f32 -1.442695, %v365_v25  ;;  %v2104_v10 = vrot.slane %v365_v25, %v5335_v52  ;;  %v4031_v21 = vmul.f32 -1.442695, %v380_v59  ;;  %v8084_v25 = vld [vmem:[#allocation8_spill] sm:$0xff] }
  0xa8   :  { %v5441_v55 = vpop.eup %4445  ;;  %4465 = vpow2.f32 %v4030_v30  ;;  %v213_v59 = vmul.f32 %v8084_v25, %v8084_v25  ;;  %v5460_v30 = vsel %vm91_vm1, %v209_v63, 0.0  ;;  %v5471_v23 = vsel %vm91_vm1, %v204_v8, 0.0  ;;  %v8089_v63 = vld [vmem:[#allocation9_spill] sm:$0xff] }
  0xa9   :  { %8081 = vst [vmem:[#allocation41_spill] sm:$0xff] %v5441_v55  ;;  %v5449_v24 = vpop.eup %4447  ;;  %v2129_v62 = vsel %vm8041_vm3, %v2128_v7, %v2124_v11  ;;  %v2105_v9 = vsel %vm8041_vm3, %v2104_v10, %v2100_v19  ;;  %271 = vadd.xlane.f32.xlu1 %v5338_v31  ;;  %262 = vadd.xlane.f32.xlu0 %v5344_v53  ;;  %4467 = vpow2.f32 %v4026_v61  ;;  %v8086_v7 = vld [vmem:[#allocation12_spill] sm:$0xff]  ;;  %v1108_v61 = vadd.f32 1.0, %v4440_v1 }
  0xaa   :  { %8083 = vst [vmem:[#allocation10_spill] sm:$0xff] %v5449_v24  ;;  %v5457_v46 = vpop.eup %4449  ;;  %v383_v28 = vpop.xlane.xlu1 %382  ;;  %v221_v11 = vmul.f32 %v8086_v7, %v8086_v7  ;;  %4469 = vpow2.f32 %v4031_v21  ;;  %v220_v51 = vmul.f32 %v8089_v63, %v8089_v63  ;;  %v5482_v1 = vsel %vm78_vm0, %v217_v13, 0.0 }
  0xab   :  { %8085 = vst [vmem:[#allocation8_spill] sm:$0xff] %v5457_v46  ;;  %v368_v29 = vpop.xlane.xlu0 %367  ;;  %v5464_v19 = vpop.eup %4451  ;;  %v4032_v31 = vmul.f32 -1.442695, %v383_v28  ;;  %v2133_v53 = vrot.slane %v383_v28, %v5351_v27  ;;  %v1105_v8 = vadd.f32 1.0, %v4442_v56  ;;  %v5487_v58 = vsel %vm78_vm0, %v213_v59, 0.0 }
  0xac   :  { %8087 = vst [vmem:[#allocation12_spill] sm:$0xff] %v5464_v19  ;;  %v4027_v10 = vmul.f32 -1.442695, %v368_v29  ;;  %v2109_v25 = vrot.slane %v368_v29, %v5351_v27  ;;  %v5468_v5 = vpop.eup %4453 }
  0xad   :  { %8088 = vst [vmem:[#allocation42_spill] sm:$0xff] %v5468_v5  ;;  %v5475_v38 = vpop.eup %4455  ;;  %4471 = vpow2.f32 %v4032_v31  ;;  %v2134_v7 = vsel %vm8042_vm4, %v2133_v53, %v2129_v62  ;;  %153 = vadd.xlane.f32.xlu1 %v5362_v12  ;;  %274 = vadd.xlane.f32.xlu0 %v5383_v20  ;;  %v5490_v62 = vsel %vm78_vm0, %v221_v11, 0.0  ;;  %v5499_v53 = vsel %vm78_vm0, %v220_v51, 0.0 }
  0xae   :  { %8090 = vst [vmem:[#allocation9_spill] sm:$0xff] %v5475_v38  ;;  %v2110_v28 = vsel %vm8042_vm4, %v2109_v25, %v2105_v9  ;;  %v5484_v21 = vpop.eup %4457  ;;  %4473 = vrcp.f32 %v1111_v36  ;;  %v395_v29 = vpop.xlane.xlu1 %394  ;;  %v5496_v36 = vadd.f32 1.0, %v4444_v37 }
  0xaf   :  { %8091 = vst [vmem:[#allocation43_spill] sm:$0xff] %v5484_v21  ;;  %v392_v63 = vpop.xlane.xlu0 %391  ;;  %v5492_v9 = vpop.eup %4459  ;;  %4475 = vpow2.f32 %v4027_v10  ;;  %v4036_v12 = vmul.f32 -1.442695, %v395_v29  ;;  %v2152_v20 = vrot.slane %v395_v29, %v5335_v52  ;;  %v218_v10 = vmul.f32 %v5001_v41, %v5001_v41  ;;  %v8095_v29 = vld [vmem:[#allocation13_spill] sm:$0xff] }
  0xb0   :  { %8092 = vst [vmem:[#allocation44_spill] sm:$0xff] %v5492_v9  ;;  %v2148_v13 = vrot.slane %v392_v63, %v5332_v49  ;;  %v4462_v31 = vpop.eup %4461  ;;  %4477 = vrcp.f32 %v1108_v61  ;;  %8093 = vst [vmem:[#allocation45_spill] sm:$0xff] %v5496_v36  ;;  %v4035_v56 = vmul.f32 -1.442695, %v392_v63  ;;  %v5510_v51 = vsel %vm78_vm0, %v8095_v29, 0.0  ;;  %v5764_v36 = vld [vmem:[#allocation2] sm:$0xff] }
  0xb1   :  { %v1482_v59 = vadd.f32 1.0, %v4462_v31  ;;  %4479 = vpow2.f32 %v4036_v12  ;;  %177 = vadd.xlane.f32.xlu1 %v5371_v16  ;;  %165 = vadd.xlane.f32.xlu0 %v5375_v17  ;;  %v5506_v25 = vpop.eup %4463  ;;  %v5514_v63 = vsel %vm91_vm1, %v5108_v18, 0.0  ;;  %v8096_v16 = vld [vmem:[#allocation11_spill] sm:$0xff]  ;;  %v222_v18 = vmul.f32 %v4996_v40, %v4996_v40  ;;  %8106 = vst [vmem:[#allocation50_spill] sm:$0xff] %v5764_v36 }
  0xb2   :  { %v2153_v11 = vsel %vm8041_vm3, %v2152_v20, %v2148_v13  ;;  %8094 = vst [vmem:[#allocation46_spill] sm:$0xff] %v5506_v25  ;;  %4481 = vrcp.f32 %v1105_v8  ;;  %v386_v37 = vpop.xlane.xlu1 %385  ;;  %v214_v17 = vmul.f32 %v8096_v16, %v8096_v16  ;;  %v4466_v12 = vpop.eup %4465  ;;  %v225_v8 = vmul.f32 %v5015_v45, %v5015_v45 }
  0xb3   :  { %v371_v61 = vpop.xlane.xlu0 %370  ;;  %4483 = vrcp.f32 %v1482_v59  ;;  %v4033_v41 = vmul.f32 -1.442695, %v386_v37  ;;  %v2138_v20 = vrot.slane %v386_v37, %v5386_v0  ;;  %v4468_v13 = vpop.eup %4467  ;;  %v5530_v59 = vsel %vm78_vm0, %v218_v10, 0.0 }
  0xb4   :  { %4485 = vpow2.f32 %v4035_v56  ;;  %v4028_v31 = vmul.f32 -1.442695, %v371_v61  ;;  %v2114_v29 = vrot.slane %v371_v61, %v5386_v0  ;;  %v1483_v25 = vadd.f32 1.0, %v4468_v13  ;;  %v4470_v45 = vpop.eup %4469 }
  0xb5   :  { %4487 = vpow2.f32 %v4033_v41  ;;  %v5525_v16 = vsel %vm8040_vm5, %v2138_v20, %v2134_v7  ;;  %189 = vadd.xlane.f32.xlu1 %v5390_v60  ;;  %186 = vadd.xlane.f32.xlu0 %v5397_v15  ;;  %v5534_v42 = vsel %vm91_vm1, %v214_v17, 0.0  ;;  %v226_v40 = vmul.f32 %v5010_v44, %v5010_v44 }
  0xb6   :  { %v2115_v56 = vsel %vm8040_vm5, %v2114_v29, %v2110_v28  ;;  %v407_v37 = vpop.xlane.xlu1 %406  ;;  %v223_v7 = vmul.f32 %v5024_v48, %v5024_v48  ;;  %v1487_v41 = vadd.f32 1.0, %v4466_v12  ;;  %4489 = vrcp.f32 %v1483_v25  ;;  %v4737_v25 = vld [vmem:[%s7960_s0 + $0x98] sm:$0xf] }
  0xb7   :  { %v398_v61 = vpop.xlane.xlu0 %397  ;;  %v4472_v60 = vpop.eup %4471  ;;  %v4040_v15 = vmul.f32 -1.442695, %v407_v37  ;;  %v5541_v10 = vsel %vm78_vm0, %v225_v8, 0.0  ;;  %4491 = vpow2.f32 %v4028_v31  ;;  %v5547_v13 = vsel %vm78_vm0, %v222_v18, 0.0 }
  0xb8   :  { %v5543_v20 = vpop.eup %4473  ;;  %v4037_v28 = vmul.f32 -1.442695, %v398_v61  ;;  %v2157_v17 = vrot.slane %v398_v61, %v5351_v27  ;;  %v1488_v29 = vadd.f32 1.0, %v4470_v45  ;;  %v5553_v48 = vsel %vm91_vm1, %v5122_v26, 0.0 }
  0xb9   :  { %8097 = vst [vmem:[#allocation13_spill] sm:$0xff] %v5543_v20  ;;  %v4476_v44 = vpop.eup %4475  ;;  %4493 = vpow2.f32 %v4040_v15  ;;  %265 = vadd.xlane.f32.xlu1 %v5400_v35  ;;  %250 = vadd.xlane.f32.xlu0 %v5403_v50  ;;  %v219_v12 = vmul.f32 %v4737_v25, %v4737_v25  ;;  %v1489_v31 = vadd.f32 1.0, %v4472_v60  ;;  %v5562_v35 = vsel %vm78_vm0, %v226_v40, 0.0  ;;  %v4738_v25 = vld [vmem:[%s7960_s0 + $0xf0] sm:$0xff] }
  0xba   :  { %v5558_v8 = vpop.eup %4477  ;;  %v2158_v18 = vsel %vm8042_vm4, %v2157_v17, %v2153_v11  ;;  %v374_v45 = vpop.xlane.xlu1 %373  ;;  %v5565_v50 = vsel %vm78_vm0, %v223_v7, 0.0  ;;  %4495 = vrcp.f32 %v1487_v41  ;;  %v230_v60 = vmul.f32 %v4738_v25, %v4738_v25 }
  0xbb   :  { %8098 = vst [vmem:[#allocation11_spill] sm:$0xff] %v5558_v8  ;;  %v410_v61 = vpop.xlane.xlu0 %409  ;;  %v4480_v26 = vpop.eup %4479  ;;  %v4029_v15 = vmul.f32 -1.442695, %v374_v45  ;;  %v2119_v20 = vrot.slane %v374_v45, %v5409_v43  ;;  %v1484_v11 = vadd.f32 1.0, %v4476_v44  ;;  %v2172_v17 = vrot.slane %v407_v37, %v5332_v49 }
  0xbc   :  { %v5571_v8 = vpop.eup %4481  ;;  %4497 = vpow2.f32 %v4037_v28  ;;  %v2176_v40 = vrot.slane %v410_v61, %v5335_v52  ;;  %v1493_v54 = vadd.f32 1.0, %v4480_v26  ;;  %v5579_v45 = vsel %vm91_vm1, %v219_v12, 0.0  ;;  %v4740_v26 = vld [vmem:[%s7960_s0 + $0xc0] sm:$0xf] }
  0xbd   :  { %8099 = vst [vmem:[#allocation47_spill] sm:$0xff] %v5571_v8  ;;  %v4484_v7 = vpop.eup %4483  ;;  %4499 = vrcp.f32 %v1488_v29  ;;  %v2120_v41 = vsel %vm1715_vm6, %v2119_v20, %v2115_v56  ;;  %286 = vadd.xlane.f32.xlu1 %v5412_v57  ;;  %277 = vadd.xlane.f32.xlu0 %v5416_v4  ;;  %v4041_v44 = vmul.f32 -1.442695, %v410_v61  ;;  %v4739_v29 = vld [vmem:[%s7960_s0 + $0xd8] sm:$0xff]  ;;  %v5589_v12 = vsel %vm78_vm0, %v230_v60, 0.0 }
  0xbe   :  { %v4486_v25 = vpop.eup %4485  ;;  %4501 = vrcp.f32 %v1489_v31  ;;  %v5582_v37 = vsel %vm8041_vm3, %v2176_v40, %v2172_v17  ;;  %v401_v28 = vpop.xlane.xlu1 %400  ;;  %v227_v56 = vmul.f32 %v4739_v29, %v4739_v29  ;;  %v224_v17 = vmul.f32 %v4740_v26, %v4740_v26 }
  0xbf   :  { %v389_v8 = vpop.xlane.xlu0 %388  ;;  %v4488_v20 = vpop.eup %4487  ;;  %4503 = vpow2.f32 %v4029_v15  ;;  %v4038_v57 = vmul.f32 -1.442695, %v401_v28  ;;  %v2162_v4 = vrot.slane %v401_v28, %v5386_v0  ;;  %v1688_v29 = vrot.slane %v4484_v7, %v5332_v49 }
  0xc0   :  { %4505 = vrcp.f32 %v1484_v11  ;;  %v4034_v31 = vmul.f32 -1.442695, %v389_v8  ;;  %v2143_v61 = vrot.slane %v389_v8, %v5409_v43  ;;  %v4490_v40 = vpop.eup %4489  ;;  %v1492_v15 = vadd.f32 1.0, %v4486_v25  ;;  %v4742_v25 = vld [vmem:[%s7960_s0 + $0x100] sm:$0xff] }
  0xc1   :  { %4507 = vrcp.f32 %v1493_v54  ;;  %v5597_v9 = vsel %vm8040_vm5, %v2162_v4, %v2158_v18  ;;  %168 = vadd.xlane.f32.xlu1 %v5420_v14  ;;  %289 = vadd.xlane.f32.xlu0 %v5445_v3  ;;  %v4492_v60 = vpop.eup %4491  ;;  %v1693_v8 = vrot.slane %v4490_v40, %v5335_v52  ;;  %v1490_v11 = vadd.f32 1.0, %v4488_v20  ;;  %v4741_v14 = vld [vmem:[%s7960_s0 + $0xf8] sm:$0xff] }
  0xc2   :  { %4509 = vpow2.f32 %v4041_v44  ;;  %v2144_v28 = vsel %vm1715_vm6, %v2143_v61, %v5525_v16  ;;  %v5604_v26 = vpop.xlane.xlu1 %421  ;;  %v231_v3 = vmul.f32 %v4741_v14, %v4741_v14  ;;  %v232_v44 = vmul.f32 %v4742_v25, %v4742_v25 }
  0xc3   :  { %v413_v54 = vpop.xlane.xlu0 %412  ;;  %v4494_v7 = vpop.eup %4493  ;;  %4511 = vpow2.f32 %v4038_v57  ;;  %v2289_v18 = vsel %vm8039_vm7, %v2144_v28, %v2120_v41  ;;  %v5614_v20 = vsel %vm8041_vm3, %v1693_v8, %v1688_v29  ;;  %v4045_v16 = vmul.f32 -1.442695, %v5604_v26  ;;  %v4743_v41 = vld [vmem:[%s7960_s0 + $0xe0] sm:$0xff] }
  0xc4   :  { %4513 = vpow2.f32 %v4034_v31  ;;  %v228_v57 = vmul.f32 %v4743_v41, %v4743_v41  ;;  %v5620_v4 = vpop.eup %4495  ;;  %v1485_v61 = vadd.f32 1.0, %v4492_v60  ;;  %v4042_v40 = vmul.f32 -1.442695, %v413_v54 }
  0xc5   :  { %4515 = vrcp.f32 %v1492_v15  ;;  %192 = vadd.xlane.f32.xlu1 %v5427_v22  ;;  %180 = vadd.xlane.f32.xlu0 %v5431_v2  ;;  %v5625_v29 = vsel %vm78_vm0, %v227_v56, 0.0  ;;  %v1497_v8 = vadd.f32 1.0, %v4494_v7  ;;  %v2181_v28 = vrot.slane %v413_v54, %v5351_v27 }
  0xc6   :  { %v4498_v31 = vpop.eup %4497  ;;  %4517 = vrcp.f32 %v1490_v11  ;;  %v404_v14 = vpop.xlane.xlu1 %403  ;;  %v5629_v41 = vsel %vm91_vm1, %v224_v17, 0.0  ;;  %v5634_v22 = vsel %vm78_vm0, %v231_v3, 0.0  ;;  %v5637_v2 = vsel %vm78_vm0, %v232_v44, 0.0  ;;  %v4744_v3 = vld [vmem:[%s7960_s0 + $0x120] sm:$0xff] }
  0xc7   :  { %v425_v25 = vpop.xlane.xlu0 %424  ;;  %v5631_v15 = vpop.eup %4499  ;;  %4519 = vpow2.f32 %v4045_v16  ;;  %v4039_v60 = vmul.f32 -1.442695, %v404_v14  ;;  %v1494_v11 = vadd.f32 1.0, %v4498_v31  ;;  %v2182_v54 = vsel %vm8042_vm4, %v2181_v28, %v5582_v37 }
  0xc8   :  { %v5639_v56 = vpop.eup %4501  ;;  %4521 = vpow2.f32 %v4042_v40  ;;  %v5644_v17 = vsel %vm78_vm0, %v228_v57, 0.0  ;;  %v2167_v16 = vrot.slane %v404_v14, %v5409_v43  ;;  %v4046_v21 = vmul.f32 -1.442695, %v425_v25 }
  0xc9   :  { %v4504_v7 = vpop.eup %4503  ;;  %4523 = vrcp.f32 %v1485_v61  ;;  %268 = vadd.xlane.f32.xlu1 %v5460_v30  ;;  %253 = vadd.xlane.f32.xlu0 %v5471_v23  ;;  %v236_v44 = vmul.f32 %v4744_v3, %v4744_v3  ;;  %v2196_v37 = vrot.slane %v5604_v26, %v5332_v49  ;;  %v2200_v57 = vrot.slane %v425_v25, %v5335_v52  ;;  %v4745_v30 = vld [vmem:[%s7960_s0 + $0x118] sm:$0xff] }
  0xca   :  { %v5652_v40 = vpop.eup %4505  ;;  %4525 = vrcp.f32 %v1497_v8  ;;  %v428_v61 = vpop.xlane.xlu1 %427  ;;  %v235_v23 = vmul.f32 %v4745_v30, %v4745_v30  ;;  %v2168_v14 = vsel %vm1715_vm6, %v2167_v16, %v5597_v9  ;;  %v1486_v26 = vadd.f32 1.0, %v4504_v7  ;;  %v4746_v9 = vld [vmem:[%s7960_s0 + $0x108] sm:$0xff] }
  0xcb   :  { %v416_v31 = vpop.xlane.xlu0 %415  ;;  %v5660_v28 = vpop.eup %4507  ;;  %4527 = vpow2.f32 %v4039_v60  ;;  %v4047_v3 = vmul.f32 -1.442695, %v428_v61  ;;  %v2205_v8 = vrot.slane %v428_v61, %v5351_v27  ;;  %v5666_v25 = vsel %vm8023_vm8, %v2168_v14, %v2289_v18  ;;  %v4749_v14 = vld [vmem:[%s7960_s0 + $0x128] sm:$0xff] }
  0xcc   :  { %v4510_v38 = vpop.eup %4509  ;;  %4529 = vrcp.f32 %v1494_v11  ;;  %v2201_v6 = vsel %vm8041_vm3, %v2200_v57, %v2196_v37  ;;  %v4043_v60 = vmul.f32 -1.442695, %v416_v31  ;;  %v233_v11 = vmul.f32 %v4746_v9, %v4746_v9 }
  0xcd   :  { %v4512_v39 = vpop.eup %4511  ;;  %4531 = vpow2.f32 %v4046_v21  ;;  %v5670_v30 = vsel %vm8042_vm4, %v2205_v8, %v2201_v6  ;;  %292 = vadd.xlane.f32.xlu1 %v5482_v1  ;;  %280 = vadd.xlane.f32.xlu0 %v5487_v58  ;;  %v2186_v7 = vrot.slane %v416_v31, %v5386_v0  ;;  %v4747_v6 = vld [vmem:[%s7960_s0 + $0xe8] sm:$0xf]  ;;  %v4748_v58 = vld [vmem:[%s7960_s0 + $0x110] sm:$0xf]  ;;  %v1498_v9 = vadd.f32 1.0, %v4510_v38 }
  0xce   :  { %v4514_v18 = vpop.eup %4513  ;;  %4533 = vpow2.f32 %v4047_v3  ;;  %v5678_v16 = vpop.xlane.xlu1 %439  ;;  %v229_v1 = vmul.f32 %v4747_v6, %v4747_v6  ;;  %v234_v37 = vmul.f32 %v4748_v58, %v4748_v58  ;;  %v237_v3 = vmul.f32 %v4749_v14, %v4749_v14 }
  0xcf   :  { %v5680_v21 = vpop.xlane.xlu0 %436  ;;  %v5688_v57 = vpop.eup %4515  ;;  %v1491_v61 = vadd.f32 1.0, %v4514_v18  ;;  %4535 = vpow2.f32 %v4043_v60  ;;  %v4051_v31 = vmul.f32 -1.442695, %v5678_v16  ;;  %v2187_v6 = vsel %vm8040_vm5, %v2186_v7, %v2182_v54  ;;  %v4750_v18 = vld [vmem:[%s7960_s0 + $0x138] sm:$0xf] }
  0xd0   :  { %v5694_v8 = vpop.eup %4517  ;;  %4537 = vrcp.f32 %v1486_v26  ;;  %v4050_v5 = vmul.f32 -1.442695, %v5680_v21  ;;  %v1495_v19 = vadd.f32 1.0, %v4512_v39  ;;  %v5701_v60 = vsel %vm78_vm0, %v236_v44, 0.0 }
  0xd1   :  { %v4520_v58 = vpop.eup %4519  ;;  %4539 = vrcp.f32 %v1491_v61  ;;  %304 = vadd.xlane.f32.xlu1 %v5490_v62  ;;  %301 = vadd.xlane.f32.xlu0 %v5499_v53  ;;  %v239_v26 = vmul.f32 %v4750_v18, %v4750_v18  ;;  %v5709_v39 = vsel %vm78_vm0, %v235_v23, 0.0  ;;  %v5712_v62 = vsel %vm78_vm0, %v233_v11, 0.0  ;;  %v5717_v53 = vld [vmem:[%s7960_s0 + $0x130] sm:$0xff] }
  0xd2   :  { %v4522_v38 = vpop.eup %4521  ;;  %4541 = vpow2.f32 %v4051_v31  ;;  %v5706_v54 = vpop.xlane.xlu1 %430  ;;  %8100 = vst [vmem:[#allocation48_spill] sm:$0xff] %v5717_v53  ;;  %v238_v44 = vmul.f32 %v5717_v53, %v5717_v53  ;;  %v1502_v31 = vadd.f32 1.0, %v4520_v58  ;;  %v5725_v23 = vsel %vm91_vm1, %v229_v1, 0.0 }
  0xd3   :  { %v419_v7 = vpop.xlane.xlu0 %418  ;;  %v5721_v61 = vpop.eup %4523  ;;  %4543 = vpow2.f32 %v4050_v5  ;;  %v4048_v14 = vmul.f32 -1.442695, %v5706_v54  ;;  %v1499_v11 = vadd.f32 1.0, %v4522_v38  ;;  %v5730_v33 = vsel %vm91_vm1, %v234_v37, 0.0 }
  0xd4   :  { %v5727_v18 = vpop.eup %4525  ;;  %4545 = vrcp.f32 %v1498_v9  ;;  %v5733_v32 = vsel %vm78_vm0, %v237_v3, 0.0  ;;  %v4044_v58 = vmul.f32 -1.442695, %v419_v7  ;;  %v2191_v5 = vrot.slane %v419_v7, %v5409_v43 }
  0xd5   :  { %v4528_v46 = vpop.eup %4527  ;;  %4547 = vrcp.f32 %v1495_v19  ;;  %195 = vadd.xlane.f32.xlu1 %v5510_v51  ;;  %183 = vadd.xlane.f32.xlu0 %v5514_v63  ;;  %v5739_v1 = vsel %vm91_vm1, %v239_v26, 0.0  ;;  %v5748_v3 = vsel %vm78_vm0, %v238_v44, 0.0  ;;  %v8102_v19 = vld [vmem:[#allocation17_spill] sm:$0xff]  ;;  %v8104_v51 = vld [vmem:[#allocation15_spill] sm:$0xff]  ;;  %v1724_v44 = vrot.slane %v5631_v15, %v5335_v52  ;;  %v8107_v15 = vld [vmem:[#allocation16_spill] sm:$0xff] }
  0xd6   :  { %v5741_v9 = vpop.eup %4529  ;;  %4549 = vpow2.f32 %v4048_v14  ;;  %v5743_v37 = vpop.xlane.xlu1 %451  ;;  %8101 = vst [vmem:[#allocation49_spill] sm:$0xff] %v5748_v3  ;;  %v5752_v7 = vsel %vm78_vm0, %v8102_v19, 0.0  ;;  %v5756_v63 = vsel %vm78_vm0, %v8104_v51, 0.0  ;;  %v1496_v53 = vadd.f32 1.0, %v4528_v46  ;;  %v5766_v51 = vld [vmem:[#allocation2 + $0x20] sm:$0xff] }
  0xd7   :  { %v5745_v38 = vpop.xlane.xlu0 %442  ;;  %8103 = vst [vmem:[#allocation17_spill] sm:$0xff] %v5752_v7  ;;  %8105 = vst [vmem:[#allocation15_spill] sm:$0xff] %v5756_v63  ;;  %v4532_v26 = vpop.eup %4531  ;;  %4551 = vrcp.f32 %v1502_v31  ;;  %v2192_v14 = vsel %vm1715_vm6, %v2191_v5, %v2187_v6  ;;  %v4055_v34 = vmul.f32 -1.442695, %v5743_v37  ;;  %v2210_v46 = vrot.slane %v5706_v54, %v5386_v0  ;;  %v8109_v54 = vld [vmem:[#allocation14_spill] sm:$0xff] }
  0xd8   :  { %v4534_v24 = vpop.eup %4533  ;;  %4553 = vrcp.f32 %v1499_v11  ;;  %v1503_v47 = vadd.f32 1.0, %v4532_v26  ;;  %v2291_v19 = vsel %vm8025_vm9, %v2192_v14, %v5666_v25  ;;  %v4052_v6 = vmul.f32 -1.442695, %v5745_v38 }
  0xd9   :  { %v4536_v55 = vpop.eup %4535  ;;  %4555 = vpow2.f32 %v4044_v58  ;;  %295 = vadd.xlane.f32.xlu1 %v5530_v59  ;;  %283 = vadd.xlane.f32.xlu0 %v5534_v42  ;;  %v5775_v31 = vsel %vm78_vm0, %v8107_v15, 0.0  ;;  %v1720_v11 = vrot.slane %v5620_v4, %v5332_v49  ;;  %v5785_v58 = vsel %vm78_vm0, %v8109_v54, 0.0  ;;  %v8111_v59 = vld [vmem:[#allocation18_spill] sm:$0xff] }
  0xda   :  { %8108 = vst [vmem:[#allocation16_spill] sm:$0xff] %v5775_v31  ;;  %v5777_v25 = vpop.eup %4537  ;;  %4557 = vpow2.f32 %v4055_v34  ;;  %v434_v5 = vpop.xlane.xlu1 %433  ;;  %8110 = vst [vmem:[#allocation14_spill] sm:$0xff] %v5785_v58  ;;  %v5789_v42 = vsel %vm78_vm0, %v8111_v59, 0.0  ;;  %v1504_v15 = vadd.f32 1.0, %v4534_v24  ;;  %v1500_v7 = vadd.f32 1.0, %v4536_v55 }
  0xdb   :  { %v5781_v26 = vpop.xlane.xlu0 %454  ;;  %v4540_v14 = vpop.eup %4539  ;;  %4559 = vrcp.f32 %v1496_v53  ;;  %v4049_v31 = vmul.f32 -1.442695, %v434_v5  ;;  %v1725_v34 = vsel %vm8041_vm3, %v1724_v44, %v1720_v11  ;;  %v2215_v3 = vrot.slane %v434_v5, %v5409_v43 }
  0xdc   :  { %v4542_v4 = vpop.eup %4541  ;;  %4561 = vrcp.f32 %v1503_v47  ;;  %v1729_v58 = vrot.slane %v5639_v56, %v5351_v27  ;;  %v2211_v59 = vsel %vm8040_vm5, %v2210_v46, %v5670_v30  ;;  %v4056_v24 = vmul.f32 -1.442695, %v5781_v26 }
  0xdd   :  { %v4544_v54 = vpop.eup %4543  ;;  %4563 = vpow2.f32 %v4052_v6  ;;  %316 = vadd.xlane.f32.xlu1 %v5541_v10  ;;  %307 = vadd.xlane.f32.xlu0 %v5547_v13  ;;  %v1734_v47 = vrot.slane %v5694_v8, %v5386_v0  ;;  %v1508_v55 = vadd.f32 1.0, %v4542_v4  ;;  %v2216_v44 = vsel %vm1715_vm6, %v2215_v3, %v2211_v59  ;;  %v5819_v8 = vld [vmem:[#allocation2 + $0x10] sm:$0xff] }
  0xde   :  { %v5802_v53 = vpop.eup %4545  ;;  %4565 = vpow2.f32 %v4049_v31  ;;  %v5807_v56 = vpop.xlane.xlu1 %457  ;;  %v1700_v10 = vrot.slane %v5652_v40, %v5351_v27  ;;  %v1739_v13 = vrot.slane %v4540_v14, %v5409_v43  ;;  %v5817_v46 = vsel %vm8038_vm10, %v2216_v44, %v2291_v19  ;;  %8112 = vst [vmem:[#allocation18_spill] sm:$0xff] %v5819_v8  ;;  %v5821_v6 = vld [vmem:[#allocation2 + $0x30] sm:$0xff] }
  0xdf   :  { %v5809_v11 = vpop.xlane.xlu0 %445  ;;  %v5811_v30 = vpop.eup %4547  ;;  %4567 = vrcp.f32 %v1504_v15  ;;  %8113 = vst [vmem:[#allocation51_spill] sm:$0xff] %v5821_v6  ;;  %v1707_v31 = vrot.slane %v5721_v61, %v5386_v0  ;;  %v1507_v5 = vadd.f32 1.0, %v4544_v54  ;;  %v4057_v4 = vmul.f32 -1.442695, %v5807_v56  ;;  %v5834_v15 = vld [vmem:[#allocation2 + $0x48] sm:$0xff] }
  0xe0   :  { %v4550_v3 = vpop.eup %4549  ;;  %4569 = vrcp.f32 %v1500_v7  ;;  %v1730_v40 = vsel %vm8042_vm4, %v1729_v58, %v1725_v34  ;;  %v1714_v19 = vrot.slane %v5777_v25, %v5409_v43  ;;  %v4053_v14 = vmul.f32 -1.442695, %v5809_v11  ;;  %v5836_v61 = vld [vmem:[#allocation2 + $0x68] sm:$0xff] }
  0xe1   :  { %v5826_v59 = vpop.eup %4551  ;;  %4571 = vpow2.f32 %v4056_v24  ;;  %198 = vadd.xlane.f32.xlu1 %v5553_v48  ;;  %319 = vadd.xlane.f32.xlu0 %v5562_v35  ;;  %v1505_v54 = vadd.f32 1.0, %v4550_v3  ;;  %v1735_v25 = vsel %vm8040_vm5, %v1734_v47, %v1730_v40  ;;  %v5847_v48 = vld [vmem:[#allocation2 + $0x58] sm:$0xff]  ;;  %v1702_v63 = vsel %vm8042_vm4, %v1700_v10, %v5614_v20 }
  0xe2   :  { %v5838_v7 = vpop.eup %4553  ;;  %4573 = vrcp.f32 %v1508_v55  ;;  %v5840_v44 = vpop.xlane.xlu1 %469  ;;  %8114 = vst [vmem:[#allocation52_spill] sm:$0xff] %v5847_v48  ;;  %v5849_v35 = vld [vmem:[#allocation2 + $0x78] sm:$0xff]  ;;  %v1740_v3 = vsel %vm1715_vm6, %v1739_v13, %v1735_v25  ;;  %v1709_v40 = vsel %vm8040_vm5, %v1707_v31, %v1702_v63  ;;  %v1748_v6 = vrot.slane %v5660_v28, %v5335_v52  ;;  %v5868_v13 = vld [vmem:[#allocation2 + $0x40] sm:$0xff] }
  0xe3   :  { %v5842_v58 = vpop.xlane.xlu0 %466  ;;  %v4556_v24 = vpop.eup %4555  ;;  %4575 = vpow2.f32 %v4057_v4  ;;  %v4061_v55 = vmul.f32 -1.442695, %v5840_v44  ;;  %v1716_v20 = vsel %vm1715_vm6, %v1714_v19, %v1709_v40  ;;  %v1744_v31 = vrot.slane %v5688_v57, %v5332_v49  ;;  %v5883_v19 = vld [vmem:[#allocation2 + $0x50] sm:$0xff] }
  0xe4   :  { %v4558_v36 = vpop.eup %4557  ;;  %4577 = vrcp.f32 %v1507_v5  ;;  %v4060_v47 = vmul.f32 -1.442695, %v5842_v58  ;;  %v1501_v5 = vadd.f32 1.0, %v4556_v24  ;;  %8115 = vst [vmem:[#allocation53_spill] sm:$0xff] %v5883_v19  ;;  %v2224_v40 = vrot.slane %v5678_v16, %v5335_v52 }
  0xe5   :  { %v5859_v8 = vpop.eup %4559  ;;  %4579 = vpow2.f32 %v4053_v14  ;;  %310 = vadd.xlane.f32.xlu1 %v5565_v50  ;;  %298 = vadd.xlane.f32.xlu0 %v5579_v45  ;;  %v5879_v50 = vsel %vm8039_vm7, %v1740_v3, %v1716_v20  ;;  %v5881_v45 = vld [vmem:[#allocation2 + $0x60] sm:$0xff]  ;;  %v5885_v14 = vld [vmem:[#allocation2 + $0x70] sm:$0xff]  ;;  %v1512_v57 = vadd.f32 1.0, %v4558_v36  ;;  %v1753_v10 = vrot.slane %v5741_v9, %v5351_v27 }
  0xe6   :  { %v5870_v63 = vpop.eup %4561  ;;  %4581 = vrcp.f32 %v1505_v54  ;;  %v5874_v28 = vpop.xlane.xlu1 %460  ;;  %v2220_v3 = vrot.slane %v5680_v21, %v5332_v49  ;;  %v1772_v48 = vrot.slane %v5802_v53, %v5335_v52  ;;  %v1749_v9 = vsel %vm8041_vm3, %v1748_v6, %v1744_v31 }
  0xe7   :  { %v5876_v4 = vpop.xlane.xlu0 %448  ;;  %v4564_v25 = vpop.eup %4563  ;;  %4583 = vpow2.f32 %v4061_v55  ;;  %v4058_v54 = vmul.f32 -1.442695, %v5874_v28  ;;  %v2229_v53 = vrot.slane %v5745_v38, %v5351_v27  ;;  %v1754_v31 = vsel %vm8042_vm4, %v1753_v10, %v1749_v9 }
  0xe8   :  { %v4566_v24 = vpop.eup %4565  ;;  %4585 = vpow2.f32 %v4060_v47  ;;  %v4054_v20 = vmul.f32 -1.442695, %v5876_v4  ;;  %v1509_v55 = vadd.f32 1.0, %v4564_v25  ;;  %v2225_v6 = vsel %vm8041_vm3, %v2224_v40, %v2220_v3 }
  0xe9   :  { %v5895_v34 = vpop.eup %4567  ;;  %4587 = vpow2.f32 %v4058_v54  ;;  %331 = vadd.xlane.f32.xlu1 %v5589_v12  ;;  %322 = vadd.xlane.f32.xlu0 %v5625_v29  ;;  %v1768_v54 = vrot.slane %v5727_v18, %v5332_v49  ;;  %v1506_v36 = vadd.f32 1.0, %v4566_v24  ;;  %v1758_v25 = vrot.slane %v5811_v30, %v5386_v0 }
  0xea   :  { %v5905_v21 = vpop.eup %4569  ;;  %4589 = vrcp.f32 %v1501_v5  ;;  %v5910_v47 = vpop.xlane.xlu1 %463  ;;  %v2230_v24 = vsel %vm8042_vm4, %v2229_v53, %v2225_v6  ;;  %v2234_v3 = vrot.slane %v5809_v11, %v5386_v0 }
  0xeb   :  { %v5912_v12 = vpop.xlane.xlu0 %472  ;;  %v4572_v29 = vpop.eup %4571  ;;  %4591 = vrcp.f32 %v1512_v57  ;;  %v4059_v16 = vmul.f32 -1.442695, %v5910_v47  ;;  %v1773_v57 = vsel %vm8041_vm3, %v1772_v48, %v1768_v54 }
  0xec   :  { %v5917_v19 = vpop.eup %4573  ;;  %4593 = vpow2.f32 %v4054_v20  ;;  %v4062_v38 = vmul.f32 -1.442695, %v5912_v12  ;;  %v1513_v10 = vadd.f32 1.0, %v4572_v29 }
  0xed   :  { %v4576_v5 = vpop.eup %4575  ;;  %4595 = vpow2.f32 %v4059_v16  ;;  %313 = vadd.xlane.f32.xlu1 %v5629_v41  ;;  %334 = vadd.xlane.f32.xlu0 %v5634_v22  ;;  %v1777_v41 = vrot.slane %v5838_v7, %v5351_v27  ;;  %v2239_v22 = vrot.slane %v5876_v4, %v5409_v43  ;;  %v1759_v4 = vsel %vm8040_vm5, %v1758_v25, %v1754_v31 }
  0xee   :  { %v5929_v40 = vpop.eup %4577  ;;  %4597 = vrcp.f32 %v1509_v55  ;;  %v5934_v30 = vpop.xlane.xlu1 %478  ;;  %v1514_v11 = vadd.f32 1.0, %v4576_v5 }
  0xef   :  { %v5936_v20 = vpop.xlane.xlu0 %475  ;;  %v4580_v16 = vpop.eup %4579  ;;  %4599 = vrcp.f32 %v1506_v36  ;;  %v4064_v48 = vmul.f32 -1.442695, %v5934_v30 }
  0xf0   :  { %v5943_v9 = vpop.eup %4581  ;;  %4601 = vpow2.f32 %v4062_v38  ;;  %v4063_v53 = vmul.f32 -1.442695, %v5936_v20  ;;  %v1510_v7 = vadd.f32 1.0, %v4580_v16  ;;  %v2235_v38 = vsel %vm8040_vm5, %v2234_v3, %v2230_v24 }
  0xf1   :  { %v4584_v29 = vpop.eup %4583  ;;  %4603 = vpow2.f32 %v4064_v48  ;;  %337 = vadd.xlane.f32.xlu1 %v5637_v2  ;;  %325 = vadd.xlane.f32.xlu0 %v5644_v17  ;;  %v2240_v48 = vsel %vm1715_vm6, %v2239_v22, %v2235_v38  ;;  %v1778_v17 = vsel %vm8042_vm4, %v1777_v41, %v1773_v57 }
  0xf2   :  { %v4586_v36 = vpop.eup %4585  ;;  %4605 = vrcp.f32 %v1513_v10  ;;  %v1518_v5 = vadd.f32 1.0, %v4584_v29  ;;  %v5956_v55 = vpop.xlane.xlu1 %83  ;;  %v1763_v29 = vrot.slane %v5859_v8, %v5409_v43 }
  0xf3   :  { %v5958_v18 = vpop.xlane.xlu0 %80  ;;  %v4588_v16 = vpop.eup %4587  ;;  %4607 = vpow2.f32 %v4063_v53  ;;  %v5962_v2 = vmul.f32 0.015625, %v5956_v55  ;;  %v1517_v25 = vadd.f32 1.0, %v4586_v36  ;;  %v5990_v36 = vsel %vm8035_vm11, %v2240_v48, %v5817_v46 }
  0xf4   :  { %v5965_v31 = vpop.eup %4589  ;;  %4609 = vrcp.f32 %v1514_v11  ;;  %v1515_v10 = vadd.f32 1.0, %v4588_v16  ;;  %v5968_v24 = vmul.f32 0.015625, %v5958_v18  ;;  %v1796_v11 = vrot.slane %v5870_v63, %v5335_v52 }
  0xf5   :  { %v5970_v3 = vpop.eup %4591  ;;  %4611 = vrcp.f32 %v1510_v7  ;;  %v2940_v57 = vrot.slane %v5962_v2, %v5335_v52  ;;  %349 = vadd.xlane.f32.xlu1 %v5701_v60  ;;  %346 = vadd.xlane.f32.xlu0 %v5709_v39  ;;  %v1782_v16 = vrot.slane %v5905_v21, %v5386_v0 }
  0xf6   :  { %v4594_v41 = vpop.eup %4593  ;;  %4613 = vrcp.f32 %v1518_v5  ;;  %v2936_v53 = vrot.slane %v5968_v24, %v5332_v49  ;;  %v5984_v8 = vpop.xlane.xlu1 %99 }
  0xf7   :  { %v5986_v7 = vpop.xlane.xlu0 %96  ;;  %v4596_v38 = vpop.eup %4595  ;;  %4615 = vrcp.f32 %v1515_v10  ;;  %v1511_v60 = vadd.f32 1.0, %v4594_v41  ;;  %v5993_v39 = vmul.f32 0.015625, %v5984_v8 }
  0xf8   :  { %8116 = vst [vmem:[#allocation54_spill] sm:$0xff] %v5986_v7  ;;  %v5996_v63 = vmul.f32 0.015625, %v5986_v7  ;;  %v5998_v5 = vpop.eup %4597  ;;  %4617 = vrcp.f32 %v1517_v25  ;;  %v1516_v6 = vadd.f32 1.0, %v4596_v38  ;;  %v2941_v22 = vsel %vm8041_vm3, %v2940_v57, %v2936_v53 }
  0xf9   :  { %v6003_v46 = vpop.eup %4599  ;;  %4619 = vrcp.f32 %v1511_v60  ;;  %v2964_v10 = vrot.slane %v5993_v39, %v5335_v52  ;;  %340 = vadd.xlane.f32.xlu1 %v5712_v62  ;;  %328 = vadd.xlane.f32.xlu0 %v5725_v23  ;;  %v1801_v25 = vrot.slane %v5895_v34, %v5351_v27  ;;  %v1787_v57 = vrot.slane %v5965_v31, %v5409_v43 }
  0xfa   :  { %8117 = vst [vmem:[#allocation55_spill] sm:$0xff] %v5996_v63  ;;  %v2960_v41 = vrot.slane %v5996_v63, %v5332_v49  ;;  %v4602_v21 = vpop.eup %4601  ;;  %4621 = vrcp.f32 %v1516_v6  ;;  %v6017_v53 = vpop.xlane.xlu1 %102  ;;  %v1764_v60 = vsel %vm1715_vm6, %v1763_v29, %v1759_v4  ;;  %v1820_v6 = vrot.slane %v5917_v19, %v5335_v52 }
  0xfb   :  { %8118 = vst [vmem:[#allocation56_spill] sm:$0xff] %v6017_v53  ;;  %v6019_v38 = vpop.xlane.xlu0 %86  ;;  %v4604_v48 = vpop.eup %4603  ;;  %v1519_v54 = vadd.f32 1.0, %v4602_v21  ;;  %v6024_v23 = vmul.f32 0.015625, %v6017_v53  ;;  %v1816_v31 = vrot.slane %v5929_v40, %v5332_v49  ;;  %v1783_v4 = vsel %vm8040_vm5, %v1782_v16, %v1778_v17 }
  0xfc   :  { %v2965_v62 = vsel %vm8041_vm3, %v2964_v10, %v2960_v41  ;;  %v6027_v63 = vmul.f32 0.015625, %v6019_v38  ;;  %v6029_v34 = vpop.eup %4605  ;;  %v1521_v7 = vadd.f32 1.0, %v4604_v48  ;;  %v8120_v19 = vrot.slane %v5826_v59, %v5332_v49 }
  0xfd   :  { %8119 = vst [vmem:[#allocation57_spill] sm:$0xff] %v6024_v23  ;;  %v4608_v29 = vpop.eup %4607  ;;  %4623 = vrcp.f32 %v1519_v54  ;;  %v2969_v10 = vrot.slane %v6024_v23, %v5351_v27  ;;  %343 = vadd.xlane.f32.xlu1 %v5730_v33  ;;  %352 = vadd.xlane.f32.xlu0 %v5733_v32  ;;  %v1806_v54 = vrot.slane %v5943_v9, %v5386_v0 }
  0xfe   :  { %v2945_v41 = vrot.slane %v6027_v63, %v5351_v27  ;;  %v1797_v40 = vsel %vm8041_vm3, %v1796_v11, %v8120_v19  ;;  %v6046_v48 = vpop.eup %4609  ;;  %4625 = vrcp.f32 %v1521_v7  ;;  %v1520_v17 = vadd.f32 1.0, %v4608_v29  ;;  %v6050_v16 = vpop.xlane.xlu1 %114 }
  0xff   :  { %8121 = vst [vmem:[#allocation58_spill] sm:$0xff] %v6050_v16  ;;  %v6052_v21 = vpop.xlane.xlu0 %111  ;;  %v1788_v33 = vsel %vm1715_vm6, %v1787_v57, %v1783_v4  ;;  %v4612_v23 = vpop.eup %4611  ;;  %v2970_v32 = vsel %vm8042_vm4, %v2969_v10, %v2965_v62  ;;  %v6058_v11 = vmul.f32 0.015625, %v6050_v16  ;;  %v1825_v7 = vrot.slane %v5998_v5, %v5351_v27  ;;  %v8123_v10 = vld [vmem:[#allocation49_spill] sm:$0xff] }
 0x100   :  { %v2946_v59 = vsel %vm8042_vm4, %v2945_v41, %v2941_v22  ;;  %v6061_v19 = vmul.f32 0.015625, %v6052_v21  ;;  %v6063_v9 = vpop.eup %4613  ;;  %4627 = vrcp.f32 %v1520_v17  ;;  %v1802_v29 = vsel %vm8042_vm4, %v1801_v25, %v1797_v40  ;;  %v8124_v41 = vld [vmem:[#allocation19_spill] sm:$0xff] }
 0x101   :  { %8122 = vst [vmem:[#allocation59_spill] sm:$0xff] %v6058_v11  ;;  %v1821_v57 = vsel %vm8041_vm3, %v1820_v6, %v1816_v31  ;;  %v4616_v4 = vpop.eup %4615  ;;  %v2988_v22 = vrot.slane %v6058_v11, %v5335_v52  ;;  %358 = vadd.xlane.f32.xlu1 %v5739_v1  ;;  %355 = vadd.xlane.f32.xlu0 %v8123_v10  ;;  %v6077_v16 = vsel %vm78_vm0, %v8124_v41, 0.0 }
 0x102   :  { %v2984_v62 = vrot.slane %v6061_v19, %v5332_v49  ;;  %v1888_v5 = vsel %vm8023_vm8, %v1764_v60, %v5879_v50  ;;  %v4618_v25 = vpop.eup %4617  ;;  %v1840_v6 = vrot.slane %v5970_v3, %v5332_v49  ;;  %v6083_v31 = vpop.xlane.xlu1 %105  ;;  %v1807_v17 = vsel %vm8040_vm5, %v1806_v54, %v1802_v29 }
 0x103   :  { %8125 = vst [vmem:[#allocation49_spill] sm:$0xff] %v6083_v31  ;;  %v6085_v40 = vpop.xlane.xlu0 %89  ;;  %v1811_v1 = vrot.slane %v6003_v46, %v5409_v43  ;;  %v1890_v10 = vsel %vm8025_vm9, %v1788_v33, %v1888_v5  ;;  %v4620_v41 = vpop.eup %4619  ;;  %v1844_v11 = vrot.slane %v6029_v34, %v5335_v52  ;;  %v6095_v60 = vmul.f32 0.015625, %v6083_v31  ;;  %v8130_v5 = vld [vmem:[#allocation15_spill] sm:$0xff] }
 0x104   :  { %8126 = vst [vmem:[#allocation19_spill] sm:$0xff] %v6085_v40  ;;  %v2989_v50 = vsel %vm8041_vm3, %v2988_v22, %v2984_v62  ;;  %v6098_v3 = vmul.f32 0.015625, %v6085_v40  ;;  %v4622_v53 = vpop.eup %4621  ;;  %v1826_v54 = vsel %vm8042_vm4, %v1825_v7, %v1821_v57  ;;  %v1830_v29 = vrot.slane %v4612_v23, %v5386_v0  ;;  %v8129_v62 = vld [vmem:[#allocation17_spill] sm:$0xff] }
 0x105   :  { %8127 = vst [vmem:[#allocation60_spill] sm:$0xff] %v6095_v60  ;;  %v1849_v46 = vrot.slane %v6046_v48, %v5351_v27  ;;  %v1854_v33 = vrot.slane %v4616_v4, %v5386_v0  ;;  %v2974_v34 = vrot.slane %v6095_v60, %v5386_v0  ;;  %1205 = vadd.xlane.f32.xlu1 %v8129_v62 }
 0x106   :  { %8128 = vst [vmem:[#allocation61_spill] sm:$0xff] %v6098_v3  ;;  %v2950_v22 = vrot.slane %v6098_v3, %v5386_v0  ;;  %1202 = vadd.xlane.f32.xlu0 %v8130_v5  ;;  %v1835_v40 = vrot.slane %v4620_v41, %v5409_v43  ;;  %v6112_v23 = vpop.xlane.xlu1 %126  ;;  %v1812_v48 = vsel %vm1715_vm6, %v1811_v1, %v1807_v17 }
 0x107   :  { %8131 = vst [vmem:[#allocation17_spill] sm:$0xff] %v6112_v23  ;;  %v6114_v7 = vpop.xlane.xlu0 %117  ;;  %v1859_v57 = vrot.slane %v4622_v53, %v5409_v43  ;;  %v1864_v4 = vrot.slane %v4618_v25, %v5332_v49  ;;  %v1868_v3 = vrot.slane %v6063_v9, %v5335_v52  ;;  %v4624_v62 = vpop.eup %4623  ;;  %v6122_v5 = vsel %vm8040_vm5, %v2974_v34, %v2970_v32  ;;  %v8133_v34 = vld [vmem:[#allocation16_spill] sm:$0xff] }
 0x108   :  { %8132 = vst [vmem:[#allocation15_spill] sm:$0xff] %v6114_v7  ;;  %v2951_v41 = vsel %vm8040_vm5, %v2950_v22, %v2946_v59  ;;  %v6126_v60 = vmul.f32 0.015625, %v6114_v7  ;;  %v1845_v31 = vsel %vm8041_vm3, %v1844_v11, %v1840_v6  ;;  %v4626_v17 = vpop.eup %4625  ;;  %v6130_v53 = vmul.f32 0.015625, %v6112_v23  ;;  %v8134_v59 = vld [vmem:[#allocation14_spill] sm:$0xff]  ;;  %v8135_v6 = vld [vmem:[#allocation20_spill] sm:$0xff] }
 0x109   :  { %v1831_v25 = vsel %vm8040_vm5, %v1830_v29, %v1826_v54  ;;  %v1850_v9 = vsel %vm8042_vm4, %v1849_v46, %v1845_v31  ;;  %v1873_v1 = vrot.slane %v4624_v62, %v5351_v27  ;;  %1220 = vadd.xlane.f32.xlu1 %v8133_v34  ;;  %v1234_v7 = vsel %vm78_vm0, %v8135_v6, 0.0 }
 0x10a   :  { %v2993_v32 = vrot.slane %v6126_v60, %v5351_v27  ;;  %1217 = vadd.xlane.f32.xlu0 %v8134_v59  ;;  %v1836_v22 = vsel %vm1715_vm6, %v1835_v40, %v1831_v25  ;;  %v1855_v11 = vsel %vm8040_vm5, %v1854_v33, %v1850_v9  ;;  %v4628_v23 = vpop.eup %4627  ;;  %v6143_v54 = vpop.xlane.xlu1 %93  ;;  %v1869_v46 = vsel %vm8041_vm3, %v1868_v3, %v1864_v4 }
 0x10b   :  { %v6145_v31 = vpop.xlane.xlu0 %129  ;;  %v1860_v29 = vsel %vm1715_vm6, %v1859_v57, %v1855_v11  ;;  %v1883_v62 = vrot.slane %v4626_v17, %v5409_v43  ;;  %v1892_v34 = vsel %vm8038_vm10, %v1812_v48, %v1890_v10  ;;  %v6153_v33 = vmul.f32 0.015625, %v6143_v54 }
 0x10c   :  { %v2994_v40 = vsel %vm8042_vm4, %v2993_v32, %v2989_v50  ;;  %v6156_v25 = vmul.f32 0.015625, %v6145_v31  ;;  %v1878_v9 = vrot.slane %v4628_v23, %v5386_v0  ;;  %v2277_v59 = vrot.slane %v5912_v12, %v5351_v27  ;;  %v8136_v12 = vld [vmem:[#allocation21_spill] sm:$0xff] }
 0x10d   :  { %v3008_v3 = vrot.slane %v6130_v53, %v5332_v49  ;;  %v1874_v57 = vsel %vm8042_vm4, %v1873_v1, %v1869_v46  ;;  %v1894_v10 = vsel %vm8035_vm11, %v1836_v22, %v1892_v34  ;;  %v2955_v50 = vrot.slane %v6153_v33, %v5409_v43  ;;  %1223 = vadd.xlane.f32.xlu1 %v5789_v42 }
 0x10e   :  { %v3012_v48 = vrot.slane %v6156_v25, %v5335_v52  ;;  %1208 = vadd.xlane.f32.xlu0 %v6077_v16  ;;  %v1879_v23 = vsel %vm8040_vm5, %v1878_v9, %v1874_v57  ;;  %v1231_v4 = vsel %vm78_vm0, %v8136_v12, 0.0  ;;  %v2258_v17 = vrot.slane %v5874_v28, %v5386_v0  ;;  %v6178_v32 = vpop.xlane.xlu1 %120 }
 0x10f   :  { %v2282_v1 = vrot.slane %v5936_v20, %v5386_v0  ;;  %v1884_v22 = vsel %vm1715_vm6, %v1883_v62, %v1879_v23  ;;  %v1896_v11 = vsel %vm8021_vm12, %v1860_v29, %v1894_v10  ;;  %v6182_v42 = vpop.xlane.xlu0 %108  ;;  %v2956_v16 = vsel %vm1715_vm6, %v2955_v50, %v2951_v41  ;;  %v8145_v50 = vld [vmem:[#allocation50_spill] sm:$0xff] }
 0x110   :  { %8137 = vst [vmem:[#allocation16_spill] sm:$0xff] %v6182_v42  ;;  %v3013_v6 = vsel %vm8041_vm3, %v3012_v48, %v3008_v3  ;;  %v6187_v46 = vmul.f32 0.015625, %v6178_v32  ;;  %v1898_v28 = vsel %vm8016_vm14, %v1884_v22, %v1896_v11  ;;  %v8139_v20 = vrot.slane %v5743_v37, %v5332_v49  ;;  %v8147_v48 = vld [vmem:[#allocation51_spill] sm:$0xff]  ;;  %v8148_v23 = vld [vmem:[#allocation18_spill] sm:$0xff]  ;;  %v8150_v22 = vld [vmem:[#allocation45_spill] sm:$0xff] }
 0x111   :  { %v8140_v34 = vrot.slane %v5781_v26, %v5335_v52  ;;  %v8141_v29 = vrot.slane %v5842_v58, %v5332_v49  ;;  %v8142_v41 = vrot.slane %v5840_v44, %v5335_v52  ;;  %v2263_v3 = vrot.slane %v5910_v47, %v5409_v43  ;;  %4067 = vmatmul.mubr.msk.f32.vlgmr.msra.gmra.mrb[0].mxu0 %vm8014_vm13, %v1898_v28  ;;  %v8144_v26 = vld [vmem:[#allocation41_spill] sm:$0xff] }
 0x112   :  { %8138 = vst [vmem:[#allocation14_spill] sm:$0xff] %v6187_v46  ;;  %4070 = vmatmul.mubr.msk.f32.vlgmr.msra.gmra.mrb[0].mxu1 %vm8014_vm13, %v1898_v28  ;;  %v6209_v37 = vmul.f32 0.015625, %v6182_v42  ;;  %v1113_v57 = vadd.f32 1.0, %v8144_v26  ;;  %v2287_v58 = vrot.slane %v5934_v30, %v5409_v43  ;;  %v2998_v44 = vrot.slane %v6187_v46, %v5386_v0  ;;  %1235 = vadd.xlane.f32.xlu1 %v1234_v7  ;;  %v8158_v7 = vld [vmem:[#allocation22_spill] sm:$0xff]  ;;  %v2463_v46 = vld [vmem:[#allocation2 + $0x190] sm:$0xff] }
 0x113   :  { %v2249_v62 = vsel %vm8041_vm3, %v8140_v34, %v8139_v20  ;;  %v2273_v9 = vsel %vm8041_vm3, %v8142_v41, %v8141_v29  ;;  %v8146_v47 = vpack.c.bf16 %v5766_v51, %v8145_v50  ;;  %v8149_v12 = vpack.c.bf16 %v8147_v48, %v8148_v23  ;;  %v6234_v20 = vpop.xlane.xlu1 %141  ;;  %v6236_v34 = vpop.xlane.xlu0 %132  ;;  %1232 = vadd.xlane.f32.xlu0 %v1231_v4 }
 0x114   :  { %8143 = vst [vmem:[#allocation20_spill] sm:$0xff] %v6209_v37  ;;  %v2278_v10 = vsel %vm8042_vm4, %v2277_v59, %v2273_v9  ;;  %4629 = vrcp.f32 %v8150_v22  ;;  %v8151_v11 = vrot.slane %v5807_v56, %v5351_v27  ;;  %v2979_v28 = vrot.slane %v6209_v37, %v5409_v43  ;;  %8153 = vst [vmem:[#allocation21_spill] sm:$0xff] %v6234_v20  ;;  %v8159_v9 = vld [vmem:[#allocation10_spill] sm:$0xff]  ;;  %v8166_v22 = vld [vmem:[#allocation48_spill] sm:$0xff] }
 0x115   :  { %4186 = vmatpush1.bf16.msra.mxu0 %v8146_v47  ;;  %4194 = vmatpush1.bf16.msra.mxu1 %v8149_v12  ;;  %v2283_v30 = vsel %vm8040_vm5, %v2282_v1, %v2278_v10  ;;  %v8152_v51 = vpack.c.bf16 %v5836_v61, %v5834_v15  ;;  %8154 = vst [vmem:[#allocation41_spill] sm:$0xff] %v6236_v34  ;;  %v6244_v1 = vmul.f32 0.015625, %v6236_v34  ;;  %v1225_v15 = vsel %vm78_vm0, %v8158_v7, 0.0  ;;  %v1619_v61 = vld [vmem:[#allocation2 + $0x88] sm:$0xf] }
 0x116   :  { %v2254_v59 = vsel %vm8042_vm4, %v8151_v11, %v2249_v62  ;;  %v2999_v56 = vsel %vm8040_vm5, %v2998_v44, %v2994_v40  ;;  %v8155_v62 = vld [vmem:[#allocation52_spill] sm:$0xff]  ;;  %v1109_v26 = vadd.f32 1.0, %v8159_v9  ;;  %v1621_v40 = vld [vmem:[#allocation2 + $0x98] sm:$0xf]  ;;  %v8160_v44 = vld [vmem:[#allocation23_spill] sm:$0xff]  ;;  %v8161_v50 = vmov 0.0   ;;  %1226 = vadd.xlane.f32.xlu1 %v1225_v15 }
 0x117   :  { %4188 = vmatprep.subr.bf16.mxu0 %v8152_v51  ;;  %v2259_v29 = vsel %vm8040_vm5, %v2258_v17, %v2254_v59  ;;  %v8156_v41 = vpack.c.bf16 %v5849_v35, %v8155_v62  ;;  %8157 = vst [vmem:[#allocation50_spill] sm:$0xff] %v6244_v1  ;;  %v2980_v17 = vsel %vm1715_vm6, %v2979_v28, %v6122_v5  ;;  %v1210_v35 = vsel %vm78_vm0, %v8160_v44, 0.0  ;;  %v1618_v59 = vld [vmem:[#allocation2 + $0x80] sm:$0xf]  ;;  %v8172_v62 = vld [vmem:[#allocation24_spill] sm:$0xff] }
 0x118   :  { %v2264_v10 = vsel %vm1715_vm6, %v2263_v3, %v2259_v29  ;;  %2374 = vmatprep.mubr.f32.mxu0 %v8161_v50  ;;  %2445 = vmatprep.mubr.f32.mxu1 %v8161_v50  ;;  %v3125_v4 = vsel %vm8039_vm7, %v2980_v17, %v2956_v16  ;;  %v6258_v47 = vmul.f32 0.015625, %v6234_v20  ;;  %v8163_v48 = vpack.c.bf16 %v5881_v45, %v5868_v13  ;;  %v8164_v3 = vld [vmem:[#allocation53_spill] sm:$0xff]  ;;  %v6271_v16 = vpop.xlane.xlu1 %123  ;;  %v6273_v45 = vpop.xlane.xlu0 %144  ;;  %v8174_v9 = vld [vmem:[#allocation12_spill] sm:$0xff]  ;;  %v8216_v20 = vld [vmem:[#allocation59_spill] sm:$0xff] }
 0x119   :  { %4196 = vmatprep.subr.bf16.mxu1 %v8156_v41  ;;  %v8165_v5 = vpack.c.bf16 %v5885_v14, %v8164_v3  ;;  %v3017_v23 = vrot.slane %v6244_v1, %v5351_v27  ;;  %v2288_v12 = vsel %vm1715_vm6, %v2287_v58, %v2283_v30  ;;  %4631 = vrcp.f32 %v1113_v57  ;;  %8167 = vst [vmem:[#allocation18_spill] sm:$0xff] %v6271_v16  ;;  %v1620_v13 = vld [vmem:[#allocation2 + $0x90] sm:$0xf]  ;;  %v8171_v30 = vld [vmem:[#allocation8_spill] sm:$0xff] }
 0x11a   :  { %8162 = vst [vmem:[#allocation51_spill] sm:$0xff] %v6258_v47  ;;  %4190 = vmatpush1.bf16.msra.mxu0 %v8163_v48  ;;  %v4023_v11 = vmul.f32 -1.442695, %v8166_v22  ;;  %8168 = vst [vmem:[#allocation45_spill] sm:$0xff] %v6273_v45  ;;  %1211 = vadd.xlane.f32.xlu0 %v1210_v35  ;;  %v6278_v28 = vmul.f32 0.015625, %v6271_v16  ;;  %v6281_v57 = vmul.f32 0.015625, %v6273_v45  ;;  %v2294_v58 = vsel %vm8021_vm12, %v2264_v10, %v5990_v36 }
 0x11b   :  { %4198 = vmatpush1.bf16.msra.mxu1 %v8165_v5  ;;  %4071 = vmatprep.subr.msk.mxu0 %vm8034_vm2, %v1619_v61  ;;  %v3018_v14 = vsel %vm8042_vm4, %v3017_v23, %v3013_v6  ;;  %v1117_v51 = vadd.f32 1.0, %v8171_v30  ;;  %v2295_v29 = vsel %vm8016_vm14, %v2288_v12, %v2294_v58  ;;  %v1246_v41 = vsel %vm78_vm0, %v8172_v62, 0.0  ;;  %v8173_v6 = vld [vmem:[#allocation25_spill] sm:$0xff]  ;;  %v8179_v5 = vld [vmem:[#allocation42_spill] sm:$0xff] }
 0x11c   :  { %4074 = vmatprep.subr.msk.mxu1 %vm8034_vm2, %v1621_v40  ;;  %8169 = vst [vmem:[#allocation52_spill] sm:$0xff] %v6278_v28  ;;  %8170 = vst [vmem:[#allocation22_spill] sm:$0xff] %v6281_v57  ;;  %v1237_v7 = vsel %vm78_vm0, %v8173_v6, 0.0  ;;  %4633 = vrcp.f32 %v1109_v26  ;;  %v3032_v15 = vrot.slane %v6258_v47, %v5332_v49  ;;  %v3003_v61 = vrot.slane %v6278_v28, %v5409_v43  ;;  %v6302_v26 = vpop.xlane.xlu1 %147  ;;  %v6304_v17 = vpop.xlane.xlu0 %135  ;;  %v8180_v22 = vld [vmem:[#allocation26_spill] sm:$0xff] }
 0x11d   :  { %v3036_v36 = vrot.slane %v6281_v57, %v5335_v52  ;;  %v1116_v10 = vadd.f32 1.0, %v8174_v9  ;;  %4635 = vpow2.f32 %v4023_v11  ;;  %8175 = vst [vmem:[#allocation10_spill] sm:$0xff] %v6302_v26  ;;  %8176 = vst [vmem:[#allocation23_spill] sm:$0xff] %v6304_v17  ;;  %1247 = vadd.xlane.f32.xlu1 %v1246_v41  ;;  %v6309_v35 = vmul.f32 0.015625, %v6302_v26  ;;  %v8181_v11 = vld [vmem:[#allocation27_spill] sm:$0xff]  ;;  %v8188_v9 = vld [vmem:[#allocation44_spill] sm:$0xff] }
 0x11e   :  { %4072 = vmatpush1.msk.msra.mxu0 %vm8034_vm2, %v1618_v59  ;;  %v3004_v40 = vsel %vm1715_vm6, %v3003_v61, %v2999_v56  ;;  %1238 = vadd.xlane.f32.xlu0 %v1237_v7  ;;  %v6312_v48 = vmul.f32 0.015625, %v6304_v17  ;;  %v6314_v3 = vpop.eup %4629  ;;  %v1114_v23 = vadd.f32 1.0, %v8179_v5  ;;  %v1213_v56 = vsel %vm91_vm1, %v8180_v22, 0.0  ;;  %v8190_v5 = vld [vmem:[#allocation30_spill] sm:$0xff]  ;;  %v8210_v17 = vld [vmem:[#allocation47_spill] sm:$0xff] }
 0x11f   :  { %4075 = vmatpush1.msk.msra.mxu1 %vm8034_vm2, %v1620_v13  ;;  %4073 = vmatmul.mubr.msk.f32.vlgmr.msra.gmra.mrb[0].mxu0 %vm8014_vm13, %v2295_v29  ;;  %v3037_v44 = vsel %vm8041_vm3, %v3036_v36, %v3032_v15  ;;  %8177 = vst [vmem:[#allocation53_spill] sm:$0xff] %v6309_v35  ;;  %v6318_v12 = vsel %vm8023_vm8, %v3004_v40, %v3125_v4  ;;  %v1249_v59 = vsel %vm78_vm0, %v8181_v11, 0.0  ;;  %4637 = vrcp.f32 %v1117_v51  ;;  %v8182_v4 = vld [vmem:[#allocation9_spill] sm:$0xff]  ;;  %v8189_v40 = vld [vmem:[#allocation28_spill] sm:$0xff]  ;;  %v2460_v28 = vld [vmem:[#allocation2 + $0x178] sm:$0xff] }
 0x120   :  { %4076 = vmatmul.mubr.msk.f32.vlgmr.msra.gmra.mrb[0].mxu1 %vm8014_vm13, %v2295_v29  ;;  %8178 = vst [vmem:[#allocation48_spill] sm:$0xff] %v6312_v48  ;;  %2790 = vmatprep.mubr.f32.mxu0 %v8161_v50  ;;  %v3041_v13 = vrot.slane %v6309_v35, %v5351_v27  ;;  %v3022_v58 = vrot.slane %v6312_v48, %v5386_v0  ;;  %4639 = vrcp.f32 %v1116_v10  ;;  %v1110_v30 = vadd.f32 1.0, %v8182_v4  ;;  %v8183_v29 = vld [vmem:[#allocation43_spill] sm:$0xff]  ;;  %v6332_v41 = vpop.xlane.xlu1 %159  ;;  %v6334_v6 = vpop.xlane.xlu0 %156 }
 0x121   :  { %2861 = vmatprep.mubr.f32.mxu1 %v8161_v50  ;;  %v1115_v62 = vadd.f32 1.0, %v8183_v29  ;;  %8184 = vst [vmem:[#allocation8_spill] sm:$0xff] %v6332_v41  ;;  %8185 = vst [vmem:[#allocation24_spill] sm:$0xff] %v6334_v6  ;;  %1214 = vadd.xlane.f32.xlu1 %v1213_v56  ;;  %v6343_v15 = vmul.f32 0.015625, %v6332_v41  ;;  %v6346_v61 = vmul.f32 0.015625, %v6334_v6  ;;  %4641 = vrcp.f32 %v1114_v23  ;;  %v2458_v6 = vld [vmem:[#allocation2 + $0x168] sm:$0xff] }
 0x122   :  { %v6337_v7 = vsel %vm8042_vm4, %v3041_v13, %v3037_v44  ;;  %v6340_v51 = vsel %vm8040_vm5, %v3022_v58, %v3018_v14  ;;  %1250 = vadd.xlane.f32.xlu0 %v1249_v59  ;;  %v1118_v10 = vadd.f32 1.0, %v8188_v9  ;;  %v1240_v44 = vsel %vm78_vm0, %v8189_v40, 0.0  ;;  %v8191_v59 = vld [vmem:[#allocation46_spill] sm:$0xff]  ;;  %v8209_v48 = vld [vmem:[#allocation11_spill] sm:$0xff] }
 0x123   :  { %8186 = vst [vmem:[#allocation25_spill] sm:$0xff] %v6343_v15  ;;  %8187 = vst [vmem:[#allocation12_spill] sm:$0xff] %v6346_v61  ;;  %v6348_v36 = vpop.eup %4631  ;;  %v1228_v14 = vsel %vm91_vm1, %v8190_v5, 0.0  ;;  %v3060_v22 = vrot.slane %v6343_v15, %v5335_v52  ;;  %v3056_v56 = vrot.slane %v6346_v61, %v5332_v49  ;;  %v521_v11 = vmul.f32 %v5962_v2, %v5956_v55  ;;  %v8192_v55 = vld [vmem:[#allocation31_spill] sm:$0xff]  ;;  %v8193_v2 = vld [vmem:[#allocation32_spill] sm:$0xff] }
 0x124   :  { %v520_v23 = vmul.f32 %v5968_v24, %v5958_v18  ;;  %4643 = vrcp.f32 %v1110_v30  ;;  %v1120_v13 = vadd.f32 1.0, %v8191_v59  ;;  %v245_v58 = vpop.xlane.xlu1 %244  ;;  %v242_v4 = vpop.xlane.xlu0 %241  ;;  %v1261_v18 = vsel %vm78_vm0, %v8192_v55, 0.0  ;;  %v8194_v61 = vld [vmem:[#allocation54_spill] sm:$0xff]  ;;  %v8198_v55 = vld [vmem:[#allocation35_spill] sm:$0xff] }
 0x125   :  { %4645 = vrcp.f32 %v1115_v62  ;;  %v6367_v9 = vsel %vm8041_vm3, %v3060_v22, %v3056_v56  ;;  %1241 = vadd.xlane.f32.xlu1 %v1240_v44  ;;  %v561_v40 = vsub.f32 %v245_v58, %v521_v11  ;;  %v1252_v24 = vsel %vm78_vm0, %v8193_v2, 0.0  ;;  %v8195_v22 = vld [vmem:[#allocation55_spill] sm:$0xff]  ;;  %v2456_v15 = vld [vmem:[#allocation2 + $0x158] sm:$0xff] }
 0x126   :  { %v6364_v29 = vpop.eup %4633  ;;  %1229 = vadd.xlane.f32.xlu0 %v1228_v14  ;;  %v560_v5 = vsub.f32 %v242_v4, %v520_v23  ;;  %4647 = vrcp.f32 %v1118_v10  ;;  %v526_v62 = vmul.f32 %v5993_v39, %v5984_v8  ;;  %v525_v56 = vmul.f32 %v8195_v22, %v8194_v61  ;;  %v8196_v8 = vld [vmem:[#allocation33_spill] sm:$0xff]  ;;  %v8197_v61 = vld [vmem:[#allocation34_spill] sm:$0xff] }
 0x127   :  { %v4636_v50 = vpop.eup %4635  ;;  %v601_v30 = vmax.f32 %v561_v40, 0.0  ;;  %4649 = vrcp.f32 %v1120_v13  ;;  %v1243_v39 = vsel %vm91_vm1, %v8196_v8, 0.0  ;;  %v1264_v13 = vsel %vm78_vm0, %v8197_v61, 0.0  ;;  %v8205_v61 = vld [vmem:[#allocation40_spill] sm:$0xff] }
 0x128   :  { %v600_v59 = vmax.f32 %v560_v5, 0.0  ;;  %v260_v44 = vpop.xlane.xlu1 %259  ;;  %v257_v14 = vpop.xlane.xlu0 %256  ;;  %v6385_v5 = vadd.f32 1.0, %v4636_v50  ;;  %v1267_v2 = vsel %vm78_vm0, %v8198_v55, 0.0  ;;  %v8201_v50 = vld [vmem:[#allocation38_spill] sm:$0xff]  ;;  %v6417_v55 = vsel %vm91_vm1, %v8205_v61, 0.0  ;;  %v2453_v61 = vld [vmem:[#allocation2 + $0x140] sm:$0xff] }
 0x129   :  { %v6377_v11 = vpop.eup %4637  ;;  %v6379_v10 = vmul.f32 0.015873017, %v601_v30  ;;  %1262 = vadd.xlane.f32.xlu1 %v1261_v18  ;;  %v566_v58 = vsub.f32 %v260_v44, %v526_v62  ;;  %v565_v4 = vsub.f32 %v257_v14, %v525_v56  ;;  %v8199_v30 = vld [vmem:[#allocation36_spill] sm:$0xff]  ;;  %v6402_v62 = vsel %vm78_vm0, %v8201_v50, 0.0  ;;  %v8204_v14 = vld [vmem:[#allocation39_spill] sm:$0xff] }
 0x12a   :  { %v6381_v23 = vmul.f32 0.015873017, %v600_v59  ;;  %1253 = vadd.xlane.f32.xlu0 %v1252_v24  ;;  %v6383_v40 = vpop.eup %4639  ;;  %v1255_v18 = vsel %vm78_vm0, %v8199_v30, 0.0  ;;  %v8200_v24 = vld [vmem:[#allocation37_spill] sm:$0xff]  ;;  %v6413_v8 = vsel %vm78_vm0, %v8204_v14, 0.0  ;;  %v2454_v50 = vld [vmem:[#allocation2 + $0x148] sm:$0xff] }
 0x12b   :  { %4651 = vrsqrt.f32 %v6379_v10  ;;  %v6398_v59 = vsel %vm78_vm0, %v8200_v24, 0.0  ;;  %v6404_v22 = vpop.eup %4641  ;;  %v8206_v30 = vld [vmem:[#allocation13_spill] sm:$0xff]  ;;  %v606_v41 = vmax.f32 %v566_v58, 0.0  ;;  %v605_v35 = vmax.f32 %v565_v4, 0.0 }
 0x12c   :  { %4653 = vrsqrt.f32 %v6381_v23  ;;  %v6407_v56 = vpop.xlane.xlu1 %150  ;;  %v6409_v44 = vpop.xlane.xlu0 %138  ;;  %v6421_v24 = vsel %vm78_vm0, %v8206_v30, 0.0  ;;  %v6433_v30 = vsel %vm78_vm0, %v8209_v48, 0.0  ;;  %v6437_v58 = vsel %vm91_vm1, %v8210_v17, 0.0 }
 0x12d   :  { %8202 = vst [vmem:[#allocation42_spill] sm:$0xff] %v6407_v56  ;;  %8203 = vst [vmem:[#allocation26_spill] sm:$0xff] %v6409_v44  ;;  %1244 = vadd.xlane.f32.xlu1 %v1243_v39  ;;  %v6424_v26 = vmul.f32 0.015625, %v6407_v56  ;;  %v6427_v14 = vmul.f32 0.015625, %v6409_v44  ;;  %v4199_v4 = vpack.c.bf16 %v2458_v6, %v2454_v50  ;;  %v4207_v39 = vpack.c.bf16 %v2460_v28, %v2456_v15  ;;  %v2459_v15 = vld [vmem:[#allocation2 + $0x170] sm:$0xff]  ;;  %v2462_v50 = vld [vmem:[#allocation2 + $0x188] sm:$0xff] }
 0x12e   :  { %1265 = vadd.xlane.f32.xlu0 %v1264_v13  ;;  %v6429_v16 = vpop.eup %4643  ;;  %v2457_v13 = vld [vmem:[#allocation2 + $0x160] sm:$0xff]  ;;  %v6441_v57 = vmul.f32 0.015873017, %v606_v41  ;;  %v6443_v44 = vmul.f32 0.015873017, %v605_v35  ;;  %v6449_v48 = vmul.f32 %v6027_v63, %v6019_v38  ;;  %v6461_v35 = vmul.f32 %v6061_v19, %v6052_v21  ;;  %v2455_v38 = vld [vmem:[#allocation2 + $0x150] sm:$0xff] }
 0x12f   :  { %8207 = vst [vmem:[#allocation27_spill] sm:$0xff] %v6424_v26  ;;  %8208 = vst [vmem:[#allocation9_spill] sm:$0xff] %v6427_v14  ;;  %v6439_v56 = vpop.eup %4645  ;;  %v3046_v45 = vrot.slane %v6424_v26, %v5386_v0  ;;  %v3027_v17 = vrot.slane %v6427_v14, %v5409_v43  ;;  %v6465_v41 = vsel %vm78_vm0, %v6314_v3, 0.0  ;;  %4200 = vmatprep.subr.bf16.mxu0 %v4199_v4  ;;  %4208 = vmatprep.subr.bf16.mxu1 %v4207_v39  ;;  %v8213_v14 = vld [vmem:[#allocation56_spill] sm:$0xff]  ;;  %v8214_v26 = vld [vmem:[#allocation57_spill] sm:$0xff] }
 0x130   :  { %v6451_v47 = vpop.eup %4647  ;;  %v6455_v28 = vpop.xlane.xlu1 %171  ;;  %v4201_v63 = vpack.c.bf16 %v2457_v13, %v2453_v61  ;;  %vm690_vm15 = vcmp.eq.f32.partialorder %v6379_v10, inf  ;;  %4655 = vrsqrt.f32 %v6441_v57  ;;  %v6471_v21 = vmul.f32 %v8214_v26, %v8213_v14  ;;  %v8215_v19 = vld [vmem:[#allocation58_spill] sm:$0xff]  ;;  %v2466_v4 = vld [vmem:[#allocation2 + $0x1a8] sm:$0xff]  ;;  %v2461_v14 = vld [vmem:[#allocation2 + $0x180] sm:$0xff] }
 0x131   :  { %8211 = vst [vmem:[#allocation43_spill] sm:$0xff] %v6455_v28  ;;  %v6457_v6 = vpop.xlane.xlu0 %162  ;;  %1268 = vadd.xlane.f32.xlu1 %v1267_v2  ;;  %v6475_v3 = vmul.f32 %v8216_v20, %v8215_v19  ;;  %v2464_v39 = vld [vmem:[#allocation2 + $0x198] sm:$0xff]  ;;  %v6477_v13 = vpop.eup %4649  ;;  %vm692_vm13 = vcmp.eq.f32.partialorder %v6379_v10, 0.0  ;;  %v693_v1 = vand.u32 2147483648, %v6379_v10  ;;  %vm683_vm14 = vcmp.eq.f32.partialorder %v6381_v23, inf  ;;  %v2465_v19 = vld [vmem:[#allocation2 + $0x1a0] sm:$0xff] }
 0x132   :  { %8212 = vst [vmem:[#allocation44_spill] sm:$0xff] %v6457_v6  ;;  %1256 = vadd.xlane.f32.xlu0 %v1255_v18  ;;  %v2468_v61 = vld [vmem:[#allocation2 + $0x1b8] sm:$0xff]  ;;  %4657 = vrsqrt.f32 %v6443_v44  ;;  %4202 = vmatpush1.bf16.msra.mxu0 %v4201_v63  ;;  %v6485_v26 = vsel %vm8040_vm5, %v3046_v45, %v6337_v7  ;;  %v3028_v20 = vsel %vm1715_vm6, %v3027_v17, %v6340_v51  ;;  %v6490_v2 = vmul.f32 0.015625, %v6455_v28  ;;  %v2467_v51 = vld [vmem:[#allocation2 + $0x1b0] sm:$0xff] }
 0x133   :  { %v6493_v18 = vmul.f32 0.015625, %v6457_v6  ;;  %v6497_v34 = vsel %vm8025_vm9, %v3028_v20, %v6318_v12  ;;  %v4209_v45 = vpack.c.bf16 %v2459_v15, %v2455_v38  ;;  %v4203_v7 = vpack.c.bf16 %v2466_v4, %v2462_v50 }
 0x134   :  { %v248_v63 = vpop.xlane.xlu1 %247  ;;  %v4211_v42 = vpack.c.bf16 %v2468_v61, %v2464_v39  ;;  %vm685_vm12 = vcmp.eq.f32.partialorder %v6381_v23, 0.0  ;;  %v686_v6 = vand.u32 2147483648, %v6381_v23  ;;  %vm725_vm8 = vcmp.eq.f32.partialorder %v6441_v57, inf  ;;  %v2874_v61 = vld [vmem:[#allocation2 + $0x1e8] sm:$0xff] }
 0x135   :  { %v6499_v37 = vpop.xlane.xlu0 %174  ;;  %v4652_v17 = vpop.eup %4651  ;;  %v3065_v28 = vrot.slane %v6493_v18, %v5351_v27  ;;  %1280 = vadd.xlane.f32.xlu1 %v6398_v59  ;;  %v562_v38 = vsub.f32 %v248_v63, %v6449_v48  ;;  %4210 = vmatpush1.bf16.msra.mxu1 %v4209_v45  ;;  %v4205_v50 = vpack.c.bf16 %v2465_v19, %v2461_v14  ;;  %vm727_vm9 = vcmp.eq.f32.partialorder %v6441_v57, 0.0 }
 0x136   :  { %v4654_v12 = vpop.eup %4653  ;;  %v689_v20 = vmul.f32 %v4652_v17, %v6379_v10  ;;  %1277 = vadd.xlane.f32.xlu0 %v6402_v62  ;;  %v6511_v15 = vmul.f32 0.015625, %v6499_v37  ;;  %4204 = vmatprep.subr.bf16.mxu0 %v4203_v7  ;;  %v4213_v59 = vpack.c.bf16 %v2467_v51, %v2463_v46  ;;  %v3080_v48 = vrot.slane %v6490_v2, %v5332_v49  ;;  %v2878_v7 = vld [vmem:[#allocation2 + $0x208] sm:$0xff] }
 0x137   :  { %v682_v4 = vmul.f32 %v4654_v12, %v6381_v23  ;;  %v6517_v39 = vsel %vm8042_vm4, %v3065_v28, %v6367_v9  ;;  %4212 = vmatprep.subr.bf16.mxu1 %v4211_v42  ;;  %v602_v14 = vmax.f32 %v562_v38, 0.0  ;;  %4206 = vmatpush1.bf16.msra.mxu0 %v4205_v50  ;;  %v2470_v9 = vld [vmem:[#allocation2 + $0x1c8] sm:$0xf]  ;;  %v2472_v28 = vld [vmem:[#allocation2 + $0x1d8] sm:$0xf] }
 0x138   :  { %v691_v62 = vsel %vm690_vm15, %v6379_v10, %v689_v20  ;;  %v3084_v19 = vrot.slane %v6511_v15, %v5335_v52  ;;  %v272_v63 = vpop.xlane.xlu1 %271  ;;  %v2469_v12 = vld [vmem:[#allocation2 + $0x1c0] sm:$0xf]  ;;  %4077 = vmatprep.subr.msk.mxu0 %vm8034_vm2, %v2470_v9 }
 0x139   :  { %v263_v45 = vpop.xlane.xlu0 %262  ;;  %v694_v42 = vsel %vm692_vm13, %v693_v1, %v691_v62  ;;  %v684_v46 = vsel %vm683_vm14, %v6381_v23, %v682_v4  ;;  %1271 = vadd.xlane.f32.xlu1 %v6413_v8  ;;  %v570_v51 = vsub.f32 %v272_v63, %v6461_v35  ;;  %v6537_v50 = vmul.f32 0.015873017, %v602_v14  ;;  %4214 = vmatpush1.bf16.msra.mxu1 %v4213_v59 }
 0x13a   :  { %v567_v17 = vsub.f32 %v263_v45, %v6471_v21  ;;  %v2520_v20 = vrot.slane %v694_v42, %v5335_v52  ;;  %v687_v38 = vsel %vm685_vm12, %v686_v6, %v684_v46  ;;  %v6540_v1 = vsel %vm8041_vm3, %v3084_v19, %v3080_v48  ;;  %1259 = vadd.xlane.f32.xlu0 %v6417_v55  ;;  %v4656_v10 = vpop.eup %4655  ;;  %v2471_v21 = vld [vmem:[#allocation2 + $0x1d0] sm:$0xf] }
 0x13b   :  { %v2516_v8 = vrot.slane %v687_v38, %v5332_v49  ;;  %v610_v35 = vmax.f32 %v570_v51, 0.0  ;;  %4080 = vmatprep.subr.msk.mxu1 %vm8034_vm2, %v2472_v28  ;;  %v4215_v23 = vpack.c.bf16 %v2878_v7, %v2874_v61  ;;  %v724_v62 = vmul.f32 %v4656_v10, %v6441_v57  ;;  %4078 = vmatpush1.msk.msra.mxu0 %vm8034_vm2, %v2469_v12 }
 0x13c   :  { %v607_v4 = vmax.f32 %v567_v17, 0.0  ;;  %v4658_v6 = vpop.eup %4657  ;;  %v728_v48 = vand.u32 2147483648, %v6441_v57  ;;  %vm718_vm12 = vcmp.eq.f32.partialorder %v6443_v44, inf  ;;  %4659 = vrsqrt.f32 %v6537_v50  ;;  %v6550_v55 = vpop.xlane.xlu1 %153  ;;  %v2876_v17 = vld [vmem:[#allocation2 + $0x1f8] sm:$0xff] }
 0x13d   :  { %v275_v59 = vpop.xlane.xlu0 %274  ;;  %v6554_v14 = vsel %vm8041_vm3, %v2520_v20, %v2516_v8  ;;  %v717_v19 = vmul.f32 %v4658_v6, %v6443_v44  ;;  %v721_v61 = vand.u32 2147483648, %v6443_v44  ;;  %v6558_v63 = vmul.f32 0.015873017, %v610_v35  ;;  %1292 = vadd.xlane.f32.xlu1 %v6421_v24  ;;  %4216 = vmatprep.subr.bf16.mxu0 %v4215_v23 }
 0x13e   :  { %v726_v45 = vsel %vm725_vm8, %v6441_v57, %v724_v62  ;;  %v6564_v9 = vmul.f32 0.015873017, %v607_v4  ;;  %1283 = vadd.xlane.f32.xlu0 %v6433_v30  ;;  %v6568_v28 = vmul.f32 0.015625, %v6550_v55  ;;  %v571_v7 = vsub.f32 %v275_v59, %v6475_v3  ;;  %4081 = vmatpush1.msk.msra.mxu1 %vm8034_vm2, %v2471_v21  ;;  %v2880_v57 = vld [vmem:[#allocation2 + $0x218] sm:$0xff]  ;;  %v8217_v62 = vld [vmem:[#allocation49_spill] sm:$0xff] }
 0x13f   :  { %v729_v42 = vsel %vm727_vm9, %v728_v48, %v726_v45  ;;  %v719_v24 = vsel %vm718_vm12, %v6443_v44, %v717_v19  ;;  %vm720_vm8 = vcmp.eq.f32.partialorder %v6443_v44, 0.0  ;;  %4661 = vrsqrt.f32 %v6558_v63  ;;  %v8218_v48 = vld [vmem:[#allocation60_spill] sm:$0xff] }
 0x140   :  { %4663 = vrcp.f32 %v6385_v5  ;;  %v2544_v30 = vrot.slane %v729_v42, %v5335_v52  ;;  %v722_v46 = vsel %vm720_vm8, %v721_v61, %v719_v24  ;;  %v6581_v51 = vpop.xlane.xlu1 %177  ;;  %v3051_v44 = vrot.slane %v6568_v28, %v5409_v43  ;;  %v8219_v61 = vld [vmem:[#allocation19_spill] sm:$0xff] }
 0x141   :  { %v6583_v3 = vpop.xlane.xlu0 %165  ;;  %v2540_v12 = vrot.slane %v722_v46, %v5332_v49  ;;  %4665 = vrsqrt.f32 %v6564_v9  ;;  %1274 = vadd.xlane.f32.xlu1 %v6437_v58  ;;  %v611_v20 = vmax.f32 %v571_v7, 0.0  ;;  %v1297_v5 = vsel %vm78_vm0, %v6348_v36, 0.0 }
 0x142   :  { %1295 = vadd.xlane.f32.xlu0 %v6465_v41  ;;  %v1285_v38 = vsel %vm78_vm0, %v6364_v29, 0.0  ;;  %v6599_v8 = vmul.f32 0.015625, %v6581_v51  ;;  %v6602_v58 = vmul.f32 0.015625, %v6583_v3  ;;  %v4223_v35 = vpack.c.bf16 %v2880_v57, %v2876_v17  ;;  %v8221_v57 = vld [vmem:[#allocation17_spill] sm:$0xff] }
 0x143   :  { %v6596_v10 = vsel %vm8041_vm3, %v2544_v30, %v2540_v12  ;;  %v3052_v4 = vsel %vm1715_vm6, %v3051_v44, %v6485_v26  ;;  %v6606_v41 = vmul.f32 0.015873017, %v611_v20  ;;  %v1309_v29 = vsel %vm78_vm0, %v6377_v11, 0.0  ;;  %v8220_v11 = vld [vmem:[#allocation61_spill] sm:$0xff] }
 0x144   :  { %v6608_v21 = vpop.xlane.xlu1 %189  ;;  %v6616_v23 = vsel %vm8038_vm10, %v3052_v4, %v6497_v34  ;;  %v3089_v6 = vrot.slane %v6599_v8, %v5351_v27  ;;  %v1306_v26 = vsel %vm78_vm0, %v6383_v40, 0.0  ;;  %v528_v59 = vmul.f32 %v8218_v48, %v8217_v62  ;;  %4224 = vmatprep.subr.bf16.mxu1 %v4223_v35 }
 0x145   :  { %v6610_v36 = vpop.xlane.xlu0 %186  ;;  %1298 = vadd.xlane.f32.xlu1 %v1297_v5  ;;  %4667 = vrsqrt.f32 %v6606_v41  ;;  %v523_v45 = vmul.f32 %v8220_v11, %v8219_v61  ;;  %v1300_v34 = vsel %vm78_vm0, %v6404_v22, 0.0  ;;  %v1288_v7 = vsel %vm91_vm1, %v6429_v16, 0.0 }
 0x146   :  { %v4660_v19 = vpop.eup %4659  ;;  %1286 = vadd.xlane.f32.xlu0 %v1285_v38  ;;  %v6634_v40 = vsel %vm8042_vm4, %v3089_v6, %v6540_v1  ;;  %v3070_v24 = vrot.slane %v6602_v58, %v5386_v0  ;;  %v6639_v30 = vmul.f32 0.015625, %v6608_v21  ;;  %vm697_vm9 = vcmp.eq.f32.partialorder %v6537_v50, inf }
 0x147   :  { %v696_v42 = vmul.f32 %v4660_v19, %v6537_v50  ;;  %v700_v22 = vand.u32 2147483648, %v6537_v50  ;;  %v6644_v46 = vmul.f32 0.015625, %v6610_v36  ;;  %v535_v12 = vmul.f32 %v6130_v53, %v8221_v57  ;;  %v8222_v53 = vld [vmem:[#allocation15_spill] sm:$0xff] }
 0x148   :  { %v266_v16 = vpop.xlane.xlu1 %265  ;;  %vm699_vm13 = vcmp.eq.f32.partialorder %v6537_v50, 0.0  ;;  %v6652_v20 = vsel %vm8040_vm5, %v3070_v24, %v6517_v39  ;;  %v3108_v5 = vrot.slane %v6639_v30, %v5335_v52  ;;  %v532_v6 = vmul.f32 %v6126_v60, %v8222_v53 }
 0x149   :  { %v251_v17 = vpop.xlane.xlu0 %250  ;;  %v4662_v1 = vpop.eup %4661  ;;  %v698_v44 = vsel %vm697_vm9, %v6537_v50, %v696_v42  ;;  %1310 = vadd.xlane.f32.xlu1 %v1309_v29  ;;  %v3104_v4 = vrot.slane %v6644_v46, %v5332_v49  ;;  %v1303_v50 = vsel %vm91_vm1, %v6439_v56, 0.0  ;;  %v568_v19 = vsub.f32 %v266_v16, %v528_v59 }
 0x14a   :  { %v4664_v38 = vpop.eup %4663  ;;  %v701_v35 = vsel %vm699_vm13, %v700_v22, %v698_v44  ;;  %1307 = vadd.xlane.f32.xlu0 %v1306_v26  ;;  %v752_v48 = vmul.f32 %v4662_v1, %v6558_v63  ;;  %v563_v61 = vsub.f32 %v251_v17, %v523_v45  ;;  %vm753_vm14 = vcmp.eq.f32.partialorder %v6558_v63, inf }
 0x14b   :  { %v4666_v62 = vpop.eup %4665  ;;  %v2525_v39 = vrot.slane %v701_v35, %v5351_v27  ;;  %v6667_v11 = vsel %vm8041_vm3, %v3108_v5, %v3104_v4  ;;  %v1312_v60 = vsel %vm78_vm0, %v6451_v47, 0.0  ;;  %vm732_vm15 = vcmp.eq.f32.partialorder %v6564_v9, inf }
 0x14c   :  { %v731_v29 = vmul.f32 %v4666_v62, %v6564_v9  ;;  %v287_v26 = vpop.xlane.xlu1 %286  ;;  %v735_v56 = vand.u32 2147483648, %v6564_v9  ;;  %v603_v24 = vmax.f32 %v563_v61, 0.0  ;;  %vm734_vm12 = vcmp.eq.f32.partialorder %v6564_v9, 0.0 }
 0x14d   :  { %v278_v42 = vpop.xlane.xlu0 %277  ;;  %1301 = vadd.xlane.f32.xlu1 %v1300_v34  ;;  %v575_v59 = vsub.f32 %v287_v26, %v535_v12  ;;  %v6677_v16 = vsel %vm8042_vm4, %v2525_v39, %v6554_v14  ;;  %v754_v47 = vsel %vm753_vm14, %v6558_v63, %v752_v48  ;;  %v608_v57 = vmax.f32 %v568_v19, 0.0 }
 0x14e   :  { %v733_v45 = vsel %vm732_vm15, %v6564_v9, %v731_v29  ;;  %1289 = vadd.xlane.f32.xlu0 %v1288_v7  ;;  %v572_v22 = vsub.f32 %v278_v42, %v532_v6  ;;  %v756_v34 = vand.u32 2147483648, %v6558_v63  ;;  %v1315_v7 = vsel %vm78_vm0, %v4664_v38, 0.0  ;;  %v8223_v42 = vld [vmem:[#allocation14_spill] sm:$0xff] }
 0x14f   :  { %v736_v17 = vsel %vm734_vm12, %v735_v56, %v733_v45  ;;  %v615_v1 = vmax.f32 %v575_v59, 0.0  ;;  %v4668_v44 = vpop.eup %4667  ;;  %v1318_v14 = vsel %vm91_vm1, %v6477_v13, 0.0  ;;  %vm755_vm8 = vcmp.eq.f32.partialorder %v6558_v63, 0.0  ;;  %v8225_v59 = vld [vmem:[#allocation20_spill] sm:$0xff] }
 0x150   :  { %v2549_v12 = vrot.slane %v736_v17, %v5351_v27  ;;  %v6684_v5 = vpop.xlane.xlu1 %168  ;;  %v759_v35 = vmul.f32 %v4668_v44, %v6606_v41  ;;  %v6691_v4 = vmul.f32 0.015873017, %v603_v24  ;;  %v536_v53 = vmul.f32 %v6156_v25, %v6145_v31  ;;  %v8224_v24 = vld [vmem:[#allocation16_spill] sm:$0xff] }
 0x151   :  { %v290_v9 = vpop.xlane.xlu0 %289  ;;  %1304 = vadd.xlane.f32.xlu1 %v1303_v50  ;;  %v757_v6 = vsel %vm755_vm8, %v756_v34, %v754_v47  ;;  %vm760_vm9 = vcmp.eq.f32.partialorder %v6606_v41, inf  ;;  %vm762_vm13 = vcmp.eq.f32.partialorder %v6606_v41, 0.0  ;;  %v763_v38 = vand.u32 2147483648, %v6606_v41 }
 0x152   :  { %1313 = vadd.xlane.f32.xlu0 %v1312_v60  ;;  %v761_v13 = vsel %vm760_vm9, %v6606_v41, %v759_v35  ;;  %v6699_v62 = vmul.f32 0.015873017, %v608_v57  ;;  %v6701_v63 = vmul.f32 0.015873017, %v615_v1  ;;  %v612_v39 = vmax.f32 %v572_v22, 0.0  ;;  %v8229_v35 = vld [vmem:[#allocation21_spill] sm:$0xff] }
 0x153   :  { %v764_v48 = vsel %vm762_vm13, %v763_v38, %v761_v13  ;;  %v6704_v50 = vmul.f32 0.015625, %v6684_v5  ;;  %v576_v31 = vsub.f32 %v290_v9, %v536_v53  ;;  %v6712_v61 = vsel %vm8042_vm4, %v2549_v12, %v6596_v10  ;;  %v8227_v9 = vld [vmem:[#allocation41_spill] sm:$0xff]  ;;  %v8230_v53 = vld [vmem:[#allocation51_spill] sm:$0xff]  ;;  %v8232_v13 = vld [vmem:[#allocation22_spill] sm:$0xff] }
 0x154   :  { %v6706_v25 = vpop.xlane.xlu1 %192  ;;  %v2568_v41 = vrot.slane %v764_v48, %v5335_v52  ;;  %4669 = vrsqrt.f32 %v6691_v4  ;;  %v2564_v29 = vrot.slane %v757_v6, %v5332_v49  ;;  %v524_v26 = vmul.f32 %v6153_v33, %v6143_v54  ;;  %v8231_v38 = vld [vmem:[#allocation45_spill] sm:$0xff]  ;;  %v8234_v48 = vld [vmem:[#allocation48_spill] sm:$0xff] }
 0x155   :  { %v6708_v19 = vpop.xlane.xlu0 %180  ;;  %1319 = vadd.xlane.f32.xlu1 %v1318_v14  ;;  %v6721_v60 = vmul.f32 %v8223_v42, %v6178_v32  ;;  %4671 = vrsqrt.f32 %v6699_v62  ;;  %v6724_v56 = vmul.f32 0.015873017, %v612_v39  ;;  %v3075_v10 = vrot.slane %v6704_v50, %v5409_v43  ;;  %v8237_v42 = vld [vmem:[#allocation10_spill] sm:$0xff] }
 0x156   :  { %1316 = vadd.xlane.f32.xlu0 %v1315_v7  ;;  %v529_v45 = vmul.f32 %v8225_v59, %v8224_v24  ;;  %4673 = vrsqrt.f32 %v6701_v63  ;;  %v6732_v22 = vmul.f32 0.015625, %v6706_v25  ;;  %v6735_v54 = vmul.f32 0.015625, %v6708_v19  ;;  %v8228_v7 = vld [vmem:[#allocation50_spill] sm:$0xff]  ;;  %v8239_v59 = vld [vmem:[#allocation8_spill] sm:$0xff] }
 0x157   :  { %v6738_v47 = vsel %vm8041_vm3, %v2568_v41, %v2564_v29  ;;  %v3076_v17 = vsel %vm1715_vm6, %v3075_v10, %v6652_v20  ;;  %v616_v57 = vmax.f32 %v576_v31, 0.0  ;;  %v537_v14 = vmul.f32 %v8228_v7, %v8227_v9  ;;  %v8233_v20 = vld [vmem:[#allocation23_spill] sm:$0xff]  ;;  %v8235_v41 = vld [vmem:[#allocation18_spill] sm:$0xff]  ;;  %v8236_v29 = vld [vmem:[#allocation52_spill] sm:$0xff] }
 0x158   :  { %v269_v33 = vpop.xlane.xlu1 %268  ;;  %8226 = vst [vmem:[#allocation28_spill] sm:$0xff] %v6738_v47  ;;  %v3113_v34 = vrot.slane %v6732_v22, %v5351_v27  ;;  %v3094_v12 = vrot.slane %v6735_v54, %v5386_v0  ;;  %v6750_v6 = vmul.f32 %v8230_v53, %v8229_v35  ;;  %v6754_v39 = vmul.f32 %v8232_v13, %v8231_v38  ;;  %v8238_v10 = vld [vmem:[#allocation53_spill] sm:$0xff]  ;;  %v6781_v53 = vld [vmem:[#allocation2 + $0x1e0] sm:$0xff] }
 0x159   :  { %v254_v32 = vpop.xlane.xlu0 %253  ;;  %v569_v1 = vsub.f32 %v269_v33, %v529_v45  ;;  %v6758_v31 = vmul.f32 %v8234_v48, %v8233_v20  ;;  %v6766_v24 = vmul.f32 %v8238_v10, %v8237_v42  ;;  %v8240_v45 = vld [vmem:[#allocation25_spill] sm:$0xff]  ;;  %4675 = vrsqrt.f32 %v6724_v56  ;;  %8242 = vst [vmem:[#allocation46_spill] sm:$0xff] %v6781_v53  ;;  %v8247_v42 = vld [vmem:[#allocation12_spill] sm:$0xff]  ;;  %v8249_v10 = vld [vmem:[#allocation27_spill] sm:$0xff] }
 0x15a   :  { %v564_v44 = vsub.f32 %v254_v32, %v524_v26  ;;  %v6762_v26 = vmul.f32 %v8236_v29, %v8235_v41  ;;  %v6770_v33 = vmul.f32 %v8240_v45, %v8239_v59  ;;  %v6775_v32 = vsel %vm8042_vm4, %v3113_v34, %v6667_v11  ;;  %v6786_v41 = vld [vmem:[#allocation2 + $0x200] sm:$0xff]  ;;  %v6788_v29 = vld [vmem:[#allocation2 + $0x1f0] sm:$0xff]  ;;  %v8246_v34 = vld [vmem:[#allocation24_spill] sm:$0xff] }
 0x15b   :  { %8241 = vst [vmem:[#allocation30_spill] sm:$0xff] %v6775_v32  ;;  %v6779_v9 = vsel %vm8040_vm5, %v3094_v12, %v6634_v40  ;;  %v6783_v38 = vmul.f32 0.015873017, %v616_v57  ;;  %8243 = vst [vmem:[#allocation31_spill] sm:$0xff] %v6786_v41  ;;  %v6790_v11 = vld [vmem:[#allocation2 + $0x210] sm:$0xff]  ;;  %v6794_v40 = vmul.f32 %v8247_v42, %v8246_v34  ;;  %v8248_v12 = vld [vmem:[#allocation42_spill] sm:$0xff]  ;;  %v6844_v47 = vmul.f32 %v6599_v8, %v6581_v51 }
 0x15c   :  { %v293_v7 = vpop.xlane.xlu1 %292  ;;  %v604_v13 = vmax.f32 %v564_v44, 0.0  ;;  %8244 = vst [vmem:[#allocation32_spill] sm:$0xff] %v6788_v29  ;;  %8245 = vst [vmem:[#allocation54_spill] sm:$0xff] %v6790_v11  ;;  %v6798_v59 = vmul.f32 %v8249_v10, %v8248_v12  ;;  %v8250_v57 = vld [vmem:[#allocation26_spill] sm:$0xff]  ;;  %v8251_v45 = vld [vmem:[#allocation9_spill] sm:$0xff]  ;;  %v6820_v12 = vmul.f32 %v6511_v15, %v6499_v37  ;;  %v6859_v51 = vmul.f32 %v6639_v30, %v6608_v21 }
 0x15d   :  { %v281_v35 = vpop.xlane.xlu0 %280  ;;  %v577_v20 = vsub.f32 %v293_v7, %v537_v14  ;;  %v6802_v44 = vmul.f32 %v8251_v45, %v8250_v57  ;;  %v6804_v14 = vld [vmem:[#allocation2 + $0x228] sm:$0xff]  ;;  %v6826_v45 = vld [vmem:[#allocation2 + $0x238] sm:$0xff]  ;;  %v6838_v15 = vld [vmem:[#allocation2 + $0x220] sm:$0xff]  ;;  %4677 = vrsqrt.f32 %v6783_v38  ;;  %vm739_vm0 = vcmp.eq.f32.partialorder %v6699_v62, inf }
 0x15e   :  { %v573_v48 = vsub.f32 %v281_v35, %v6721_v60  ;;  %8252 = vst [vmem:[#allocation55_spill] sm:$0xff] %v6804_v14  ;;  %v6808_v60 = vsel %vm8035_vm11, %v3076_v17, %v6616_v23  ;;  %v4670_v7 = vpop.eup %4669  ;;  %v8254_v35 = vld [vmem:[#allocation43_spill] sm:$0xff]  ;;  %v8255_v34 = vld [vmem:[#allocation44_spill] sm:$0xff]  ;;  %v6822_v10 = vmul.f32 0.015873017, %v604_v13  ;;  %8257 = vst [vmem:[#allocation35_spill] sm:$0xff] %v6826_v45 }
 0x15f   :  { %8253 = vst [vmem:[#allocation33_spill] sm:$0xff] %v6808_v60  ;;  %v6812_v32 = vmul.f32 %v6490_v2, %v8254_v35  ;;  %v6816_v42 = vmul.f32 %v6493_v18, %v8255_v34  ;;  %v6824_v57 = vld [vmem:[#allocation2 + $0x248] sm:$0xff]  ;;  %v6828_v23 = vld [vmem:[#allocation2 + $0x258] sm:$0xff]  ;;  %v6832_v2 = vmul.f32 %v6568_v28, %v6550_v55  ;;  %v609_v17 = vmax.f32 %v569_v1, 0.0  ;;  %8259 = vst [vmem:[#allocation37_spill] sm:$0xff] %v6838_v15  ;;  %v4672_v60 = vpop.eup %4671 }
 0x160   :  { %8256 = vst [vmem:[#allocation34_spill] sm:$0xff] %v6824_v57  ;;  %8258 = vst [vmem:[#allocation36_spill] sm:$0xff] %v6828_v23  ;;  %v305_v35 = vpop.xlane.xlu1 %304  ;;  %v6840_v13 = vld [vmem:[#allocation2 + $0x240] sm:$0xff]  ;;  %v6848_v55 = vmul.f32 %v6602_v58, %v6583_v3  ;;  %v617_v28 = vmax.f32 %v577_v20, 0.0  ;;  %v4674_v1 = vpop.eup %4673  ;;  %v703_v34 = vmul.f32 %v4670_v7, %v6691_v4  ;;  %4679 = vrsqrt.f32 %v6822_v10 }
 0x161   :  { %v302_v18 = vpop.xlane.xlu0 %301  ;;  %8260 = vst [vmem:[#allocation38_spill] sm:$0xff] %v6840_v13  ;;  %v6863_v3 = vmul.f32 %v6644_v46, %v6610_v36  ;;  %vm741_vm1 = vcmp.eq.f32.partialorder %v6699_v62, 0.0  ;;  %v742_v58 = vand.u32 2147483648, %v6699_v62  ;;  %v6870_v20 = vmul.f32 0.015873017, %v609_v17 }
 0x162   :  { %v613_v7 = vmax.f32 %v573_v48, 0.0  ;;  %vm704_vm14 = vcmp.eq.f32.partialorder %v6691_v4, inf  ;;  %vm706_vm15 = vcmp.eq.f32.partialorder %v6691_v4, 0.0  ;;  %v6878_v36 = vmul.f32 0.015873017, %v617_v28 }
 0x163   :  { %v581_v30 = vsub.f32 %v305_v35, %v6754_v39  ;;  %v4676_v46 = vpop.eup %4675  ;;  %v738_v8 = vmul.f32 %v4672_v60, %v6699_v62  ;;  %v705_v37 = vsel %vm704_vm14, %v6691_v4, %v703_v34  ;;  %v787_v17 = vmul.f32 %v4674_v1, %v6701_v63 }
 0x164   :  { %v6872_v29 = vpop.xlane.xlu1 %195  ;;  %v580_v48 = vsub.f32 %v302_v18, %v6750_v6  ;;  %v707_v15 = vand.u32 2147483648, %v6691_v4  ;;  %vm788_vm12 = vcmp.eq.f32.partialorder %v6701_v63, inf  ;;  %vm790_vm8 = vcmp.eq.f32.partialorder %v6701_v63, 0.0 }
 0x165   :  { %v6874_v21 = vpop.xlane.xlu0 %183  ;;  %v791_v28 = vand.u32 2147483648, %v6701_v63  ;;  %vm767_vm9 = vcmp.eq.f32.partialorder %v6724_v56, inf  ;;  %4681 = vrsqrt.f32 %v6870_v20  ;;  %v6891_v39 = vmul.f32 0.015873017, %v613_v7 }
 0x166   :  { %v621_v60 = vmax.f32 %v581_v30, 0.0  ;;  %v708_v6 = vsel %vm706_vm15, %v707_v15, %v705_v37  ;;  %vm769_vm13 = vcmp.eq.f32.partialorder %v6724_v56, 0.0  ;;  %v770_v18 = vand.u32 2147483648, %v6724_v56 }
 0x167   :  { %4683 = vrsqrt.f32 %v6878_v36  ;;  %v740_v1 = vsel %vm739_vm0, %v6699_v62, %v738_v8  ;;  %v789_v13 = vsel %vm788_vm12, %v6701_v63, %v787_v17  ;;  %v766_v7 = vmul.f32 %v4676_v46, %v6724_v56  ;;  %v4678_v45 = vpop.eup %4677 }
 0x168   :  { %v296_v35 = vpop.xlane.xlu1 %295  ;;  %v620_v30 = vmax.f32 %v580_v48, 0.0  ;;  %v6905_v4 = vmul.f32 %v6704_v50, %v6684_v5  ;;  %vm795_vm14 = vcmp.eq.f32.partialorder %v6783_v38, inf  ;;  %v6910_v37 = vmul.f32 %v6732_v22, %v6706_v25 }
 0x169   :  { %v284_v34 = vpop.xlane.xlu0 %283  ;;  %v6914_v15 = vmul.f32 %v6735_v54, %v6708_v19  ;;  %v2530_v17 = vrot.slane %v708_v6, %v5386_v0  ;;  %v798_v46 = vand.u32 2147483648, %v6783_v38  ;;  %4685 = vrsqrt.f32 %v6891_v39 }
 0x16a   :  { %v4680_v8 = vpop.eup %4679  ;;  %v6919_v48 = vmul.f32 0.015873017, %v621_v60  ;;  %v6923_v23 = vsel %vm741_vm1, %v742_v58, %v740_v1  ;;  %v6927_v25 = vsel %vm790_vm8, %v791_v28, %v789_v13  ;;  %vm711_vm0 = vcmp.eq.f32.partialorder %v6822_v10, inf }
 0x16b   :  { %v710_v19 = vmul.f32 %v4680_v8, %v6822_v10  ;;  %v768_v22 = vsel %vm767_vm9, %v6724_v56, %v766_v7  ;;  %vm797_vm15 = vcmp.eq.f32.partialorder %v6783_v38, 0.0  ;;  %vm713_vm12 = vcmp.eq.f32.partialorder %v6822_v10, 0.0 }
 0x16c   :  { %v317_v5 = vpop.xlane.xlu1 %316  ;;  %v714_v62 = vand.u32 2147483648, %v6822_v10  ;;  %v6937_v54 = vmul.f32 0.015873017, %v620_v30  ;;  %v794_v63 = vmul.f32 %v4678_v45, %v6783_v38  ;;  %v578_v58 = vsub.f32 %v296_v35, %v6758_v31 }
 0x16d   :  { %v308_v50 = vpop.xlane.xlu0 %307  ;;  %v712_v13 = vsel %vm711_vm0, %v6822_v10, %v710_v19  ;;  %v574_v28 = vsub.f32 %v284_v34, %v6762_v26  ;;  %4687 = vrsqrt.f32 %v6919_v48  ;;  %v585_v6 = vsub.f32 %v317_v5, %v6794_v40 }
 0x16e   :  { %v715_v60 = vsel %vm713_vm12, %v714_v62, %v712_v13  ;;  %v2531_v30 = vsel %vm8040_vm5, %v2530_v17, %v6677_v16  ;;  %v618_v45 = vmax.f32 %v578_v58, 0.0  ;;  %v582_v10 = vsub.f32 %v308_v50, %v6766_v24 }
 0x16f   :  { %v2535_v8 = vrot.slane %v715_v60, %v5409_v43  ;;  %v614_v14 = vmax.f32 %v574_v28, 0.0  ;;  %v4682_v31 = vpop.eup %4681  ;;  %v6955_v35 = vsel %vm769_vm13, %v770_v18, %v768_v22  ;;  %4689 = vrsqrt.f32 %v6937_v54 }
 0x170   :  { %v6945_v1 = vpop.xlane.xlu1 %198  ;;  %v625_v40 = vmax.f32 %v585_v6, 0.0  ;;  %vm746_vm1 = vcmp.eq.f32.partialorder %v6870_v20, inf  ;;  %vm748_vm8 = vcmp.eq.f32.partialorder %v6870_v20, 0.0  ;;  %v6961_v16 = vmul.f32 0.015625, %v6872_v29 }
 0x171   :  { %v320_v7 = vpop.xlane.xlu0 %319  ;;  %v4684_v34 = vpop.eup %4683  ;;  %v6964_v24 = vsel %vm1715_vm6, %v2535_v8, %v2531_v30  ;;  %v796_v56 = vsel %vm795_vm14, %v6783_v38, %v794_v63  ;;  %v749_v18 = vand.u32 2147483648, %v6870_v20  ;;  %v6972_v5 = vmul.f32 0.015873017, %v618_v45 }
 0x172   :  { %8261 = vst [vmem:[#allocation39_spill] sm:$0xff] %v6961_v16  ;;  %v745_v62 = vmul.f32 %v4682_v31, %v6870_v20  ;;  %v6979_v13 = vmul.f32 0.015873017, %v614_v14  ;;  %v622_v58 = vmax.f32 %v582_v10, 0.0  ;;  %v801_v60 = vmul.f32 %v4684_v34, %v6878_v36 }
 0x173   :  { %v4686_v28 = vpop.eup %4685  ;;  %vm802_vm9 = vcmp.eq.f32.partialorder %v6878_v36, inf  ;;  %vm804_vm13 = vcmp.eq.f32.partialorder %v6878_v36, 0.0  ;;  %v6984_v63 = vmul.f32 0.015873017, %v625_v40  ;;  %v6988_v6 = vsel %vm797_vm15, %v798_v46, %v796_v56 }
 0x174   :  { %v311_v50 = vpop.xlane.xlu1 %310  ;;  %v805_v30 = vand.u32 2147483648, %v6878_v36  ;;  %v6993_v14 = vmul.f32 %v6961_v16, %v6872_v29  ;;  %v514_v8 = vmul.f32 0.015625, %v6874_v21  ;;  %vm774_vm14 = vcmp.eq.f32.partialorder %v6891_v39, inf }
 0x175   :  { %v6974_v19 = vpop.xlane.xlu0 %298  ;;  %4691 = vrsqrt.f32 %v6972_v5  ;;  %v586_v10 = vsub.f32 %v320_v7, %v6770_v33  ;;  %v747_v31 = vsel %vm746_vm1, %v6870_v20, %v745_v62  ;;  %v773_v29 = vmul.f32 %v4686_v28, %v6891_v39 }
 0x176   :  { %4693 = vrsqrt.f32 %v6979_v13  ;;  %v7008_v40 = vmul.f32 0.015873017, %v622_v58  ;;  %v803_v33 = vsel %vm802_vm9, %v6878_v36, %v801_v60  ;;  %vm776_vm0 = vcmp.eq.f32.partialorder %v6891_v39, 0.0 }
 0x177   :  { %v4688_v34 = vpop.eup %4687  ;;  %4695 = vrsqrt.f32 %v6984_v63  ;;  %v777_v7 = vand.u32 2147483648, %v6891_v39  ;;  %vm830_vm15 = vcmp.eq.f32.partialorder %v6919_v48, inf  ;;  %v7020_v62 = vmul.f32 %v514_v8, %v6874_v21 }
 0x178   :  { %v332_v38 = vpop.xlane.xlu1 %331  ;;  %v3099_v58 = vrot.slane %v514_v8, %v5409_v43  ;;  %v7025_v45 = vsel %vm748_vm8, %v749_v18, %v747_v31  ;;  %vm832_vm12 = vcmp.eq.f32.partialorder %v6919_v48, 0.0  ;;  %v833_v60 = vand.u32 2147483648, %v6919_v48 }
 0x179   :  { %v7001_v46 = vpop.xlane.xlu0 %322  ;;  %v4690_v28 = vpop.eup %4689  ;;  %v626_v56 = vmax.f32 %v586_v10, 0.0  ;;  %v583_v17 = vsub.f32 %v311_v50, %v6798_v59  ;;  %v7034_v21 = vsel %vm804_vm13, %v805_v30, %v803_v33  ;;  %v775_v20 = vsel %vm774_vm14, %v6891_v39, %v773_v29 }
 0x17a   :  { %v829_v18 = vmul.f32 %v4688_v34, %v6919_v48  ;;  %4697 = vrsqrt.f32 %v7008_v40  ;;  %v579_v59 = vsub.f32 %v6974_v19, %v6802_v44  ;;  %v8262_v36 = vrot.slane %v6923_v23, %v5386_v0 }
 0x17b   :  { %v7041_v8 = vmul.f32 0.015873017, %v626_v56  ;;  %v623_v10 = vmax.f32 %v583_v17, 0.0  ;;  %v822_v30 = vmul.f32 %v4690_v28, %v6937_v54  ;;  %vm823_vm1 = vcmp.eq.f32.partialorder %v6937_v54, inf }
 0x17c   :  { %v314_v22 = vpop.xlane.xlu1 %313  ;;  %v7050_v50 = vsel %vm8040_vm5, %v8262_v36, %v6712_v61  ;;  %vm825_vm8 = vcmp.eq.f32.partialorder %v6937_v54, 0.0  ;;  %v826_v31 = vand.u32 2147483648, %v6937_v54  ;;  %v7060_v44 = vsel %vm1715_vm6, %v3099_v58, %v6779_v9 }
 0x17d   :  { %v7030_v26 = vpop.xlane.xlu0 %334  ;;  %8263 = vst [vmem:[#allocation40_spill] sm:$0xff] %v7060_v44  ;;  %v7063_v23 = vmul.f32 0.015625, %v6945_v1  ;;  %v590_v61 = vsub.f32 %v332_v38, %v6812_v32  ;;  %v7074_v56 = vsel %vm776_vm0, %v777_v7, %v775_v20  ;;  %v7076_v33 = vmul.f32 0.015873017, %v623_v10 }
 0x17e   :  { %v587_v9 = vsub.f32 %v7001_v46, %v6816_v42  ;;  %v831_v32 = vsel %vm830_vm15, %v6919_v48, %v829_v18  ;;  %4699 = vrsqrt.f32 %v7041_v8  ;;  %v619_v38 = vmax.f32 %v579_v59, 0.0 }
 0x17f   :  { %8264 = vst [vmem:[#allocation13_spill] sm:$0xff] %v7063_v23  ;;  %v4692_v58 = vpop.eup %4691  ;;  %v584_v28 = vsub.f32 %v314_v22, %v6832_v2  ;;  %v824_v39 = vsel %vm823_vm1, %v6937_v54, %v822_v30  ;;  %vm809_vm9 = vcmp.eq.f32.partialorder %v6972_v5, inf  ;;  %v812_v7 = vand.u32 2147483648, %v6972_v5 }
 0x180   :  { %v7066_v19 = vpop.xlane.xlu1 %337  ;;  %v4694_v36 = vpop.eup %4693  ;;  %vm781_vm13 = vcmp.eq.f32.partialorder %v6979_v13, inf  ;;  %vm811_vm14 = vcmp.eq.f32.partialorder %v6972_v5, 0.0  ;;  %v784_v20 = vand.u32 2147483648, %v6979_v13  ;;  %vm858_vm0 = vcmp.eq.f32.partialorder %v6984_v63, inf }
 0x181   :  { %v7068_v29 = vpop.xlane.xlu0 %325  ;;  %v4696_v42 = vpop.eup %4695  ;;  %v630_v2 = vmax.f32 %v590_v61, 0.0  ;;  %v7100_v10 = vsel %vm832_vm12, %v833_v60, %v831_v32  ;;  %vm783_vm15 = vcmp.eq.f32.partialorder %v6979_v13, 0.0  ;;  %vm860_vm1 = vcmp.eq.f32.partialorder %v6984_v63, 0.0 }
 0x182   :  { %v861_v59 = vand.u32 2147483648, %v6984_v63  ;;  %4701 = vrsqrt.f32 %v7076_v33  ;;  %v627_v30 = vmax.f32 %v587_v9, 0.0  ;;  %v7108_v34 = vsel %vm825_vm8, %v826_v31, %v824_v39 }
 0x183   :  { %v808_v61 = vmul.f32 %v4692_v58, %v6972_v5  ;;  %v7111_v46 = vmul.f32 0.015873017, %v619_v38  ;;  %v624_v48 = vmax.f32 %v584_v28, 0.0  ;;  %v780_v32 = vmul.f32 %v4694_v36, %v6979_v13 }
 0x184   :  { %v350_v22 = vpop.xlane.xlu1 %349  ;;  %v4698_v60 = vpop.eup %4697  ;;  %v857_v17 = vmul.f32 %v4696_v42, %v6984_v63  ;;  %vm837_vm12 = vcmp.eq.f32.partialorder %v7008_v40, inf  ;;  %v591_v57 = vsub.f32 %v7030_v26, %v6820_v12  ;;  %vm839_vm8 = vcmp.eq.f32.partialorder %v7008_v40, 0.0 }
 0x185   :  { %v7096_v18 = vpop.xlane.xlu0 %346  ;;  %v840_v31 = vand.u32 2147483648, %v7008_v40  ;;  %v7122_v9 = vmul.f32 0.015873017, %v630_v2  ;;  %v7132_v36 = vmul.f32 %v7063_v23, %v6945_v1  ;;  %v7136_v26 = vmul.f32 0.015873017, %v627_v30 }
 0x186   :  { %v810_v39 = vsel %vm809_vm9, %v6972_v5, %v808_v61  ;;  %v836_v42 = vmul.f32 %v4698_v60, %v7008_v40  ;;  %4703 = vrsqrt.f32 %v7111_v46  ;;  %v7143_v2 = vmul.f32 0.015873017, %v624_v48 }
 0x187   :  { %v782_v1 = vsel %vm781_vm13, %v6979_v13, %v780_v32  ;;  %v859_v12 = vsel %vm858_vm0, %v6984_v63, %v857_v17  ;;  %v631_v30 = vmax.f32 %v591_v57, 0.0  ;;  %v592_v54 = vsub.f32 %v7066_v19, %v6844_v47 }
 0x188   :  { %v7124_v58 = vpop.xlane.xlu1 %340  ;;  %v4700_v28 = vpop.eup %4699  ;;  %vm865_vm9 = vcmp.eq.f32.partialorder %v7041_v8, inf  ;;  %4705 = vrsqrt.f32 %v7122_v9  ;;  %v588_v61 = vsub.f32 %v7068_v29, %v6848_v55  ;;  %v596_v48 = vsub.f32 %v350_v22, %v6859_v51 }
 0x189   :  { %v7126_v38 = vpop.xlane.xlu0 %328  ;;  %v7164_v57 = vsel %vm811_vm14, %v812_v7, %v810_v39  ;;  %vm867_vm13 = vcmp.eq.f32.partialorder %v7041_v8, 0.0  ;;  %4707 = vrsqrt.f32 %v7136_v26  ;;  %v7168_v47 = vmul.f32 0.015873017, %v631_v30 }
 0x18a   :  { %v632_v17 = vmax.f32 %v592_v54, 0.0  ;;  %v7172_v55 = vsel %vm783_vm15, %v784_v20, %v782_v1  ;;  %v7176_v51 = vsel %vm860_vm1, %v861_v59, %v859_v12  ;;  %v838_v5 = vsel %vm837_vm12, %v7008_v40, %v836_v42 }
 0x18b   :  { %v628_v19 = vmax.f32 %v588_v61, 0.0  ;;  %v864_v7 = vmul.f32 %v4700_v28, %v7041_v8  ;;  %4709 = vrsqrt.f32 %v7143_v2  ;;  %v636_v22 = vmax.f32 %v596_v48, 0.0 }
 0x18c   :  { %v7158_v60 = vpop.xlane.xlu1 %343  ;;  %v4702_v29 = vpop.eup %4701  ;;  %v595_v13 = vsub.f32 %v7096_v18, %v6863_v3  ;;  %v868_v63 = vand.u32 2147483648, %v7041_v8  ;;  %4711 = vrsqrt.f32 %v7168_v47  ;;  %v7189_v59 = vmul.f32 0.015873017, %v632_v17 }
 0x18d   :  { %v7160_v32 = vpop.xlane.xlu0 %352  ;;  %v7197_v39 = vsel %vm839_vm8, %v840_v31, %v838_v5  ;;  %vm844_vm14 = vcmp.eq.f32.partialorder %v7076_v33, inf  ;;  %v7200_v3 = vmul.f32 0.015873017, %v628_v19  ;;  %v843_v42 = vmul.f32 %v4702_v29, %v7076_v33 }
 0x18e   :  { %vm846_vm0 = vcmp.eq.f32.partialorder %v7076_v33, 0.0  ;;  %v847_v1 = vand.u32 2147483648, %v7076_v33  ;;  %v866_v30 = vsel %vm865_vm9, %v7041_v8, %v864_v7  ;;  %vm816_vm15 = vcmp.eq.f32.partialorder %v7111_v46, inf }
 0x18f   :  { %v7211_v40 = vmul.f32 0.015873017, %v636_v22  ;;  %v635_v31 = vmax.f32 %v595_v13, 0.0  ;;  %v593_v61 = vsub.f32 %v7124_v58, %v6914_v15  ;;  %v819_v5 = vand.u32 2147483648, %v7111_v46 }
 0x190   :  { %v359_v54 = vpop.xlane.xlu1 %358  ;;  %v4704_v48 = vpop.eup %4703  ;;  %4713 = vrsqrt.f32 %v7189_v59  ;;  %v589_v19 = vsub.f32 %v7126_v38, %v6905_v4  ;;  %vm893_vm1 = vcmp.eq.f32.partialorder %v7122_v9, inf  ;;  %v896_v22 = vand.u32 2147483648, %v7122_v9 }
 0x191   :  { %v7191_v12 = vpop.xlane.xlu0 %355  ;;  %vm872_vm12 = vcmp.eq.f32.partialorder %v7136_v26, inf  ;;  %4715 = vrsqrt.f32 %v7200_v3  ;;  %v7229_v58 = vsel %vm867_vm13, %v868_v63, %v866_v30  ;;  %v845_v4 = vsel %vm844_vm14, %v7076_v33, %v843_v42 }
 0x192   :  { %v4706_v15 = vpop.eup %4705  ;;  %vm818_vm8 = vcmp.eq.f32.partialorder %v7111_v46, 0.0  ;;  %v875_v38 = vand.u32 2147483648, %v7136_v26  ;;  %v815_v17 = vmul.f32 %v4704_v48, %v7111_v46  ;;  %vm895_vm9 = vcmp.eq.f32.partialorder %v7122_v9, 0.0 }
 0x193   :  { %v4708_v18 = vpop.eup %4707  ;;  %4717 = vrsqrt.f32 %v7211_v40  ;;  %v7240_v8 = vmul.f32 0.015873017, %v635_v31  ;;  %v633_v63 = vmax.f32 %v593_v61, 0.0  ;;  %vm874_vm13 = vcmp.eq.f32.partialorder %v7136_v26, 0.0 }
 0x194   :  { %v1206_v29 = vpop.xlane.xlu1 %1205  ;;  %vm851_vm14 = vcmp.eq.f32.partialorder %v7143_v2, inf  ;;  %v629_v42 = vmax.f32 %v589_v19, 0.0  ;;  %v594_v30 = vsub.f32 %v7158_v60, %v7020_v62  ;;  %v597_v20 = vsub.f32 %v7160_v32, %v6910_v37 }
 0x195   :  { %v7221_v7 = vpop.xlane.xlu0 %1202  ;;  %v599_v48 = vsub.f32 %v359_v54, %v7132_v36  ;;  %v4710_v31 = vpop.eup %4709  ;;  %v892_v11 = vmul.f32 %v4706_v15, %v7122_v9  ;;  %vm900_vm2 = vcmp.eq.f32.partialorder %v7168_v47, inf  ;;  %v903_v19 = vand.u32 2147483648, %v7168_v47 }
 0x196   :  { %v4712_v62 = vpop.eup %4711  ;;  %v871_v60 = vmul.f32 %v4708_v18, %v7136_v26  ;;  %4719 = vrsqrt.f32 %v7240_v8  ;;  %v7260_v37 = vmul.f32 0.015873017, %v633_v63  ;;  %v7262_v36 = vmul.f32 0.015873017, %v629_v42 }
 0x197   :  { %v7266_v32 = vsel %vm846_vm0, %v847_v1, %v845_v4  ;;  %vm902_vm11 = vcmp.eq.f32.partialorder %v7168_v47, 0.0  ;;  %v634_v54 = vmax.f32 %v594_v30, 0.0  ;;  %v637_v15 = vmax.f32 %v597_v20, 0.0 }
 0x198   :  { %v7249_v28 = vpop.xlane.xlu1 %1220  ;;  %v639_v61 = vmax.f32 %v599_v48, 0.0  ;;  %v817_v53 = vsel %vm816_vm15, %v7111_v46, %v815_v17  ;;  %4721 = vrsqrt.f32 %v7260_v37  ;;  %v598_v63 = vsub.f32 %v7191_v12, %v6993_v14 }
 0x199   :  { %v7251_v13 = vpop.xlane.xlu0 %1217  ;;  %v894_v20 = vsel %vm893_vm1, %v7122_v9, %v892_v11  ;;  %v850_v1 = vmul.f32 %v4710_v31, %v7143_v2  ;;  %v899_v4 = vmul.f32 %v4712_v62, %v7168_v47  ;;  %vm907_vm0 = vcmp.eq.f32.partialorder %v7189_v59, inf }
 0x19a   :  { %4723 = vrsqrt.f32 %v7262_v36  ;;  %v4714_v17 = vpop.eup %4713  ;;  %v873_v14 = vsel %vm872_vm12, %v7136_v26, %v871_v60  ;;  %vm879_vm15 = vcmp.eq.f32.partialorder %v7200_v3, inf  ;;  %v1323_v30 = vmul.f32 0.015625, %v1206_v29 }
 0x19b   :  { %v4716_v48 = vpop.eup %4715  ;;  %v7294_v11 = vsel %vm818_vm8, %v819_v5, %v817_v53  ;;  %v7296_v31 = vmul.f32 0.015873017, %v634_v54  ;;  %v7298_v62 = vmul.f32 0.015873017, %v637_v15  ;;  %v7300_v18 = vmul.f32 0.015873017, %v639_v61 }
 0x19c   :  { %v7276_v42 = vpop.xlane.xlu1 %1223  ;;  %v7304_v41 = vsel %vm895_vm9, %v896_v22, %v894_v20  ;;  %vm935_vm1 = vcmp.eq.f32.partialorder %v7211_v40, inf  ;;  %v638_v29 = vmax.f32 %v598_v63, 0.0  ;;  %v7310_v53 = vsel %vm874_vm13, %v875_v38, %v873_v14 }
 0x19d   :  { %v7278_v33 = vpop.xlane.xlu0 %1208  ;;  %v4718_v12 = vpop.eup %4717  ;;  %v7315_v46 = vsel %vm851_vm14, %v7143_v2, %v850_v1  ;;  %v901_v9 = vsel %vm900_vm2, %v7168_v47, %v899_v4  ;;  %4725 = vrsqrt.f32 %v7296_v31  ;;  %v906_v22 = vmul.f32 %v4714_v17, %v7189_v59 }
 0x19e   :  { %v878_v61 = vmul.f32 %v4716_v48, %v7200_v3  ;;  %vm928_vm12 = vcmp.eq.f32.partialorder %v7240_v8, inf  ;;  %4727 = vrsqrt.f32 %v7298_v62  ;;  %v7330_v38 = vmul.f32 0.015873017, %v638_v29 }
 0x19f   :  { %4729 = vrsqrt.f32 %v7300_v18  ;;  %v3360_v54 = vrot.slane %v1323_v30, %v5335_v52  ;;  %v1322_v15 = vmul.f32 0.015625, %v7221_v7  ;;  %vm853_vm2 = vcmp.eq.f32.partialorder %v7143_v2, 0.0 }
 0x1a0   :  { %v7321_v5 = vpop.xlane.xlu1 %1235  ;;  %v4720_v63 = vpop.eup %4719  ;;  %v7337_v20 = vsel %vm902_vm11, %v903_v19, %v901_v9  ;;  %vm914_vm8 = vcmp.eq.f32.partialorder %v7260_v37, inf  ;;  %v917_v4 = vand.u32 2147483648, %v7260_v37  ;;  %vm909_vm9 = vcmp.eq.f32.partialorder %v7189_v59, 0.0 }
 0x1a1   :  { %8265 = vst [vmem:[#allocation11_spill] sm:$0xff] %v7321_v5  ;;  %v7327_v26 = vpop.xlane.xlu0 %1232  ;;  %vm881_vm13 = vcmp.eq.f32.partialorder %v7200_v3, 0.0  ;;  %v934_v17 = vmul.f32 %v4718_v12, %v7211_v40  ;;  %vm886_vm14 = vcmp.eq.f32.partialorder %v7262_v36, inf  ;;  %4731 = vrsqrt.f32 %v7330_v38 }
 0x1a2   :  { %8266 = vst [vmem:[#allocation47_spill] sm:$0xff] %v7327_v26  ;;  %v3356_v47 = vrot.slane %v1322_v15, %v5332_v49  ;;  %v4722_v19 = vpop.eup %4721  ;;  %v908_v14 = vsel %vm907_vm0, %v7189_v59, %v906_v22  ;;  %v880_v30 = vsel %vm879_vm15, %v7200_v3, %v878_v61  ;;  %vm916_vm11 = vcmp.eq.f32.partialorder %v7260_v37, 0.0 }
 0x1a3   :  { %vm888_vm10 = vcmp.eq.f32.partialorder %v7262_v36, 0.0  ;;  %v889_v12 = vand.u32 2147483648, %v7262_v36  ;;  %vm937_vm7 = vcmp.eq.f32.partialorder %v7211_v40, 0.0  ;;  %v927_v9 = vmul.f32 %v4720_v63, %v7240_v8 }
 0x1a4   :  { %v1227_v7 = vpop.xlane.xlu1 %1226  ;;  %v4724_v29 = vpop.eup %4723  ;;  %vm930_vm5 = vcmp.eq.f32.partialorder %v7240_v8, 0.0  ;;  %v7361_v22 = vsel %vm8041_vm3, %v3360_v54, %v3356_v47  ;;  %v7364_v15 = vmul.f32 0.015625, %v7249_v28  ;;  %v7367_v61 = vmul.f32 0.015625, %v7251_v13 }
 0x1a5   :  { %8267 = vst [vmem:[#allocation56_spill] sm:$0xff] %v7361_v22  ;;  %v913_v60 = vmul.f32 %v4722_v19, %v7260_v37  ;;  %v885_v1 = vmul.f32 %v4724_v29, %v7262_v36  ;;  %v7372_v26 = vmul.f32 0.015625, %v7276_v42  ;;  %v7375_v63 = vmul.f32 0.015625, %v7278_v33 }
 0x1a6   :  { %8268 = vst [vmem:[#allocation57_spill] sm:$0xff] %v7364_v15  ;;  %v936_v54 = vsel %vm935_vm1, %v7211_v40, %v934_v17  ;;  %vm921_vm0 = vcmp.eq.f32.partialorder %v7296_v31, inf  ;;  %v924_v28 = vand.u32 2147483648, %v7296_v31  ;;  %vm942_vm15 = vcmp.eq.f32.partialorder %v7298_v62, inf }
 0x1a7   :  { %v1212_v48 = vpop.xlane.xlu0 %1211  ;;  %8269 = vst [vmem:[#allocation58_spill] sm:$0xff] %v7372_v26  ;;  %8270 = vst [vmem:[#allocation59_spill] sm:$0xff] %v7375_v63  ;;  %vm944_vm3 = vcmp.eq.f32.partialorder %v7298_v62, 0.0  ;;  %v945_v13 = vand.u32 2147483648, %v7298_v62  ;;  %vm949_vm4 = vcmp.eq.f32.partialorder %v7330_v38, inf  ;;  %v952_v42 = vand.u32 2147483648, %v7330_v38  ;;  %v4726_v19 = vpop.eup %4725 }
 0x1a8   :  { %v929_v17 = vsel %vm928_vm12, %v7240_v8, %v927_v9  ;;  %v887_v29 = vsel %vm886_vm14, %v7262_v36, %v885_v1  ;;  %v4728_v23 = vpop.eup %4727  ;;  %v7410_v5 = vmul.f32 0.015625, %v1227_v7  ;;  %v7412_v15 = vmul.f32 0.015625, %v1212_v48 }
 0x1a9   :  { %v4730_v1 = vpop.eup %4729  ;;  %v941_v16 = vmul.f32 %v4728_v23, %v7298_v62  ;;  %v8273_v44 = vand.u32 2147483648, %v7143_v2  ;;  %v8274_v9 = vand.u32 2147483648, %v7200_v3  ;;  %v890_v23 = vsel %vm888_vm10, %v889_v12, %v887_v29 }
 0x1aa   :  { %v7387_v33 = vpop.xlane.xlu1 %1247  ;;  %v8275_v7 = vand.u32 2147483648, %v7189_v59  ;;  %vm923_vm10 = vcmp.eq.f32.partialorder %v7296_v31, 0.0  ;;  %v8277_v12 = vand.u32 2147483648, %v7211_v40  ;;  %vm951_vm1 = vcmp.eq.f32.partialorder %v7330_v38, 0.0 }
 0x1ab   :  { %8271 = vst [vmem:[#allocation49_spill] sm:$0xff] %v7387_v33  ;;  %v7389_v47 = vpop.xlane.xlu0 %1238  ;;  %v915_v33 = vsel %vm914_vm8, %v7260_v37, %v913_v60  ;;  %v855_v60 = vsel %vm853_vm2, %v8273_v44, %v7315_v46  ;;  %v883_v22 = vsel %vm881_vm13, %v8274_v9, %v880_v30  ;;  %v4732_v44 = vpop.eup %4731  ;;  %v943_v2 = vsel %vm942_vm15, %v7298_v62, %v941_v16 }
 0x1ac   :  { %8272 = vst [vmem:[#allocation60_spill] sm:$0xff] %v7389_v47  ;;  %v920_v47 = vmul.f32 %v4726_v19, %v7296_v31  ;;  %v955_v19 = vmul.f32 %v4730_v1, %v7300_v18  ;;  %v911_v48 = vsel %vm909_vm9, %v8275_v7, %v908_v14  ;;  %v918_v3 = vsel %vm916_vm11, %v917_v4, %v915_v33  ;;  %v8279_v33 = vld [vmem:[#allocation28_spill] sm:$0xff] }
 0x1ad   :  { %v948_v59 = vmul.f32 %v4732_v44, %v7330_v38  ;;  %v8276_v14 = vand.u32 2147483648, %v7240_v8  ;;  %v939_v16 = vsel %vm937_vm7, %v8277_v12, %v936_v54  ;;  %v946_v37 = vsel %vm944_vm3, %v945_v13, %v943_v2 }
 0x1ae   :  { %v7430_v63 = vpop.xlane.xlu1 %1214  ;;  %v922_v36 = vsel %vm921_vm0, %v7296_v31, %v920_v47  ;;  %vm956_vm12 = vcmp.eq.f32.partialorder %v7300_v18, inf  ;;  %vm958_vm2 = vcmp.eq.f32.partialorder %v7300_v18, 0.0  ;;  %v959_v4 = vand.u32 2147483648, %v7300_v18 }
 0x1af   :  { %v7432_v26 = vpop.xlane.xlu0 %1250  ;;  %v925_v46 = vsel %vm923_vm10, %v924_v28, %v922_v36  ;;  %v932_v30 = vsel %vm930_vm5, %v8276_v14, %v929_v17  ;;  %v950_v31 = vsel %vm949_vm4, %v7330_v38, %v948_v59  ;;  %v957_v8 = vsel %vm956_vm12, %v7300_v18, %v955_v19 }
 0x1b0   :  { %v8278_v40 = vrot.slane %v7025_v45, %v5409_v43  ;;  %v953_v13 = vsel %vm951_vm1, %v952_v42, %v950_v31  ;;  %v8280_v47 = vrot.slane %v6955_v35, %v5351_v27  ;;  %vm8281_vm3 = vcmask 195712  }
 0x1b1   :  { %v8282_v17 = vrot.slane %v6927_v25, %v5332_v49  ;;  %v8283_v18 = vrot.slane %v6988_v6, %v5335_v52  ;;  %vm8284_vm4 = vcmask 130112   ;;  %v960_v29 = vsel %vm958_vm2, %v959_v4, %v957_v8  ;;  %vm8288_vm7 = vmmov %vm8281_vm3 }
 0x1b2   :  { %v2560_v62 = vsel %vm1715_vm6, %v8278_v40, %v7050_v50  ;;  %v7467_v54 = vpop.xlane.xlu1 %1241  ;;  %v2574_v38 = vsel %vm8281_vm3, %v8280_v47, %v8279_v33  ;;  %v2607_v50 = vrot.slane %v7294_v11, %v5409_v43  ;;  %v8285_v42 = vrot.slane %v7074_v56, %v5386_v0  ;;  %vm8291_vm8 = vmmov %vm8284_vm4 }
 0x1b3   :  { %v1230_v28 = vpop.xlane.xlu0 %1229  ;;  %v2593_v45 = vsel %vm8284_vm4, %v8283_v18, %v8282_v17  ;;  %vm8286_vm5 = vcmask 261312   ;;  %v8287_v35 = vrot.slane %v7034_v21, %v5351_v27  ;;  %v8289_v25 = vrot.slane %v7108_v34, %v5332_v49  ;;  %vm8296_vm13 = vmmov %vm8281_vm3 }
 0x1b4   :  { %v2579_v9 = vsel %vm8286_vm5, %v8285_v42, %v2574_v38  ;;  %v8290_v6 = vrot.slane %v7100_v10, %v5335_v52  ;;  %v8292_v11 = vrot.slane %v7172_v55, %v5409_v43  ;;  %v8293_v7 = vrot.slane %v7164_v57, %v5386_v0  ;;  %vm8294_vm9 = vmmov %vm8286_vm5 }
 0x1b5   :  { %v2598_v1 = vsel %vm8288_vm7, %v8287_v35, %v2593_v45  ;;  %v8295_v44 = vrot.slane %v7197_v39, %v5351_v27  ;;  %v2626_v10 = vrot.slane %v7266_v32, %v5386_v0  ;;  %v2631_v36 = vrot.slane %v855_v60, %v5409_v43  ;;  %vm8299_vm14 = vmmov %vm8284_vm4 }
 0x1b6   :  { %v2617_v19 = vsel %vm8291_vm8, %v8290_v6, %v8289_v25  ;;  %v2584_v56 = vsel %vm1715_vm6, %v8292_v11, %v2579_v9  ;;  %v2603_v21 = vsel %vm8294_vm9, %v8293_v7, %v2598_v1  ;;  %v8297_v55 = vrot.slane %v7176_v51, %v5332_v49  ;;  %v7523_v14 = vpop.xlane.xlu1 %1262  ;;  %vm8300_vm11 = vmmov %vm8286_vm5  ;;  %v8310_v9 = vld [vmem:[#allocation57_spill] sm:$0xff] }
 0x1b7   :  { %v2622_v34 = vsel %vm8296_vm13, %v8295_v44, %v2617_v19  ;;  %v2608_v2 = vsel %vm1715_vm6, %v2607_v50, %v2603_v21  ;;  %v8298_v57 = vrot.slane %v7229_v58, %v5335_v52  ;;  %v2645_v39 = vrot.slane %v7310_v53, %v5351_v27  ;;  %v7525_v12 = vpop.xlane.xlu0 %1253  ;;  %vm8301_vm0 = vmmov %vm8281_vm3  ;;  %v2883_v1 = vld [vmem:[#allocation2 + $0x230] sm:$0xff] }
 0x1b8   :  { %v2627_v32 = vsel %vm8300_vm11, %v2626_v10, %v2622_v34  ;;  %v2650_v31 = vrot.slane %v883_v22, %v5386_v0  ;;  %v2655_v60 = vrot.slane %v890_v23, %v5409_v43  ;;  %v2660_v51 = vrot.slane %v7304_v41, %v5332_v49  ;;  %vm8302_vm15 = vmmov %vm8286_vm5  ;;  %v2887_v25 = vld [vmem:[#allocation2 + $0x250] sm:$0xff]  ;;  %v8318_v10 = vld [vmem:[#allocation30_spill] sm:$0xff] }
 0x1b9   :  { %v2641_v59 = vsel %vm8299_vm14, %v8298_v57, %v8297_v55  ;;  %v2632_v58 = vsel %vm1715_vm6, %v2631_v36, %v2627_v32  ;;  %v2664_v53 = vrot.slane %v7337_v20, %v5335_v52  ;;  %v2669_v4 = vrot.slane %v911_v48, %v5351_v27  ;;  %vm8303_vm10 = vmmov %vm8284_vm4  ;;  %v8322_v36 = vld [vmem:[#allocation58_spill] sm:$0xff]  ;;  %v8325_v32 = vld [vmem:[#allocation56_spill] sm:$0xff] }
 0x1ba   :  { %v2646_v8 = vsel %vm8301_vm0, %v2645_v39, %v2641_v59  ;;  %v2674_v33 = vrot.slane %v918_v3, %v5386_v0  ;;  %v2679_v22 = vrot.slane %v925_v46, %v5409_v43  ;;  %v2684_v23 = vrot.slane %v932_v30, %v5332_v49  ;;  %v7545_v18 = vpop.xlane.xlu1 %1244  ;;  %vm8304_vm1 = vmmov %vm8301_vm0 }
 0x1bb   :  { %v2651_v40 = vsel %vm8302_vm15, %v2650_v31, %v2646_v8  ;;  %v2665_v41 = vsel %vm8303_vm10, %v2664_v53, %v2660_v51  ;;  %v2688_v38 = vrot.slane %v939_v16, %v5335_v52  ;;  %v2693_v17 = vrot.slane %v946_v37, %v5351_v27  ;;  %v7547_v20 = vpop.xlane.xlu0 %1265  ;;  %vm8306_vm2 = vmmov %vm8286_vm5  ;;  %v8326_v31 = vld [vmem:[#allocation59_spill] sm:$0xff]  ;;  %v8330_v8 = vld [vmem:[#allocation13_spill] sm:$0xff] }
 0x1bc   :  { %v2656_v47 = vsel %vm1715_vm6, %v2655_v60, %v2651_v40  ;;  %v2670_v48 = vsel %vm8304_vm1, %v2669_v4, %v2665_v41  ;;  %v2698_v3 = vrot.slane %v953_v13, %v5386_v0  ;;  %v2703_v46 = vrot.slane %v960_v29, %v5409_v43  ;;  %vm8307_vm3 = vmmov %vm8284_vm4 }
 0x1bd   :  { %vm8305_vm12 = vcmask 1041409   ;;  %v2675_v45 = vsel %vm8306_vm2, %v2674_v33, %v2670_v48  ;;  %v2689_v50 = vsel %vm8307_vm3, %v2688_v38, %v2684_v23  ;;  %vm8308_vm4 = vcmask 1042434   ;;  %vm8312_vm5 = vmmov %vm8307_vm3  ;;  %v8336_v23 = vld [vmem:[#allocation40_spill] sm:$0xff]  ;;  %v8338_v38 = vld [vmem:[#allocation31_spill] sm:$0xff] }
 0x1be   :  { %v2705_v30 = vsel %vm8305_vm12, %v2560_v62, %v6964_v24  ;;  %v1326_v37 = vmul.f32 0.015625, %v7430_v63  ;;  %v8309_v42 = vrot.slane %v7367_v61, %v5332_v49  ;;  %v8311_v35 = vrot.slane %v8310_v9, %v5335_v52  ;;  %vm8313_vm7 = vmmov %vm8301_vm0  ;;  %v7574_v11 = vpop.xlane.xlu1 %1268  ;;  %v8346_v9 = vld [vmem:[#allocation55_spill] sm:$0xff] }
 0x1bf   :  { %v2706_v16 = vsel %vm8308_vm4, %v2584_v56, %v2705_v30  ;;  %v2680_v29 = vsel %vm1715_vm6, %v2679_v22, %v2675_v45  ;;  %v2694_v24 = vsel %vm8313_vm7, %v2693_v17, %v2689_v50  ;;  %vm8314_vm8 = vcmask 1043459   ;;  %vm8315_vm9 = vmmov %vm8306_vm2  ;;  %v7576_v56 = vpop.xlane.xlu0 %1256  ;;  %v8335_v22 = vld [vmem:[#allocation33_spill] sm:$0xff]  ;;  %v8339_v17 = vld [vmem:[#allocation46_spill] sm:$0xff] }
 0x1c0   :  { %v3385_v13 = vsel %vm8312_vm5, %v8311_v35, %v8309_v42  ;;  %v2707_v62 = vsel %vm8314_vm8, %v2608_v2, %v2706_v16  ;;  %v3394_v6 = vrot.slane %v7410_v5, %v5386_v0  ;;  %v3370_v63 = vrot.slane %v7412_v15, %v5386_v0  ;;  %v8319_v5 = vld [vmem:[#allocation39_spill] sm:$0xff]  ;;  %vm8321_vm11 = vmmov %vm8306_vm2  ;;  %v8345_v42 = vld [vmem:[#allocation34_spill] sm:$0xff] }
 0x1c1   :  { %v2699_v61 = vsel %vm8315_vm9, %v2698_v3, %v2694_v24  ;;  %vm8316_vm13 = vcmask 1044484   ;;  %vm8317_vm14 = vcmask 1045509   ;;  %v3375_v44 = vrot.slane %v1326_v37, %v5409_v43  ;;  %vm8328_vm10 = vmmov %vm8301_vm0  ;;  %v8341_v3 = vld [vmem:[#allocation54_spill] sm:$0xff] }
 0x1c2   :  { %v2708_v19 = vsel %vm8316_vm13, %v2632_v58, %v2707_v62  ;;  %v2704_v7 = vsel %vm1715_vm6, %v2703_v46, %v2699_v61  ;;  %v1331_v34 = vmul.f32 0.015625, %v1230_v28  ;;  %v8320_v2 = vrot.slane %v8319_v5, %v5386_v0  ;;  %vm8332_vm12 = vmmov %vm8306_vm2  ;;  %v7609_v41 = vpop.xlane.xlu1 %1280  ;;  %v8342_v46 = vld [vmem:[#allocation32_spill] sm:$0xff]  ;;  %v3300_v5 = vld [vmem:[#allocation2 + $0x2b8] sm:$0xff] }
 0x1c3   :  { %v2709_v21 = vsel %vm8317_vm14, %v2656_v47, %v2708_v19  ;;  %v8323_v55 = vrot.slane %v8322_v36, %v5351_v27  ;;  %vm8324_vm15 = vcmask 1046534   ;;  %v4229_v39 = vpack.c.bf16 %v2887_v25, %v2883_v1  ;;  %v7620_v37 = vpop.xlane.xlu0 %1277  ;;  %v2890_v1 = vld [vmem:[#allocation2 + $0x268] sm:$0xf]  ;;  %v2892_v25 = vld [vmem:[#allocation2 + $0x278] sm:$0xf]  ;;  %v3293_v19 = vld [vmem:[#allocation2 + $0x280] sm:$0xff] }
 0x1c4   :  { %v3119_v15 = vsel %vm8321_vm11, %v8320_v2, %v8318_v10  ;;  %v2710_v59 = vsel %vm8324_vm15, %v2680_v29, %v2709_v21  ;;  %v8327_v60 = vrot.slane %v8326_v31, %v5351_v27  ;;  %vm8329_vm1 = vcmask 1047559   ;;  %vm8337_vm5 = vmmov %vm8324_vm15  ;;  %v8349_v29 = vld [vmem:[#allocation35_spill] sm:$0xff]  ;;  %v3298_v61 = vld [vmem:[#allocation2 + $0x2a8] sm:$0xff] }
 0x1c5   :  { %v3390_v57 = vsel %vm8301_vm0, %v8323_v55, %v3385_v13  ;;  %v2711_v51 = vsel %vm8329_vm1, %v2704_v7, %v2710_v59  ;;  %v3399_v58 = vrot.slane %v1331_v34, %v5409_v43  ;;  %v8331_v53 = vrot.slane %v8330_v8, %v5409_v43  ;;  %vm8344_vm7 = vmmov %vm8329_vm1  ;;  %v8348_v13 = vld [vmem:[#allocation36_spill] sm:$0xff]  ;;  %v2889_v7 = vld [vmem:[#allocation2 + $0x260] sm:$0xf] }
 0x1c6   :  { %v3366_v28 = vsel %vm8328_vm10, %v8327_v60, %v8325_v32  ;;  %v3395_v40 = vsel %vm8332_vm12, %v3394_v6, %v3390_v57  ;;  %vm8333_vm3 = vcmask 293888   ;;  %v3130_v47 = vsel %vm8337_vm5, %v8336_v23, %v8335_v22  ;;  %v2891_v21 = vld [vmem:[#allocation2 + $0x270] sm:$0xf]  ;;  %v3297_v34 = vld [vmem:[#allocation2 + $0x2a0] sm:$0xff]  ;;  %v3296_v10 = vld [vmem:[#allocation2 + $0x298] sm:$0xff] }
 0x1c7   :  { %v3124_v4 = vsel %vm1715_vm6, %v8331_v53, %v3119_v15  ;;  %v3371_v33 = vsel %vm8306_vm2, %v3370_v63, %v3366_v28  ;;  %4079 = vmatmul.mubr.msk.f32.vlgmr.msra.gmra.mrb[0].mxu0 %vm8333_vm3, %v2711_v51  ;;  %vm8334_vm4 = vmmov %vm8333_vm3  ;;  %v8340_v48 = vpack.c.bf16 %v8338_v38, %v8339_v17  ;;  %v8343_v30 = vpack.c.bf16 %v8341_v3, %v8342_v46  ;;  %v3294_v63 = vld [vmem:[#allocation2 + $0x288] sm:$0xff]  ;;  %v8353_v2 = vld [vmem:[#allocation38_spill] sm:$0xff]  ;;  %v7638_v55 = vpop.xlane.xlu0 %1259 }
 0x1c8   :  { %4082 = vmatmul.mubr.msk.f32.vlgmr.msra.gmra.mrb[0].mxu1 %vm8334_vm4, %v2711_v51  ;;  %v3376_v45 = vsel %vm1715_vm6, %v3375_v44, %v3371_v33  ;;  %v3400_v50 = vsel %vm1715_vm6, %v3399_v58, %v3395_v40  ;;  %v3131_v16 = vsel %vm8344_vm7, %v3124_v4, %v3130_v47  ;;  %v8347_v35 = vpack.c.bf16 %v8345_v42, %v8346_v9  ;;  %v7633_v44 = vpop.xlane.xlu1 %1271  ;;  %v8354_v15 = vld [vmem:[#allocation37_spill] sm:$0xff]  ;;  %v3302_v32 = vld [vmem:[#allocation2 + $0x2c8] sm:$0xff]  ;;  %v3304_v60 = vld [vmem:[#allocation2 + $0x2d8] sm:$0xff] }
 0x1c9   :  { %4218 = vmatpush1.bf16.msra.mxu0 %v8340_v48  ;;  %4226 = vmatpush1.bf16.msra.mxu1 %v8343_v30  ;;  %v8350_v24 = vpack.c.bf16 %v8348_v13, %v8349_v29  ;;  %vm8351_vm8 = vcmask 1041409   ;;  %v8352_v6 = vmov 0.0   ;;  %v8355_v36 = vpack.c.bf16 %v8353_v2, %v8354_v15  ;;  %v3295_v57 = vld [vmem:[#allocation2 + $0x290] sm:$0xff]  ;;  %v3306_v31 = vld [vmem:[#allocation2 + $0x2e8] sm:$0xff]  ;;  %v3308_v28 = vld [vmem:[#allocation2 + $0x2f8] sm:$0xff] }
 0x1ca   :  { %4220 = vmatprep.subr.bf16.mxu0 %v8347_v35  ;;  %v7629_v62 = vsel %vm8351_vm8, %v3400_v50, %v3376_v45  ;;  %3210 = vmatprep.mubr.f32.mxu0 %v8352_v6  ;;  %v3299_v59 = vld [vmem:[#allocation2 + $0x2b0] sm:$0xff]  ;;  %vm8356_vm9 = vcmask 1043456   ;;  %v4231_v51 = vpack.c.bf16 %v3298_v61, %v3294_v63  ;;  %v4239_v58 = vpack.c.bf16 %v3300_v5, %v3296_v10  ;;  %v3301_v40 = vld [vmem:[#allocation2 + $0x2c0] sm:$0xff]  ;;  %vm8360_vm0 = vmmov %vm8333_vm3 }
 0x1cb   :  { %4228 = vmatprep.subr.bf16.mxu1 %v8350_v24  ;;  %3281 = vmatprep.mubr.f32.mxu1 %v8352_v6  ;;  %vm8357_vm13 = vmmov %vm8356_vm9  ;;  %v4233_v53 = vpack.c.bf16 %v3297_v34, %v3293_v19  ;;  %v4241_v4 = vpack.c.bf16 %v3299_v59, %v3295_v57  ;;  %v4235_v33 = vpack.c.bf16 %v3306_v31, %v3302_v32  ;;  %v3305_v22 = vld [vmem:[#allocation2 + $0x2e0] sm:$0xff]  ;;  %v3303_v47 = vld [vmem:[#allocation2 + $0x2d0] sm:$0xff]  ;;  %v1338_v24 = vmul.f32 0.015625, %v7432_v26 }
 0x1cc   :  { %v7642_v8 = vpop.xlane.xlu1 %1292  ;;  %vm8358_vm14 = vmmov %vm8356_vm9  ;;  %v4243_v23 = vpack.c.bf16 %v3308_v28, %v3304_v60  ;;  %v3307_v38 = vld [vmem:[#allocation2 + $0x2f0] sm:$0xff]  ;;  %v8362_v17 = vld [vmem:[#allocation11_spill] sm:$0xff]  ;;  %v4237_v46 = vpack.c.bf16 %v3305_v22, %v3301_v40  ;;  %v1335_v61 = vmul.f32 0.015625, %v7467_v54  ;;  %v1339_v26 = vmul.f32 0.015625, %v7525_v12 }
 0x1cd   :  { %4222 = vmatpush1.bf16.msra.mxu0 %v8355_v36  ;;  %4230 = vmatpush1.bf16.msra.mxu1 %v4229_v39  ;;  %vm8359_vm11 = vmmov %vm8356_vm9  ;;  %v7646_v39 = vpop.xlane.xlu0 %1283  ;;  %v1333_v48 = vmul.f32 0.015625, %v8362_v17  ;;  %v4245_v30 = vpack.c.bf16 %v3307_v38, %v3303_v47  ;;  %v8363_v45 = vld [vmem:[#allocation47_spill] sm:$0xff]  ;;  %v3310_v9 = vld [vmem:[#allocation2 + $0x308] sm:$0xf]  ;;  %v1343_v34 = vmul.f32 0.015625, %v7547_v20  ;;  %v1342_v20 = vmul.f32 0.015625, %v7523_v14 }
 0x1ce   :  { %4083 = vmatprep.subr.msk.mxu0 %vm8356_vm9, %v2890_v1  ;;  %4086 = vmatprep.subr.msk.mxu1 %vm8357_vm13, %v2892_v25  ;;  %vm8361_vm15 = vmmov %vm8360_vm0  ;;  %v1332_v50 = vmul.f32 0.015625, %v8363_v45  ;;  %v3312_v35 = vld [vmem:[#allocation2 + $0x318] sm:$0xf]  ;;  %v8364_v13 = vld [vmem:[#allocation60_spill] sm:$0xff]  ;;  %v1344_v59 = vmul.f32 0.015625, %v7574_v11  ;;  %v3418_v32 = vrot.slane %v1335_v61, %v5386_v0  ;;  %v3437_v31 = vrot.slane %v1339_v26, %v5351_v27 }
 0x1cf   :  { %v1334_v29 = vmul.f32 0.015625, %v8364_v13  ;;  %v3759_v1 = vld [vmem:[%s7963_s3 + $0x88] sm:$0xff]  ;;  %v3790_v25 = vld [vmem:[%s7963_s3 + $0x180] sm:$0xff]  ;;  %v3408_v19 = vrot.slane %v1333_v48, %v5335_v52  ;;  %vm8366_vm10 = vmmov %vm8356_vm9  ;;  %vm8370_vm3 = vcmask 130112   ;;  %v1348_v11 = vmul.f32 0.015625, %v7609_v41 }
 0x1d0   :  { %v7651_v3 = vpop.xlane.xlu1 %1274  ;;  %v3791_v63 = vld [vmem:[%s7963_s3 + $0x188] sm:$0xff]  ;;  %v3404_v5 = vrot.slane %v1332_v50, %v5332_v49  ;;  %v3309_v15 = vld [vmem:[#allocation2 + $0x300] sm:$0xf]  ;;  %vm8367_vm1 = vmmov %vm8356_vm9  ;;  %vm8371_vm4 = vcmask 195712   ;;  %vm8373_vm7 = vcmask 261312   ;;  %v1345_v17 = vmul.f32 0.015625, %v7633_v44 }
 0x1d1   :  { %4084 = vmatpush1.msk.msra.mxu0 %vm8358_vm14, %v2889_v7  ;;  %4087 = vmatpush1.msk.msra.mxu1 %vm8359_vm11, %v2891_v21  ;;  %v7654_v42 = vpop.xlane.xlu0 %1295  ;;  %v8365_v7 = vld [vmem:[#allocation49_spill] sm:$0xff]  ;;  %v1336_v21 = vmul.f32 0.015625, %v7545_v18  ;;  %v4279_v36 = vpack.c.bf16 %v3791_v63, %v3790_v25  ;;  %v3413_v57 = vrot.slane %v1334_v29, %v5351_v27  ;;  %v3432_v18 = vrot.slane %v1338_v24, %v5335_v52  ;;  %vm8368_vm12 = vmmov %vm8367_vm1 }
 0x1d2   :  { %4085 = vmatmul.mubr.msk.f32.vlgmr.msra.gmra.mrb[0].mxu0 %vm8360_vm0, %v3131_v16  ;;  %4088 = vmatmul.mubr.msk.f32.vlgmr.msra.gmra.mrb[0].mxu1 %vm8361_vm15, %v3131_v16  ;;  %v3758_v16 = vld [vmem:[%s7963_s3 + $0x80] sm:$0xff]  ;;  %v3311_v54 = vld [vmem:[#allocation2 + $0x310] sm:$0xf]  ;;  %vm8369_vm2 = vmmov %vm8367_vm1  ;;  %v3409_v14 = vsel %vm8370_vm3, %v3408_v19, %v3404_v5  ;;  %v3480_v45 = vrot.slane %v1348_v11, %v5335_v52  ;;  %v1346_v13 = vmul.f32 0.015625, %v7651_v3 }
 0x1d3   :  { %4232 = vmatprep.subr.bf16.mxu0 %v4231_v51  ;;  %4240 = vmatprep.subr.bf16.mxu1 %v4239_v58  ;;  %v4247_v12 = vpack.c.bf16 %v3759_v1, %v3758_v16  ;;  %v3423_v28 = vrot.slane %v1336_v21, %v5409_v43  ;;  %v3456_v51 = vrot.slane %v1343_v34, %v5335_v52  ;;  %v1340_v58 = vmul.f32 0.015625, %v7576_v56  ;;  %vm8372_vm5 = vmmov %vm8370_vm3 }
 0x1d4   :  { %4234 = vmatpush1.bf16.msra.mxu0 %v4233_v53  ;;  %4242 = vmatpush1.bf16.msra.mxu1 %v4241_v4  ;;  %v1299_v10 = vpop.xlane.xlu1 %1298  ;;  %v1347_v4 = vmul.f32 0.015625, %v7620_v37  ;;  %v3452_v56 = vrot.slane %v1342_v20, %v5332_v49  ;;  %vm8374_vm8 = vmmov %vm8371_vm4  ;;  %v3466_v1 = vrot.slane %v1345_v17, %v5386_v0 }
 0x1d5   :  { %4236 = vmatprep.subr.bf16.mxu0 %v4235_v33  ;;  %4244 = vmatprep.subr.bf16.mxu1 %v4243_v23  ;;  %v1287_v2 = vpop.xlane.xlu0 %1286  ;;  %v3414_v33 = vsel %vm8371_vm4, %v3413_v57, %v3409_v14  ;;  %v3461_v23 = vrot.slane %v1344_v59, %v5351_v27  ;;  %vm8375_vm9 = vmmov %vm8370_vm3  ;;  %v3442_v48 = vrot.slane %v1340_v58, %v5386_v0  ;;  %v1354_v29 = vmul.f32 0.015625, %v1299_v10 }
 0x1d6   :  { %3630 = vmatprep.mubr.f32.mxu0 %v8352_v6  ;;  %3701 = vmatprep.mubr.f32.mxu1 %v8352_v6  ;;  %v1337_v6 = vmul.f32 0.015625, %v8365_v7  ;;  %v3419_v47 = vsel %vm8373_vm7, %v3418_v32, %v3414_v33  ;;  %v3457_v37 = vsel %vm8375_vm9, %v3456_v51, %v3452_v56  ;;  %v3476_v50 = vrot.slane %v1347_v4, %v5332_v49  ;;  %vm8376_vm13 = vmmov %vm8371_vm4  ;;  %v3743_v4 = vld [vmem:[%s7963_s3 + $0x8] sm:$0xff]  ;;  %v3774_v56 = vld [vmem:[%s7963_s3 + $0x100] sm:$0xff] }
 0x1d7   :  { %v3424_v41 = vsel %vm1715_vm6, %v3423_v28, %v3419_v47  ;;  %v3462_v44 = vsel %vm8376_vm13, %v3461_v23, %v3457_v37  ;;  %v1350_v24 = vmul.f32 0.015625, %v1287_v2  ;;  %vm8377_vm14 = vmmov %vm8373_vm7  ;;  %v3471_v10 = vrot.slane %v1346_v13, %v5409_v43  ;;  %v3775_v23 = vld [vmem:[%s7963_s3 + $0x108] sm:$0xff]  ;;  %v3760_v47 = vld [vmem:[%s7963_s3 + $0x90] sm:$0xff] }
 0x1d8   :  { %4238 = vmatpush1.bf16.msra.mxu0 %v4237_v46  ;;  %4246 = vmatpush1.bf16.msra.mxu1 %v4245_v30  ;;  %v3428_v60 = vrot.slane %v1337_v6, %v5332_v49  ;;  %v1311_v53 = vpop.xlane.xlu1 %1310  ;;  %v1341_v46 = vmul.f32 0.015625, %v7638_v55  ;;  %v1352_v55 = vmul.f32 0.015625, %v7642_v8  ;;  %vm8378_vm11 = vmmov %vm8370_vm3  ;;  %v3509_v8 = vrot.slane %v1354_v29, %v5351_v27  ;;  %v3792_v37 = vld [vmem:[%s7963_s3 + $0x190] sm:$0xff] }
 0x1d9   :  { %4089 = vmatprep.subr.msk.mxu0 %vm8366_vm10, %v3310_v9  ;;  %4092 = vmatprep.subr.msk.mxu1 %vm8367_vm1, %v3312_v35  ;;  %v1308_v40 = vpop.xlane.xlu0 %1307  ;;  %v1349_v9 = vmul.f32 0.015625, %v7646_v39  ;;  %v1353_v35 = vmul.f32 0.015625, %v7654_v42  ;;  %v1358_v39 = vmul.f32 0.015625, %v1311_v53  ;;  %v3481_v7 = vsel %vm8378_vm11, %v3480_v45, %v3476_v50  ;;  %vm8379_vm0 = vmmov %vm8373_vm7 }
 0x1da   :  { %v3433_v22 = vsel %vm8372_vm5, %v3432_v18, %v3428_v60  ;;  %v3447_v26 = vrot.slane %v1341_v46, %v5409_v43  ;;  %v1357_v19 = vmul.f32 0.015625, %v1308_v40  ;;  %v3490_v5 = vrot.slane %v1350_v24, %v5386_v0  ;;  %vm8380_vm15 = vmmov %vm8371_vm4 }
 0x1db   :  { %v3438_v38 = vsel %vm8374_vm8, %v3437_v31, %v3433_v22  ;;  %v3485_v6 = vrot.slane %v1349_v9, %v5351_v27  ;;  %v3504_v3 = vrot.slane %v1353_v35, %v5335_v52  ;;  %v3528_v18 = vrot.slane %v1358_v39, %v5335_v52  ;;  %vm8381_vm10 = vmmov %vm8370_vm3  ;;  %v3744_v35 = vld [vmem:[%s7963_s3 + $0x10] sm:$0xff]  ;;  %v3795_v39 = vld [vmem:[%s7963_s3 + $0x1a8] sm:$0xff] }
 0x1dc   :  { %4090 = vmatpush1.msk.msra.mxu0 %vm8368_vm12, %v3309_v15  ;;  %4093 = vmatpush1.msk.msra.mxu1 %vm8369_vm2, %v3311_v54  ;;  %v1302_v30 = vpop.xlane.xlu1 %1301  ;;  %v3443_v61 = vsel %vm8377_vm14, %v3442_v48, %v3438_v38  ;;  %v3467_v15 = vsel %vm8379_vm0, %v3466_v1, %v3462_v44  ;;  %v3500_v54 = vrot.slane %v1352_v55, %v5332_v49  ;;  %vm8382_vm1 = vmmov %vm8371_vm4  ;;  %vm8384_vm2 = vcmask 1042434   ;;  %v3793_v48 = vld [vmem:[%s7963_s3 + $0x198] sm:$0xff]  ;;  %v3776_v1 = vld [vmem:[%s7963_s3 + $0x110] sm:$0xff] }
 0x1dd   :  { %4248 = vmatprep.subr.bf16.mxu0 %v4247_v12  ;;  %4280 = vmatprep.subr.bf16.mxu1 %v4279_v36  ;;  %v1290_v16 = vpop.xlane.xlu0 %1289  ;;  %v1355_v25 = vmul.f32 0.015625, %v1302_v30  ;;  %v3448_v57 = vsel %vm1715_vm6, %v3447_v26, %v3443_v61  ;;  %v3524_v20 = vrot.slane %v1357_v19, %v5332_v49  ;;  %v3486_v31 = vsel %vm8380_vm15, %v3485_v6, %v3481_v7  ;;  %vm8383_vm12 = vmmov %vm8379_vm0  ;;  %v3742_v49 = vld [vmem:[%s7963_s3] sm:$0xff]  ;;  %v3777_v55 = vld [vmem:[%s7963_s3 + $0x118] sm:$0xff] }
 0x1de   :  { %v1351_v63 = vmul.f32 0.015625, %v1290_v16  ;;  %v3505_v60 = vsel %vm8381_vm10, %v3504_v3, %v3500_v54  ;;  %v3472_v53 = vsel %vm1715_vm6, %v3471_v10, %v3467_v15  ;;  %v3491_v11 = vsel %vm8383_vm12, %v3490_v5, %v3486_v31  ;;  %vm8385_vm3 = vmmov %vm8379_vm0  ;;  %v3745_v16 = vld [vmem:[%s7963_s3 + $0x18] sm:$0xff]  ;;  %v3763_v61 = vld [vmem:[%s7963_s3 + $0xa8] sm:$0xff] }
 0x1df   :  { %v3514_v12 = vrot.slane %v1355_v25, %v5386_v0  ;;  %v3510_v14 = vsel %vm8382_vm1, %v3509_v8, %v3505_v60  ;;  %vm8386_vm4 = vcmask 1043459   ;;  %v3529_v38 = vsel %vm8372_vm5, %v3528_v18, %v3524_v20  ;;  %vm8388_vm8 = vmmov %vm8382_vm1  ;;  %v3762_v25 = vld [vmem:[%s7963_s3 + $0xa0] sm:$0xff]  ;;  %v3747_v6 = vld [vmem:[%s7963_s3 + $0x28] sm:$0xff] }
 0x1e0   :  { %v1305_v42 = vpop.xlane.xlu1 %1304  ;;  %v3495_v36 = vrot.slane %v1351_v63, %v5409_v43  ;;  %vm8387_vm7 = vcmask 1044484   ;;  %vm8389_vm9 = vcmask 1045509   ;;  %vm8390_vm13 = vmmov %vm8379_vm0  ;;  %v4249_v50 = vpack.c.bf16 %v3743_v4, %v3742_v49  ;;  %v3794_v26 = vld [vmem:[%s7963_s3 + $0x1a0] sm:$0xff]  ;;  %v3779_v10 = vld [vmem:[%s7963_s3 + $0x128] sm:$0xff] }
 0x1e1   :  { %v1356_v21 = vmul.f32 0.015625, %v1305_v42  ;;  %v1314_v34 = vpop.xlane.xlu0 %1313  ;;  %v3515_v40 = vsel %vm8385_vm3, %v3514_v12, %v3510_v14  ;;  %v4281_v9 = vpack.c.bf16 %v3775_v23, %v3774_v56  ;;  %vm8391_vm14 = vcmask 1046534   ;;  %v3746_v7 = vld [vmem:[%s7963_s3 + $0x20] sm:$0xff]  ;;  %v3764_v8 = vld [vmem:[%s7963_s3 + $0xb0] sm:$0xff]  ;;  %v3765_v5 = vld [vmem:[%s7963_s3 + $0xb8] sm:$0xff] }
 0x1e2   :  { %v1359_v2 = vmul.f32 0.015625, %v1314_v34  ;;  %v3496_v33 = vsel %vm1715_vm6, %v3495_v36, %v3491_v11  ;;  %v4283_v24 = vpack.c.bf16 %v3793_v48, %v3792_v37  ;;  %vm8392_vm11 = vcmask 1047559   ;;  %v3778_v34 = vld [vmem:[%s7963_s3 + $0x120] sm:$0xff]  ;;  %v3797_v15 = vld [vmem:[%s7963_s3 + $0x1b8] sm:$0xff]  ;;  %v3748_v36 = vld [vmem:[%s7963_s3 + $0x30] sm:$0xff] }
 0x1e3   :  { %v3519_v59 = vrot.slane %v1356_v21, %v5409_v43  ;;  %v4253_v19 = vpack.c.bf16 %v3745_v16, %v3744_v35  ;;  %v4285_v42 = vpack.c.bf16 %v3777_v55, %v3776_v1  ;;  %v4255_v3 = vpack.c.bf16 %v3763_v61, %v3762_v25  ;;  %v3766_v31 = vld [vmem:[%s7963_s3 + $0xc0] sm:$0xff]  ;;  %v3767_v60 = vld [vmem:[%s7963_s3 + $0xc8] sm:$0xff]  ;;  %v3801_v56 = vld [vmem:[%s7963_s3 + $0x1d8] sm:$0xff] }
 0x1e4   :  { %v1320_v32 = vpop.xlane.xlu1 %1319  ;;  %v3533_v28 = vrot.slane %v1359_v2, %v5351_v27  ;;  %v3546_v27 = vsel %vm8384_vm2, %v3424_v41, %v7629_v62  ;;  %v3761_v41 = vld [vmem:[%s7963_s3 + $0x98] sm:$0xff]  ;;  %v4287_v21 = vpack.c.bf16 %v3795_v39, %v3794_v26  ;;  %v3796_v2 = vld [vmem:[%s7963_s3 + $0x1b0] sm:$0xff]  ;;  %v4257_v54 = vpack.c.bf16 %v3747_v6, %v3746_v7  ;;  %v3750_v14 = vld [vmem:[%s7963_s3 + $0x40] sm:$0xff] }
 0x1e5   :  { %v1317_v51 = vpop.xlane.xlu0 %1316  ;;  %v1361_v58 = vmul.f32 0.015625, %v1320_v32  ;;  %v3547_v62 = vsel %vm8386_vm4, %v3448_v57, %v3546_v27  ;;  %v3520_v17 = vsel %vm1715_vm6, %v3519_v59, %v3515_v40  ;;  %v4251_v29 = vpack.c.bf16 %v3761_v41, %v3760_v47  ;;  %v3749_v57 = vld [vmem:[%s7963_s3 + $0x38] sm:$0xff]  ;;  %v3780_v59 = vld [vmem:[%s7963_s3 + $0x130] sm:$0xff]  ;;  %v3751_v11 = vld [vmem:[%s7963_s3 + $0x48] sm:$0xff] }
 0x1e6   :  { %v1360_v52 = vmul.f32 0.015625, %v1317_v51  ;;  %v3548_v46 = vsel %vm8387_vm7, %v3472_v53, %v3547_v62  ;;  %v3534_v30 = vsel %vm8388_vm8, %v3533_v28, %v3529_v38  ;;  %v4289_v12 = vpack.c.bf16 %v3779_v10, %v3778_v34  ;;  %v3781_v32 = vld [vmem:[%s7963_s3 + $0x138] sm:$0xff]  ;;  %v3798_v28 = vld [vmem:[%s7963_s3 + $0x1c0] sm:$0xff]  ;;  %v3799_v51 = vld [vmem:[%s7963_s3 + $0x1c8] sm:$0xff] }
 0x1e7   :  { %v3543_v22 = vrot.slane %v1361_v58, %v5409_v43  ;;  %v3549_v45 = vsel %vm8389_vm9, %v3496_v33, %v3548_v46  ;;  %v4259_v18 = vpack.c.bf16 %v3765_v5, %v3764_v8  ;;  %v4291_v20 = vpack.c.bf16 %v3797_v15, %v3796_v2  ;;  %v3782_v4 = vld [vmem:[%s7963_s3 + $0x140] sm:$0xff]  ;;  %v3783_v27 = vld [vmem:[%s7963_s3 + $0x148] sm:$0xff]  ;;  %v3768_v40 = vld [vmem:[%s7963_s3 + $0xd0] sm:$0xff] }
 0x1e8   :  { %v3538_v43 = vrot.slane %v1360_v52, %v5386_v0  ;;  %v3550_v13 = vsel %vm8391_vm14, %v3520_v17, %v3549_v45  ;;  %v4261_v58 = vpack.c.bf16 %v3749_v57, %v3748_v36  ;;  %v4293_v53 = vpack.c.bf16 %v3781_v32, %v3780_v59  ;;  %v3769_v33 = vld [vmem:[%s7963_s3 + $0xd8] sm:$0xff]  ;;  %v3752_v62 = vld [vmem:[%s7963_s3 + $0x50] sm:$0xff]  ;;  %v3770_v48 = vld [vmem:[%s7963_s3 + $0xe0] sm:$0xff] }
 0x1e9   :  { %v4263_v52 = vpack.c.bf16 %v3767_v60, %v3766_v31  ;;  %v4295_v49 = vpack.c.bf16 %v3799_v51, %v3798_v28  ;;  %v4265_v23 = vpack.c.bf16 %v3751_v11, %v3750_v14  ;;  %v4297_v47 = vpack.c.bf16 %v3783_v27, %v3782_v4  ;;  %v3753_v38 = vld [vmem:[%s7963_s3 + $0x58] sm:$0xff]  ;;  %v3784_v41 = vld [vmem:[%s7963_s3 + $0x150] sm:$0xff]  ;;  %v3771_v46 = vld [vmem:[%s7963_s3 + $0xe8] sm:$0xff] }
 0x1ea   :  { %v3539_v0 = vsel %vm8390_vm13, %v3538_v43, %v3534_v30  ;;  %v4267_v17 = vpack.c.bf16 %v3769_v33, %v3768_v40  ;;  %v3785_v37 = vld [vmem:[%s7963_s3 + $0x158] sm:$0xff]  ;;  %v3802_v30 = vld [vmem:[%s7963_s3 + $0x1e0] sm:$0xff]  ;;  %v3803_v45 = vld [vmem:[%s7963_s3 + $0x1e8] sm:$0xff] }
 0x1eb   :  { %v3544_v44 = vsel %vm1715_vm6, %v3543_v22, %v3539_v0  ;;  %vm8393_vm6 = vcmask 293888   ;;  %v3800_v22 = vld [vmem:[%s7963_s3 + $0x1d0] sm:$0xff]  ;;  %v4269_v0 = vpack.c.bf16 %v3753_v38, %v3752_v62  ;;  %v4303_v35 = vpack.c.bf16 %v3803_v45, %v3802_v30  ;;  %v3754_v16 = vld [vmem:[%s7963_s3 + $0x60] sm:$0xff]  ;;  %v3773_v25 = vld [vmem:[%s7963_s3 + $0xf8] sm:$0xff] }
 0x1ec   :  { %v3551_v63 = vsel %vm8392_vm11, %v3544_v44, %v3550_v13  ;;  %vm8394_vm0 = vmmov %vm8393_vm6  ;;  %v4299_v43 = vpack.c.bf16 %v3801_v56, %v3800_v22  ;;  %v3755_v44 = vld [vmem:[%s7963_s3 + $0x68] sm:$0xff]  ;;  %v3772_v1 = vld [vmem:[%s7963_s3 + $0xf0] sm:$0xff] }
 0x1ed   :  { %4091 = vmatmul.mubr.msk.f32.vlgmr.msra.gmra.mrb[0].mxu0 %vm8393_vm6, %v3551_v63  ;;  %4094 = vmatmul.mubr.msk.f32.vlgmr.msra.gmra.mrb[0].mxu1 %vm8394_vm0, %v3551_v63  ;;  %v4273_v13 = vpack.c.bf16 %v3755_v44, %v3754_v16  ;;  %v3804_v63 = vld [vmem:[%s7963_s3 + $0x1f0] sm:$0xff]  ;;  %v3805_v61 = vld [vmem:[%s7963_s3 + $0x1f8] sm:$0xff]  ;;  %v4275_v26 = vpack.c.bf16 %v3773_v25, %v3772_v1  ;;  %v3712_v5 = vld [vmem:[%s7962_s2] sm:$0xf] }
 0x1ee   :  { %4250 = vmatpush3.bf16.msra.mxu0 %v4249_v50  ;;  %4282 = vmatpush3.bf16.msra.mxu1 %v4281_v9  ;;  %v4301_v50 = vpack.c.bf16 %v3785_v37, %v3784_v41  ;;  %v4271_v9 = vpack.c.bf16 %v3771_v46, %v3770_v48  ;;  %v3756_v39 = vld [vmem:[%s7963_s3 + $0x70] sm:$0xff]  ;;  %v4307_v7 = vpack.c.bf16 %v3805_v61, %v3804_v63  ;;  %v4095_v4 = vld [vmem:[%s7964_s4] ss:$0 sm:$0xff]  ;;  %s4805_s4 = smov [#allocation5]  }
 0x1ef   :  { %4252 = vmatprep.subr.bf16.mxu0 %v4251_v29  ;;  %4284 = vmatprep.subr.bf16.mxu1 %v4283_v24  ;;  %v3786_v29 = vld [vmem:[%s7963_s3 + $0x160] sm:$0xff]  ;;  %v3787_v24 = vld [vmem:[%s7963_s3 + $0x168] sm:$0xff]  ;;  %v8395_v34 = vld [vmem:[#allocation29_spill] sm:$0xff]  ;;  %s3976_s21 = sshll.u32 %s4805_s4, 4  ;;  %s3977_s21 = int_to_ptr.vmem [resolvable:$true] %s3976_s21 }
 0x1f0   :  { %v4305_v55 = vpack.c.bf16 %v3787_v24, %v3786_v29  ;;  %v3716_v10 = vsub.s32 0, %v8395_v34  ;;  %v3724_v8 = vsub.s32 2, %v8395_v34  ;;  %v3720_v2 = vsub.s32 1, %v8395_v34  ;;  %v3953_v62 = vld [vmem:[%s7965_s5] sm:$0x1]  ;;  %s4774_s22 = scalar_lea.vmem %s3977_s21, 128  ;;  %p4779_p9 = scmp.lt.s32.totalorder %s3977_s21, %s3977_s21 }
 0x1f1   :  { %v3728_v15 = vsub.s32 3, %v8395_v34  ;;  %vm3954_vm15 = vcmp.gt.f32.partialorder %v3953_v62, 0.5  ;;  %p4775_p8 = scmp.ne.s32.totalorder %s3977_s21, %s4774_s22  ;;  %p4780_p10 = scmp.lt.s32.totalorder %s4774_s22, %s4774_s22 }
 0x1f2   :  { %4254 = vmatpush3.bf16.msra.mxu0 %v4253_v19  ;;  %4286 = vmatpush3.bf16.msra.mxu1 %v4285_v42  ;;  %v3757_v19 = vld [vmem:[%s7963_s3 + $0x78] sm:$0xff]  ;;  %v3788_v42 = vld [vmem:[%s7963_s3 + $0x170] sm:$0xff]  ;;  %v3721_v36 = vrot.slane %v3712_v5, %v3720_v2 }
 0x1f3   :  { %4256 = vmatprep.subr.bf16.mxu0 %v4255_v3  ;;  %4288 = vmatprep.subr.bf16.mxu1 %v4287_v21  ;;  %v4277_v6 = vpack.c.bf16 %v3757_v19, %v3756_v39  ;;  %v3789_v3 = vld [vmem:[%s7963_s3 + $0x178] sm:$0xff]  ;;  %v3729_v57 = vrot.slane %v3712_v5, %v3728_v15  ;;  %p4781_p11 = por %p4780_p10, %p4779_p9 }
 0x1f4   :  { %v4309_v21 = vpack.c.bf16 %v3789_v3, %v3788_v42 }
 0x1f5   :  { %p4782_p12 = pnand %p4781_p11, %p4775_p8 }
 0x1f6   :  { %4258 = vmatpush3.bf16.msra.mxu0 %v4257_v54  ;;  %4290 = vmatpush3.bf16.msra.mxu1 %v4289_v12  ;;  %v3717_v54 = vrot.slane %v3712_v5, %v3716_v10  ;;  %v3725_v12 = vrot.slane %v3712_v5, %v3724_v8 }
 0x1f7   :  { %4260 = vmatprep.subr.bf16.mxu0 %v4259_v18  ;;  %4292 = vmatprep.subr.bf16.mxu1 %v4291_v20 }
 0x1fa   :  { %4262 = vmatpush3.bf16.msra.mxu0 %v4261_v58  ;;  %4294 = vmatpush3.bf16.msra.mxu1 %v4293_v53 }
 0x1fb   :  { %4264 = vmatprep.subr.bf16.mxu0 %v4263_v52  ;;  %4296 = vmatprep.subr.bf16.mxu1 %v4295_v49 }
 0x1fe   :  { %4266 = vmatpush3.bf16.msra.mxu0 %v4265_v23  ;;  %4298 = vmatpush3.bf16.msra.mxu1 %v4297_v47 }
 0x1ff   :  { %4268 = vmatprep.subr.bf16.mxu0 %v4267_v17  ;;  %4300 = vmatprep.subr.bf16.mxu1 %v4299_v43  ;;  %v4804_v43 = vmov 0  }
 0x200   :  { %v3961_v41 = vsel %vm3954_vm15, 1, %v4804_v43 }
 0x201   :  { %v3965_v37 = vrot.slane %v3961_v41, %v3716_v10 }
 0x202   :  { %4270 = vmatpush3.bf16.msra.mxu0 %v4269_v0  ;;  %4302 = vmatpush3.bf16.msra.mxu1 %v4301_v50 }
 0x203   :  { %4272 = vmatprep.subr.bf16.mxu0 %v4271_v9  ;;  %4304 = vmatprep.subr.bf16.mxu1 %v4303_v35  ;;  %vm3966_vm10 = vcmp.eq.s32.totalorder %v3965_v37, 1 }
 0x206   :  { %4274 = vmatpush3.bf16.msra.mxu0 %v4273_v13  ;;  %4306 = vmatpush3.bf16.msra.mxu1 %v4305_v55 }
 0x207   :  { %4276 = vmatprep.subr.bf16.mxu0 %v4275_v26  ;;  %4308 = vmatprep.subr.bf16.mxu1 %v4307_v7 }
 0x20a   :  { %4278 = vmatpush3.bf16.msra.mxu0 %v4277_v6  ;;  %4310 = vmatpush3.bf16.msra.mxu1 %v4309_v21 }
 0x2c0   :  { %v3632_v18 = vpop.f32.mrb[0].mxu0  ;;  %v3703_v20 = vpop.f32.mrb[0].mxu1 }
 0x2c1   :  { %v3734_v59 = vadd.f32 %v3717_v54, %v3632_v18  ;;  %v3736_v32 = vadd.f32 %v3725_v12, %v3703_v20  ;;  %v3634_v31 = vpop.f32.mrb[1].mxu0  ;;  %v3705_v60 = vpop.f32.mrb[1].mxu1 }
 0x2c2   :  { %v3735_v28 = vadd.f32 %v3721_v36, %v3634_v31  ;;  %v3737_v51 = vadd.f32 %v3729_v57, %v3705_v60 }
 0x2c3   :  { %v3738_v14 = vmax.f32 %v3734_v59, 0.0  ;;  %v3740_v11 = vmax.f32 %v3736_v32, 0.0 }
 0x2c4   :  { %v3739_v58 = vmax.f32 %v3735_v28, 0.0  ;;  %v3741_v53 = vmax.f32 %v3737_v51, 0.0 }
 0x2c6   :  { %3877 = vmatprep.mubr.f32.mxu0 %v3739_v58  ;;  %3947 = vmatprep.mubr.f32.mxu1 %v3741_v53 }
 0x2c7   :  { %3878 = vmatmul.mubr.f32.vlgmr.msra.gmra.mrb[2].mxu0 %v3738_v14  ;;  %3948 = vmatmul.mubr.f32.vlgmr.msra.gmra.mrb[2].mxu1 %v3740_v11 }
 0x39a   :  { %v4129_v52 = vpop.f32.mrb[2].mxu0  ;;  %v4164_v49 = vpop.f32.mrb[2].mxu1 }
 0x39b   :  { %v4130_v27 = vpop.f32.mrb[3].mxu0  ;;  %v4165_v40 = vpop.f32.mrb[3].mxu1 }
 0x39c   :  { %v4131_v33 = vadd.f32 %v4130_v27, %v4129_v52  ;;  %v4166_v22 = vadd.f32 %v4165_v40, %v4164_v49 }
 0x39e   :  { %v3880_v56 = vadd.f32 %v4131_v33, %v4095_v4 }
 0x3a0   :  { %v3950_v23 = vadd.f32 %v4166_v22, %v3880_v56 }
 0x3a2   :  { %v4096_v47 = vmul.f32 -1.442695, %v3950_v23 }
 0x3a4   :  { %4733 = vpow2.f32 %v4096_v47 }
 0x3ae   :  { %v4734_v38 = vpop.eup %4733 }
 0x3af   :  { %v3958_v17 = vadd.f32 1.0, %v4734_v38 }
 0x3b1   :  { %4735 = vrcp.f32 %v3958_v17 }
 0x3bb   :  { %v4736_v48 = vpop.eup %4735 }
 0x3bc   :  { %v3967_v46 = vsel %vm3966_vm10, %v4736_v48, %v3950_v23 }
 0x3bd   :  { %v3968_v30 = vmax.f32 %v3967_v46, 0.0 }
 0x3bf   :  { %3969 = vst [vmem:[#allocation5] sm:$0xff] %v3968_v30 }
 0x3c0   :  { %4785 = shalt.err (!%p4782_p12)
}
 0x3c1   :  { %s4786_s24 = scalar_lea.hbm %s7966_s6, 128 }
 0x3c2   :  { %p4787_p13 = scmp.ne.s32.totalorder %s7966_s6, %s4786_s24  ;;  %p4790_p0 = scmp.lt.u32.totalorder %s4786_s24, %s7966_s6 }
 0x3c4   :  { %p4792_p1 = pnand %p4790_p0, %p4787_p13 }
 0x3c6   :  { %4795 = shalt.err (!%p4792_p1)
}
 0x3c7   :  { %3979 = dma.vmem_to_hbm [thread:$0]  %s3977_s21, 128, %s7966_s6, [#allocation4]  }
 0x3c8   :  { %4798 = dma.done.wait [#allocation4], 128  }
 0x3c9   :  { %4799 = vsyncadd [#allocation4], 4294967168 }
 0x3ca   :  { %3983 = vsyncpa [#allocation3], 1 }
 0x3cb   :  { %3984 = vsyncpa [#allocation4], 1 }

</bundles_post_ra>
